<compile_context>
chip_gen: v5e
topology: v5e:2x2
jax: 0.10.0
libtpu: 0.0.40
codegen_flags: <defaults>
</compile_context>

<pallas_src>
import functools

import jax
import jax.numpy as jnp
from jax.experimental import pallas as pl
from jax.experimental.pallas import tpu as pltpu

_LANES = 128


def _dual_attention_kernel(Bt, C, H, W, x_ref, eca_ref, w1p_ref, w2p_ref,
                           o_ref, xpad1, xpad2):
    f32 = jnp.float32
    SEG1 = W + 2            # per-channel lane segment width for the 3x3 conv
    SEG2 = W + 6            # per-channel lane segment width for the 7x7 conv
    PK1 = C * SEG1          # active packed lanes, conv1
    PK2 = C * SEG2          # active packed lanes, conv2

    # Zero both packed padding buffers once per grid step.  Interiors are
    # fully overwritten per image below; the pad ring and tail lanes (>= PK)
    # stay zero for the whole step.  Unconditional (no pl.when(pid == 0)) so
    # the kernel is correct when the batch grid axis is sharded across cores.
    xpad1[...] = jnp.zeros((H + 2, _LANES), f32)
    xpad2[...] = jnp.zeros((H + 6, _LANES), f32)

    for bi in range(Bt):
        # ---------------- ECA channel gate ----------------
        xs = [x_ref[bi, c] for c in range(C)]                          # (H, W)
        a = [jnp.mean(xs[c], axis=(0, 1), keepdims=True) for c in range(C)]

        for c in range(C):
            # 1-D conv (k=3, pad=1, no bias) across the channel axis.
            y = eca_ref[1] * a[c]
            if c - 1 >= 0:
                y = y + eca_ref[0] * a[c - 1]
            if c + 1 < C:
                y = y + eca_ref[2] * a[c + 1]
            s = jax.nn.sigmoid(y)                                      # (1, 1)
            # x_ca[c] lives in the interior of xpad1's channel segment c and
            # is re-read from there for the final residual.
            xpad1[1:H + 1, c * SEG1 + 1:c * SEG1 + 1 + W] = xs[c] * s

        # ------ SpatialGate conv1: 3x3 C->C, InstanceNorm, ReLU (packed) ----
        # One shifted window per tap covers all C input channels; per-tap /
        # per-output-channel weights are pre-broadcast per lane segment.
        accs = [jnp.zeros((H, PK1), f32) for _ in range(C)]
        for kh in range(3):
            for kw in range(3):
                win = xpad1[kh:kh + H, kw:kw + PK1]                    # (H, PK1)
                tap = kh * 3 + kw
                for o in range(C):
                    wvec = w1p_ref[tap, o][:, :PK1]                    # (1, PK1)
                    accs[o] = accs[o] + wvec * win

        for o in range(C):
            # Sum over input-channel segments -> (H, W).
            acc = accs[o][:, 0:W]
            for c in range(1, C):
                acc = acc + accs[o][:, c * SEG1:c * SEG1 + W]
            mu = jnp.mean(acc, axis=(0, 1), keepdims=True)
            d = acc - mu
            var = jnp.mean(d * d, axis=(0, 1), keepdims=True)
            normed = d * jax.lax.rsqrt(var + 1e-5)
            xpad2[3:H + 3, o * SEG2 + 3:o * SEG2 + 3 + W] = jnp.maximum(
                normed, 0.0)

        # ----- SpatialGate conv2: 7x7 C->1, InstanceNorm, sigmoid (packed) --
        acc2 = [jnp.zeros((H, PK2), f32) for _ in range(2)]            # 2-way
        for kh in range(7):
            for kw in range(7):
                win = xpad2[kh:kh + H, kw:kw + PK2]                    # (H, PK2)
                tap = kh * 7 + kw
                wvec = w2p_ref[tap][:, :PK2]                           # (1, PK2)
                acc2[tap & 1] = acc2[tap & 1] + wvec * win
        sp = acc2[0] + acc2[1]                                         # (H, PK2)
        s2 = sp[:, 0:W]
        for c in range(1, C):
            s2 = s2 + sp[:, c * SEG2:c * SEG2 + W]
        mu2 = jnp.mean(s2, axis=(0, 1), keepdims=True)
        d2 = s2 - mu2
        var2 = jnp.mean(d2 * d2, axis=(0, 1), keepdims=True)
        att = jax.nn.sigmoid(d2 * jax.lax.rsqrt(var2 + 1e-5))          # (H, W)

        # out = SpatialGate(x_ca) + x_ca = x_ca * (1 + attention).
        gain = 1.0 + att
        outs = [xpad1[1:H + 1, c * SEG1 + 1:c * SEG1 + 1 + W] * gain
                for c in range(C)]
        o_ref[bi] = jnp.stack(outs, axis=0)                            # (C,H,W)


def _default_grid_steps(batch):
    """1 grid step on single-TensorCore chips (v5e / v6e 'lite'), otherwise 2
    so a 'parallel' batch axis can feed both TensorCores (megacore / v7x)."""
    if batch <= 1:
        return 1
    try:
        kind = jax.devices()[0].device_kind.lower()
    except Exception:
        kind = ""
    single_core = ("lite" in kind) or ("v5e" in kind) or ("v6e" in kind)
    steps = 1 if single_core else 2
    if batch % steps:
        steps = 1
    return steps


def dual_attention(x, eca_w, w1, w2, grid_steps=None):
    B, C, H, W = x.shape
    SEG1, SEG2 = W + 2, W + 6
    # Lane-packed layout must fit in one 128-lane row (incl. kw slop).
    assert C * SEG1 + 2 <= _LANES and C * SEG2 + 6 <= _LANES, (
        "channel-packed lane layout requires C*(W+6)+6 <= 128")
    # TODO(synk): for larger C/W (C*(W+6)+6 > 128) switch conv1 to an
    # im2col + MXU matmul path instead of the packed-lane VPU path.

    if grid_steps is None:
        grid_steps = _default_grid_steps(B)
    assert B % grid_steps == 0
    Bt = B // grid_steps

    eca_flat = eca_w.reshape(-1).astype(jnp.float32)                   # (3,)

    # conv1 weights packed per tap along the channel-segmented lane axis:
    # w1p[tap, o, 0, c*SEG1:(c+1)*SEG1] == w1[o, c, kh, kw], tap = kh*3 + kw.
    w1_t = jnp.transpose(w1, (2, 3, 0, 1)).reshape(9, C, C)
    w1p = jnp.pad(jnp.repeat(w1_t, SEG1, axis=2),
                  ((0, 0), (0, 0), (0, _LANES - C * SEG1)))
    w1p = w1p.reshape(9, C, 1, _LANES).astype(jnp.float32)

    # conv2 weights: w2p[tap, 0, c*SEG2:(c+1)*SEG2] == w2[0, c, kh, kw].
    w2_t = jnp.transpose(w2[0], (1, 2, 0)).reshape(49, C)
    w2p = jnp.pad(jnp.repeat(w2_t, SEG2, axis=1),
                  ((0, 0), (0, _LANES - C * SEG2)))
    w2p = w2p.reshape(49, 1, _LANES).astype(jnp.float32)

    kernel = functools.partial(_dual_attention_kernel, Bt, C, H, W)
    return pl.pallas_call(
        kernel,
        out_shape=jax.ShapeDtypeStruct((B, C, H, W), jnp.float32),
        grid=(grid_steps,),
        in_specs=[
            pl.BlockSpec((Bt, C, H, W), lambda g: (g, 0, 0, 0)),
            pl.BlockSpec(memory_space=pltpu.MemorySpace.SMEM),
            pl.BlockSpec((9, C, 1, _LANES), lambda g: (0, 0, 0, 0)),
            pl.BlockSpec((49, 1, _LANES), lambda g: (0, 0, 0)),
        ],
        out_specs=pl.BlockSpec((Bt, C, H, W), lambda g: (g, 0, 0, 0)),
        scratch_shapes=[
            pltpu.VMEM((H + 2, _LANES), jnp.float32),   # packed 3x3 conv input
            pltpu.VMEM((H + 6, _LANES), jnp.float32),   # packed 7x7 conv input
        ],
        compiler_params=pltpu.CompilerParams(
            # Batch steps are independent -> allow megacore / v7x sharding.
            dimension_semantics=("parallel",),
        ),
    )(x, eca_flat, w1p, w2p)


def dual_attention_reference(x, eca_w, w1, w2):
    """Pure-JAX reference mirroring the PyTorch forward pass."""
    B, C, H, W = x.shape
    ew = eca_w.reshape(-1)                               # Conv1d(1,1,3) weight
    # ECA
    avg = jnp.mean(x, axis=(2, 3))                       # (B, C)
    avg_p = jnp.pad(avg, ((0, 0), (1, 1)))
    y = (ew[0] * avg_p[:, 0:C] + ew[1] * avg_p[:, 1:C + 1]
         + ew[2] * avg_p[:, 2:C + 2])
    x_ca = x * jax.nn.sigmoid(y)[:, :, None, None]
    # SpatialGate conv1 (3x3) + InstanceNorm + ReLU
    c1 = jax.lax.conv_general_dilated(
        x_ca, w1, (1, 1), ((1, 1), (1, 1)),
        dimension_numbers=("NCHW", "OIHW", "NCHW"))
    mu = jnp.mean(c1, axis=(2, 3), keepdims=True)
    var = jnp.mean((c1 - mu) ** 2, axis=(2, 3), keepdims=True)
    c1 = jnp.maximum((c1 - mu) * jax.lax.rsqrt(var + 1e-5), 0.0)
    # SpatialGate conv2 (7x7) + InstanceNorm + sigmoid
    c2 = jax.lax.conv_general_dilated(
        c1, w2, (1, 1), ((3, 3), (3, 3)),
        dimension_numbers=("NCHW", "OIHW", "NCHW"))
    mu2 = jnp.mean(c2, axis=(2, 3), keepdims=True)
    var2 = jnp.mean((c2 - mu2) ** 2, axis=(2, 3), keepdims=True)
    att = jax.nn.sigmoid((c2 - mu2) * jax.lax.rsqrt(var2 + 1e-5))
    return x_ca * att + x_ca


if __name__ == "__main__":
    B, C, H, W = 2, 4, 16, 16
    key = jax.random.PRNGKey(0)
    kx, k1, k2, k3 = jax.random.split(key, 4)

    x = jax.random.normal(kx, (B, C, H, W), jnp.float32)
    eca_w = 0.3 * jax.random.normal(k1, (1, 1, 3), jnp.float32)   # Conv1d(1,1,3)
    w1 = 0.2 * jax.random.normal(k2, (C, C, 3, 3), jnp.float32)   # Conv2d(C,C,3)
    w2 = 0.1 * jax.random.normal(k3, (1, C, 7, 7), jnp.float32)   # Conv2d(C,1,7)

    out = jax.block_until_ready(dual_attention(x, eca_w, w1, w2))
    ref = jax.block_until_ready(dual_attention_reference(x, eca_w, w1, w2))

    assert out.shape == (B, C, H, W)
    max_err = jnp.max(jnp.abs(out - ref))
    assert jnp.allclose(out, ref, atol=1e-3, rtol=1e-3), f"max abs err {max_err}"

    print("KERNEL_OK")
</pallas_src>

<mosaic_0001>
module attributes {stable_mosaic.version = 11 : i64} {
  func.func @_dual_attention_kernel(%arg0: i32, %arg1: memref<1x4x16x16xf32, #tpu.memory_space<vmem>>, %arg2: memref<3xf32, #tpu.memory_space<smem>>, %arg3: memref<9x4x1x128xf32, #tpu.memory_space<vmem>>, %arg4: memref<49x1x128xf32, #tpu.memory_space<vmem>>, %arg5: memref<1x4x16x16xf32, #tpu.memory_space<vmem>>, %arg6: memref<18x128xf32, #tpu.memory_space<vmem>>, %arg7: memref<22x128xf32, #tpu.memory_space<vmem>>) attributes {dimension_semantics = [#tpu.dimension_semantics<parallel>], iteration_bounds = array<i64: 2>, scalar_prefetch = 0 : i64, scratch_operands = 2 : i64, tpu.core_type = #tpu.core_type<tc>, window_params = [{transform_indices = @transform_0, window_bounds = array<i64: 1, 4, 16, 16>}, {transform_indices = @transform_1, window_bounds = array<i64: 3>}, {pipeline_mode = #tpu.pipeline_mode<synchronous>, transform_indices = @transform_2, window_bounds = array<i64: 9, 4, 1, 128>}, {pipeline_mode = #tpu.pipeline_mode<synchronous>, transform_indices = @transform_3, window_bounds = array<i64: 49, 1, 128>}, {transform_indices = @transform_4, window_bounds = array<i64: 1, 4, 16, 16>}]} {
    %cst = arith.constant 0.000000e+00 : f32
    %0 = vector.broadcast %cst : f32 to vector<18x128xf32>
    %c0 = arith.constant 0 : index
    %c0_0 = arith.constant 0 : index
    %1 = vector.load %arg6[%c0, %c0_0] : memref<18x128xf32, #tpu.memory_space<vmem>>, vector<18x128xf32>
    tpu.vector_store %arg6[%c0, %c0_0], %0 {strides = array<i32>} : memref<18x128xf32, #tpu.memory_space<vmem>>, vector<18x128xf32>,
    %cst_1 = arith.constant 0.000000e+00 : f32
    %2 = vector.broadcast %cst_1 : f32 to vector<22x128xf32>
    %c0_2 = arith.constant 0 : index
    %c0_3 = arith.constant 0 : index
    %3 = vector.load %arg7[%c0_2, %c0_3] : memref<22x128xf32, #tpu.memory_space<vmem>>, vector<22x128xf32>
    tpu.vector_store %arg7[%c0_2, %c0_3], %2 {strides = array<i32>} : memref<22x128xf32, #tpu.memory_space<vmem>>, vector<22x128xf32>,
    %c0_4 = arith.constant 0 : index
    %c0_5 = arith.constant 0 : index
    %c0_6 = arith.constant 0 : index
    %c0_7 = arith.constant 0 : index
    %4 = vector.load %arg1[%c0_4, %c0_5, %c0_6, %c0_7] : memref<1x4x16x16xf32, #tpu.memory_space<vmem>>, vector<1x1x16x16xf32>
    %5 = vector.shape_cast %4 : vector<1x1x16x16xf32> to vector<16x16xf32>
    %c0_8 = arith.constant 0 : index
    %c1 = arith.constant 1 : index
    %c0_9 = arith.constant 0 : index
    %c0_10 = arith.constant 0 : index
    %6 = vector.load %arg1[%c0_8, %c1, %c0_9, %c0_10] : memref<1x4x16x16xf32, #tpu.memory_space<vmem>>, vector<1x1x16x16xf32>
    %7 = vector.shape_cast %6 : vector<1x1x16x16xf32> to vector<16x16xf32>
    %c0_11 = arith.constant 0 : index
    %c2 = arith.constant 2 : index
    %c0_12 = arith.constant 0 : index
    %c0_13 = arith.constant 0 : index
    %8 = vector.load %arg1[%c0_11, %c2, %c0_12, %c0_13] : memref<1x4x16x16xf32, #tpu.memory_space<vmem>>, vector<1x1x16x16xf32>
    %9 = vector.shape_cast %8 : vector<1x1x16x16xf32> to vector<16x16xf32>
    %c0_14 = arith.constant 0 : index
    %c3 = arith.constant 3 : index
    %c0_15 = arith.constant 0 : index
    %c0_16 = arith.constant 0 : index
    %10 = vector.load %arg1[%c0_14, %c3, %c0_15, %c0_16] : memref<1x4x16x16xf32, #tpu.memory_space<vmem>>, vector<1x1x16x16xf32>
    %11 = vector.shape_cast %10 : vector<1x1x16x16xf32> to vector<16x16xf32>
    %12 = vector.shape_cast %5 : vector<16x16xf32> to vector<1x16x16xf32>
    %cst_17 = arith.constant dense<0.000000e+00> : vector<1xf32>
    %13 = vector.multi_reduction <add>, %12, %cst_17 [1, 2] : vector<1x16x16xf32> to vector<1xf32>
    %14 = vector.shape_cast %13 : vector<1xf32> to vector<1x1x1xf32>
    %15 = vector.extract %14[0, 0, 0] : f32 from vector<1x1x1xf32>
    %16 = vector.broadcast %15 : f32 to vector<1x1xf32>
    %cst_18 = arith.constant 2.560000e+02 : f32
    %17 = vector.broadcast %cst_18 : f32 to vector<1x1xf32>
    %18 = arith.divf %16, %17 : vector<1x1xf32>
    %19 = vector.shape_cast %7 : vector<16x16xf32> to vector<1x16x16xf32>
    %cst_19 = arith.constant dense<0.000000e+00> : vector<1xf32>
    %20 = vector.multi_reduction <add>, %19, %cst_19 [1, 2] : vector<1x16x16xf32> to vector<1xf32>
    %21 = vector.shape_cast %20 : vector<1xf32> to vector<1x1x1xf32>
    %22 = vector.extract %21[0, 0, 0] : f32 from vector<1x1x1xf32>
    %23 = vector.broadcast %22 : f32 to vector<1x1xf32>
    %cst_20 = arith.constant 2.560000e+02 : f32
    %24 = vector.broadcast %cst_20 : f32 to vector<1x1xf32>
    %25 = arith.divf %23, %24 : vector<1x1xf32>
    %26 = vector.shape_cast %9 : vector<16x16xf32> to vector<1x16x16xf32>
    %cst_21 = arith.constant dense<0.000000e+00> : vector<1xf32>
    %27 = vector.multi_reduction <add>, %26, %cst_21 [1, 2] : vector<1x16x16xf32> to vector<1xf32>
    %28 = vector.shape_cast %27 : vector<1xf32> to vector<1x1x1xf32>
    %29 = vector.extract %28[0, 0, 0] : f32 from vector<1x1x1xf32>
    %30 = vector.broadcast %29 : f32 to vector<1x1xf32>
    %cst_22 = arith.constant 2.560000e+02 : f32
    %31 = vector.broadcast %cst_22 : f32 to vector<1x1xf32>
    %32 = arith.divf %30, %31 : vector<1x1xf32>
    %33 = vector.shape_cast %11 : vector<16x16xf32> to vector<1x16x16xf32>
    %cst_23 = arith.constant dense<0.000000e+00> : vector<1xf32>
    %34 = vector.multi_reduction <add>, %33, %cst_23 [1, 2] : vector<1x16x16xf32> to vector<1xf32>
    %35 = vector.shape_cast %34 : vector<1xf32> to vector<1x1x1xf32>
    %36 = vector.extract %35[0, 0, 0] : f32 from vector<1x1x1xf32>
    %37 = vector.broadcast %36 : f32 to vector<1x1xf32>
    %cst_24 = arith.constant 2.560000e+02 : f32
    %38 = vector.broadcast %cst_24 : f32 to vector<1x1xf32>
    %39 = arith.divf %37, %38 : vector<1x1xf32>
    %c1_25 = arith.constant 1 : index
    %40 = memref.load %arg2[%c1_25] : memref<3xf32, #tpu.memory_space<smem>>
    %41 = vector.broadcast %40 : f32 to vector<1x1xf32>
    %42 = arith.mulf %41, %18 : vector<1x1xf32>
    %c2_26 = arith.constant 2 : index
    %43 = memref.load %arg2[%c2_26] : memref<3xf32, #tpu.memory_space<smem>>
    %44 = vector.broadcast %43 : f32 to vector<1x1xf32>
    %45 = arith.mulf %44, %25 : vector<1x1xf32>
    %46 = arith.addf %42, %45 : vector<1x1xf32>
    %47 = arith.negf %46 : vector<1x1xf32>
    %48 = math.exp %47 : vector<1x1xf32>
    %cst_27 = arith.constant 1.000000e+00 : f32
    %49 = vector.broadcast %cst_27 : f32 to vector<1x1xf32>
    %50 = arith.addf %49, %48 : vector<1x1xf32>
    %51 = arith.divf %49, %50 : vector<1x1xf32>
    %52 = vector.broadcast %51 : vector<1x1xf32> to vector<16x16xf32>
    %53 = arith.mulf %5, %52 : vector<16x16xf32>
    %c1_28 = arith.constant 1 : index
    %c1_29 = arith.constant 1 : index
    %54 = vector.load %arg6[%c1_28, %c1_29] : memref<18x128xf32, #tpu.memory_space<vmem>>, vector<16x16xf32>
    tpu.vector_store %arg6[%c1_28, %c1_29], %53 {strides = array<i32>} : memref<18x128xf32, #tpu.memory_space<vmem>>, vector<16x16xf32>,
    %c1_30 = arith.constant 1 : index
    %55 = memref.load %arg2[%c1_30] : memref<3xf32, #tpu.memory_space<smem>>
    %56 = vector.broadcast %55 : f32 to vector<1x1xf32>
    %57 = arith.mulf %56, %25 : vector<1x1xf32>
    %c0_31 = arith.constant 0 : index
    %58 = memref.load %arg2[%c0_31] : memref<3xf32, #tpu.memory_space<smem>>
    %59 = vector.broadcast %58 : f32 to vector<1x1xf32>
    %60 = arith.mulf %59, %18 : vector<1x1xf32>
    %61 = arith.addf %57, %60 : vector<1x1xf32>
    %c2_32 = arith.constant 2 : index
    %62 = memref.load %arg2[%c2_32] : memref<3xf32, #tpu.memory_space<smem>>
    %63 = vector.broadcast %62 : f32 to vector<1x1xf32>
    %64 = arith.mulf %63, %32 : vector<1x1xf32>
    %65 = arith.addf %61, %64 : vector<1x1xf32>
    %66 = arith.negf %65 : vector<1x1xf32>
    %67 = math.exp %66 : vector<1x1xf32>
    %cst_33 = arith.constant 1.000000e+00 : f32
    %68 = vector.broadcast %cst_33 : f32 to vector<1x1xf32>
    %69 = arith.addf %68, %67 : vector<1x1xf32>
    %70 = arith.divf %68, %69 : vector<1x1xf32>
    %71 = vector.broadcast %70 : vector<1x1xf32> to vector<16x16xf32>
    %72 = arith.mulf %7, %71 : vector<16x16xf32>
    %c1_34 = arith.constant 1 : index
    %c19 = arith.constant 19 : index
    %73 = vector.load %arg6[%c1_34, %c19] : memref<18x128xf32, #tpu.memory_space<vmem>>, vector<16x16xf32>
    tpu.vector_store %arg6[%c1_34, %c19], %72 {strides = array<i32>} : memref<18x128xf32, #tpu.memory_space<vmem>>, vector<16x16xf32>,
    %c1_35 = arith.constant 1 : index
    %74 = memref.load %arg2[%c1_35] : memref<3xf32, #tpu.memory_space<smem>>
    %75 = vector.broadcast %74 : f32 to vector<1x1xf32>
    %76 = arith.mulf %75, %32 : vector<1x1xf32>
    %c0_36 = arith.constant 0 : index
    %77 = memref.load %arg2[%c0_36] : memref<3xf32, #tpu.memory_space<smem>>
    %78 = vector.broadcast %77 : f32 to vector<1x1xf32>
    %79 = arith.mulf %78, %25 : vector<1x1xf32>
    %80 = arith.addf %76, %79 : vector<1x1xf32>
    %c2_37 = arith.constant 2 : index
    %81 = memref.load %arg2[%c2_37] : memref<3xf32, #tpu.memory_space<smem>>
    %82 = vector.broadcast %81 : f32 to vector<1x1xf32>
    %83 = arith.mulf %82, %39 : vector<1x1xf32>
    %84 = arith.addf %80, %83 : vector<1x1xf32>
    %85 = arith.negf %84 : vector<1x1xf32>
    %86 = math.exp %85 : vector<1x1xf32>
    %cst_38 = arith.constant 1.000000e+00 : f32
    %87 = vector.broadcast %cst_38 : f32 to vector<1x1xf32>
    %88 = arith.addf %87, %86 : vector<1x1xf32>
    %89 = arith.divf %87, %88 : vector<1x1xf32>
    %90 = vector.broadcast %89 : vector<1x1xf32> to vector<16x16xf32>
    %91 = arith.mulf %9, %90 : vector<16x16xf32>
    %c1_39 = arith.constant 1 : index
    %c37 = arith.constant 37 : index
    %92 = vector.load %arg6[%c1_39, %c37] : memref<18x128xf32, #tpu.memory_space<vmem>>, vector<16x16xf32>
    tpu.vector_store %arg6[%c1_39, %c37], %91 {strides = array<i32>} : memref<18x128xf32, #tpu.memory_space<vmem>>, vector<16x16xf32>,
    %c1_40 = arith.constant 1 : index
    %93 = memref.load %arg2[%c1_40] : memref<3xf32, #tpu.memory_space<smem>>
    %94 = vector.broadcast %93 : f32 to vector<1x1xf32>
    %95 = arith.mulf %94, %39 : vector<1x1xf32>
    %c0_41 = arith.constant 0 : index
    %96 = memref.load %arg2[%c0_41] : memref<3xf32, #tpu.memory_space<smem>>
    %97 = vector.broadcast %96 : f32 to vector<1x1xf32>
    %98 = arith.mulf %97, %32 : vector<1x1xf32>
    %99 = arith.addf %95, %98 : vector<1x1xf32>
    %100 = arith.negf %99 : vector<1x1xf32>
    %101 = math.exp %100 : vector<1x1xf32>
    %cst_42 = arith.constant 1.000000e+00 : f32
    %102 = vector.broadcast %cst_42 : f32 to vector<1x1xf32>
    %103 = arith.addf %102, %101 : vector<1x1xf32>
    %104 = arith.divf %102, %103 : vector<1x1xf32>
    %105 = vector.broadcast %104 : vector<1x1xf32> to vector<16x16xf32>
    %106 = arith.mulf %11, %105 : vector<16x16xf32>
    %c1_43 = arith.constant 1 : index
    %c55 = arith.constant 55 : index
    %107 = vector.load %arg6[%c1_43, %c55] : memref<18x128xf32, #tpu.memory_space<vmem>>, vector<16x16xf32>
    tpu.vector_store %arg6[%c1_43, %c55], %106 {strides = array<i32>} : memref<18x128xf32, #tpu.memory_space<vmem>>, vector<16x16xf32>,
    %cst_44 = arith.constant 0.000000e+00 : f32
    %108 = vector.broadcast %cst_44 : f32 to vector<16x72xf32>
    %cst_45 = arith.constant 0.000000e+00 : f32
    %109 = vector.broadcast %cst_45 : f32 to vector<16x72xf32>
    %cst_46 = arith.constant 0.000000e+00 : f32
    %110 = vector.broadcast %cst_46 : f32 to vector<16x72xf32>
    %cst_47 = arith.constant 0.000000e+00 : f32
    %111 = vector.broadcast %cst_47 : f32 to vector<16x72xf32>
    %c0_48 = arith.constant 0 : index
    %c0_49 = arith.constant 0 : index
    %112 = vector.load %arg6[%c0_48, %c0_49] : memref<18x128xf32, #tpu.memory_space<vmem>>, vector<16x72xf32>
    %c0_50 = arith.constant 0 : index
    %c0_51 = arith.constant 0 : index
    %c0_52 = arith.constant 0 : index
    %c0_53 = arith.constant 0 : index
    %113 = vector.load %arg3[%c0_50, %c0_51, %c0_52, %c0_53] : memref<9x4x1x128xf32, #tpu.memory_space<vmem>>, vector<1x1x1x128xf32>
    %114 = vector.shape_cast %113 : vector<1x1x1x128xf32> to vector<1x128xf32>
    %115 = vector.extract_strided_slice %114 {offsets = [0, 0], sizes = [1, 72], strides = [1, 1]} : vector<1x128xf32> to vector<1x72xf32>
    %116 = vector.broadcast %115 : vector<1x72xf32> to vector<16x72xf32>
    %117 = arith.mulf %116, %112 : vector<16x72xf32>
    %118 = arith.addf %108, %117 : vector<16x72xf32>
    %c0_54 = arith.constant 0 : index
    %c1_55 = arith.constant 1 : index
    %c0_56 = arith.constant 0 : index
    %c0_57 = arith.constant 0 : index
    %119 = vector.load %arg3[%c0_54, %c1_55, %c0_56, %c0_57] : memref<9x4x1x128xf32, #tpu.memory_space<vmem>>, vector<1x1x1x128xf32>
    %120 = vector.shape_cast %119 : vector<1x1x1x128xf32> to vector<1x128xf32>
    %121 = vector.extract_strided_slice %120 {offsets = [0, 0], sizes = [1, 72], strides = [1, 1]} : vector<1x128xf32> to vector<1x72xf32>
    %122 = vector.broadcast %121 : vector<1x72xf32> to vector<16x72xf32>
    %123 = arith.mulf %122, %112 : vector<16x72xf32>
    %124 = arith.addf %109, %123 : vector<16x72xf32>
    %c0_58 = arith.constant 0 : index
    %c2_59 = arith.constant 2 : index
    %c0_60 = arith.constant 0 : index
    %c0_61 = arith.constant 0 : index
    %125 = vector.load %arg3[%c0_58, %c2_59, %c0_60, %c0_61] : memref<9x4x1x128xf32, #tpu.memory_space<vmem>>, vector<1x1x1x128xf32>
    %126 = vector.shape_cast %125 : vector<1x1x1x128xf32> to vector<1x128xf32>
    %127 = vector.extract_strided_slice %126 {offsets = [0, 0], sizes = [1, 72], strides = [1, 1]} : vector<1x128xf32> to vector<1x72xf32>
    %128 = vector.broadcast %127 : vector<1x72xf32> to vector<16x72xf32>
    %129 = arith.mulf %128, %112 : vector<16x72xf32>
    %130 = arith.addf %110, %129 : vector<16x72xf32>
    %c0_62 = arith.constant 0 : index
    %c3_63 = arith.constant 3 : index
    %c0_64 = arith.constant 0 : index
    %c0_65 = arith.constant 0 : index
    %131 = vector.load %arg3[%c0_62, %c3_63, %c0_64, %c0_65] : memref<9x4x1x128xf32, #tpu.memory_space<vmem>>, vector<1x1x1x128xf32>
    %132 = vector.shape_cast %131 : vector<1x1x1x128xf32> to vector<1x128xf32>
    %133 = vector.extract_strided_slice %132 {offsets = [0, 0], sizes = [1, 72], strides = [1, 1]} : vector<1x128xf32> to vector<1x72xf32>
    %134 = vector.broadcast %133 : vector<1x72xf32> to vector<16x72xf32>
    %135 = arith.mulf %134, %112 : vector<16x72xf32>
    %136 = arith.addf %111, %135 : vector<16x72xf32>
    %c0_66 = arith.constant 0 : index
    %c1_67 = arith.constant 1 : index
    %137 = vector.load %arg6[%c0_66, %c1_67] : memref<18x128xf32, #tpu.memory_space<vmem>>, vector<16x72xf32>
    %c1_68 = arith.constant 1 : index
    %c0_69 = arith.constant 0 : index
    %c0_70 = arith.constant 0 : index
    %c0_71 = arith.constant 0 : index
    %138 = vector.load %arg3[%c1_68, %c0_69, %c0_70, %c0_71] : memref<9x4x1x128xf32, #tpu.memory_space<vmem>>, vector<1x1x1x128xf32>
    %139 = vector.shape_cast %138 : vector<1x1x1x128xf32> to vector<1x128xf32>
    %140 = vector.extract_strided_slice %139 {offsets = [0, 0], sizes = [1, 72], strides = [1, 1]} : vector<1x128xf32> to vector<1x72xf32>
    %141 = vector.broadcast %140 : vector<1x72xf32> to vector<16x72xf32>
    %142 = arith.mulf %141, %137 : vector<16x72xf32>
    %143 = arith.addf %118, %142 : vector<16x72xf32>
    %c1_72 = arith.constant 1 : index
    %c1_73 = arith.constant 1 : index
    %c0_74 = arith.constant 0 : index
    %c0_75 = arith.constant 0 : index
    %144 = vector.load %arg3[%c1_72, %c1_73, %c0_74, %c0_75] : memref<9x4x1x128xf32, #tpu.memory_space<vmem>>, vector<1x1x1x128xf32>
    %145 = vector.shape_cast %144 : vector<1x1x1x128xf32> to vector<1x128xf32>
    %146 = vector.extract_strided_slice %145 {offsets = [0, 0], sizes = [1, 72], strides = [1, 1]} : vector<1x128xf32> to vector<1x72xf32>
    %147 = vector.broadcast %146 : vector<1x72xf32> to vector<16x72xf32>
    %148 = arith.mulf %147, %137 : vector<16x72xf32>
    %149 = arith.addf %124, %148 : vector<16x72xf32>
    %c1_76 = arith.constant 1 : index
    %c2_77 = arith.constant 2 : index
    %c0_78 = arith.constant 0 : index
    %c0_79 = arith.constant 0 : index
    %150 = vector.load %arg3[%c1_76, %c2_77, %c0_78, %c0_79] : memref<9x4x1x128xf32, #tpu.memory_space<vmem>>, vector<1x1x1x128xf32>
    %151 = vector.shape_cast %150 : vector<1x1x1x128xf32> to vector<1x128xf32>
    %152 = vector.extract_strided_slice %151 {offsets = [0, 0], sizes = [1, 72], strides = [1, 1]} : vector<1x128xf32> to vector<1x72xf32>
    %153 = vector.broadcast %152 : vector<1x72xf32> to vector<16x72xf32>
    %154 = arith.mulf %153, %137 : vector<16x72xf32>
    %155 = arith.addf %130, %154 : vector<16x72xf32>
    %c1_80 = arith.constant 1 : index
    %c3_81 = arith.constant 3 : index
    %c0_82 = arith.constant 0 : index
    %c0_83 = arith.constant 0 : index
    %156 = vector.load %arg3[%c1_80, %c3_81, %c0_82, %c0_83] : memref<9x4x1x128xf32, #tpu.memory_space<vmem>>, vector<1x1x1x128xf32>
    %157 = vector.shape_cast %156 : vector<1x1x1x128xf32> to vector<1x128xf32>
    %158 = vector.extract_strided_slice %157 {offsets = [0, 0], sizes = [1, 72], strides = [1, 1]} : vector<1x128xf32> to vector<1x72xf32>
    %159 = vector.broadcast %158 : vector<1x72xf32> to vector<16x72xf32>
    %160 = arith.mulf %159, %137 : vector<16x72xf32>
    %161 = arith.addf %136, %160 : vector<16x72xf32>
    %c0_84 = arith.constant 0 : index
    %c2_85 = arith.constant 2 : index
    %162 = vector.load %arg6[%c0_84, %c2_85] : memref<18x128xf32, #tpu.memory_space<vmem>>, vector<16x72xf32>
    %c2_86 = arith.constant 2 : index
    %c0_87 = arith.constant 0 : index
    %c0_88 = arith.constant 0 : index
    %c0_89 = arith.constant 0 : index
    %163 = vector.load %arg3[%c2_86, %c0_87, %c0_88, %c0_89] : memref<9x4x1x128xf32, #tpu.memory_space<vmem>>, vector<1x1x1x128xf32>
    %164 = vector.shape_cast %163 : vector<1x1x1x128xf32> to vector<1x128xf32>
    %165 = vector.extract_strided_slice %164 {offsets = [0, 0], sizes = [1, 72], strides = [1, 1]} : vector<1x128xf32> to vector<1x72xf32>
    %166 = vector.broadcast %165 : vector<1x72xf32> to vector<16x72xf32>
    %167 = arith.mulf %166, %162 : vector<16x72xf32>
    %168 = arith.addf %143, %167 : vector<16x72xf32>
    %c2_90 = arith.constant 2 : index
    %c1_91 = arith.constant 1 : index
    %c0_92 = arith.constant 0 : index
    %c0_93 = arith.constant 0 : index
    %169 = vector.load %arg3[%c2_90, %c1_91, %c0_92, %c0_93] : memref<9x4x1x128xf32, #tpu.memory_space<vmem>>, vector<1x1x1x128xf32>
    %170 = vector.shape_cast %169 : vector<1x1x1x128xf32> to vector<1x128xf32>
    %171 = vector.extract_strided_slice %170 {offsets = [0, 0], sizes = [1, 72], strides = [1, 1]} : vector<1x128xf32> to vector<1x72xf32>
    %172 = vector.broadcast %171 : vector<1x72xf32> to vector<16x72xf32>
    %173 = arith.mulf %172, %162 : vector<16x72xf32>
    %174 = arith.addf %149, %173 : vector<16x72xf32>
    %c2_94 = arith.constant 2 : index
    %c2_95 = arith.constant 2 : index
    %c0_96 = arith.constant 0 : index
    %c0_97 = arith.constant 0 : index
    %175 = vector.load %arg3[%c2_94, %c2_95, %c0_96, %c0_97] : memref<9x4x1x128xf32, #tpu.memory_space<vmem>>, vector<1x1x1x128xf32>
    %176 = vector.shape_cast %175 : vector<1x1x1x128xf32> to vector<1x128xf32>
    %177 = vector.extract_strided_slice %176 {offsets = [0, 0], sizes = [1, 72], strides = [1, 1]} : vector<1x128xf32> to vector<1x72xf32>
    %178 = vector.broadcast %177 : vector<1x72xf32> to vector<16x72xf32>
    %179 = arith.mulf %178, %162 : vector<16x72xf32>
    %180 = arith.addf %155, %179 : vector<16x72xf32>
    %c2_98 = arith.constant 2 : index
    %c3_99 = arith.constant 3 : index
    %c0_100 = arith.constant 0 : index
    %c0_101 = arith.constant 0 : index
    %181 = vector.load %arg3[%c2_98, %c3_99, %c0_100, %c0_101] : memref<9x4x1x128xf32, #tpu.memory_space<vmem>>, vector<1x1x1x128xf32>
    %182 = vector.shape_cast %181 : vector<1x1x1x128xf32> to vector<1x128xf32>
    %183 = vector.extract_strided_slice %182 {offsets = [0, 0], sizes = [1, 72], strides = [1, 1]} : vector<1x128xf32> to vector<1x72xf32>
    %184 = vector.broadcast %183 : vector<1x72xf32> to vector<16x72xf32>
    %185 = arith.mulf %184, %162 : vector<16x72xf32>
    %186 = arith.addf %161, %185 : vector<16x72xf32>
    %c1_102 = arith.constant 1 : index
    %c0_103 = arith.constant 0 : index
    %187 = vector.load %arg6[%c1_102, %c0_103] : memref<18x128xf32, #tpu.memory_space<vmem>>, vector<16x72xf32>
    %c3_104 = arith.constant 3 : index
    %c0_105 = arith.constant 0 : index
    %c0_106 = arith.constant 0 : index
    %c0_107 = arith.constant 0 : index
    %188 = vector.load %arg3[%c3_104, %c0_105, %c0_106, %c0_107] : memref<9x4x1x128xf32, #tpu.memory_space<vmem>>, vector<1x1x1x128xf32>
    %189 = vector.shape_cast %188 : vector<1x1x1x128xf32> to vector<1x128xf32>
    %190 = vector.extract_strided_slice %189 {offsets = [0, 0], sizes = [1, 72], strides = [1, 1]} : vector<1x128xf32> to vector<1x72xf32>
    %191 = vector.broadcast %190 : vector<1x72xf32> to vector<16x72xf32>
    %192 = arith.mulf %191, %187 : vector<16x72xf32>
    %193 = arith.addf %168, %192 : vector<16x72xf32>
    %c3_108 = arith.constant 3 : index
    %c1_109 = arith.constant 1 : index
    %c0_110 = arith.constant 0 : index
    %c0_111 = arith.constant 0 : index
    %194 = vector.load %arg3[%c3_108, %c1_109, %c0_110, %c0_111] : memref<9x4x1x128xf32, #tpu.memory_space<vmem>>, vector<1x1x1x128xf32>
    %195 = vector.shape_cast %194 : vector<1x1x1x128xf32> to vector<1x128xf32>
    %196 = vector.extract_strided_slice %195 {offsets = [0, 0], sizes = [1, 72], strides = [1, 1]} : vector<1x128xf32> to vector<1x72xf32>
    %197 = vector.broadcast %196 : vector<1x72xf32> to vector<16x72xf32>
    %198 = arith.mulf %197, %187 : vector<16x72xf32>
    %199 = arith.addf %174, %198 : vector<16x72xf32>
    %c3_112 = arith.constant 3 : index
    %c2_113 = arith.constant 2 : index
    %c0_114 = arith.constant 0 : index
    %c0_115 = arith.constant 0 : index
    %200 = vector.load %arg3[%c3_112, %c2_113, %c0_114, %c0_115] : memref<9x4x1x128xf32, #tpu.memory_space<vmem>>, vector<1x1x1x128xf32>
    %201 = vector.shape_cast %200 : vector<1x1x1x128xf32> to vector<1x128xf32>
    %202 = vector.extract_strided_slice %201 {offsets = [0, 0], sizes = [1, 72], strides = [1, 1]} : vector<1x128xf32> to vector<1x72xf32>
    %203 = vector.broadcast %202 : vector<1x72xf32> to vector<16x72xf32>
    %204 = arith.mulf %203, %187 : vector<16x72xf32>
    %205 = arith.addf %180, %204 : vector<16x72xf32>
    %c3_116 = arith.constant 3 : index
    %c3_117 = arith.constant 3 : index
    %c0_118 = arith.constant 0 : index
    %c0_119 = arith.constant 0 : index
    %206 = vector.load %arg3[%c3_116, %c3_117, %c0_118, %c0_119] : memref<9x4x1x128xf32, #tpu.memory_space<vmem>>, vector<1x1x1x128xf32>
    %207 = vector.shape_cast %206 : vector<1x1x1x128xf32> to vector<1x128xf32>
    %208 = vector.extract_strided_slice %207 {offsets = [0, 0], sizes = [1, 72], strides = [1, 1]} : vector<1x128xf32> to vector<1x72xf32>
    %209 = vector.broadcast %208 : vector<1x72xf32> to vector<16x72xf32>
    %210 = arith.mulf %209, %187 : vector<16x72xf32>
    %211 = arith.addf %186, %210 : vector<16x72xf32>
    %c1_120 = arith.constant 1 : index
    %c1_121 = arith.constant 1 : index
    %212 = vector.load %arg6[%c1_120, %c1_121] : memref<18x128xf32, #tpu.memory_space<vmem>>, vector<16x72xf32>
    %c4 = arith.constant 4 : index
    %c0_122 = arith.constant 0 : index
    %c0_123 = arith.constant 0 : index
    %c0_124 = arith.constant 0 : index
    %213 = vector.load %arg3[%c4, %c0_122, %c0_123, %c0_124] : memref<9x4x1x128xf32, #tpu.memory_space<vmem>>, vector<1x1x1x128xf32>
    %214 = vector.shape_cast %213 : vector<1x1x1x128xf32> to vector<1x128xf32>
    %215 = vector.extract_strided_slice %214 {offsets = [0, 0], sizes = [1, 72], strides = [1, 1]} : vector<1x128xf32> to vector<1x72xf32>
    %216 = vector.broadcast %215 : vector<1x72xf32> to vector<16x72xf32>
    %217 = arith.mulf %216, %212 : vector<16x72xf32>
    %218 = arith.addf %193, %217 : vector<16x72xf32>
    %c4_125 = arith.constant 4 : index
    %c1_126 = arith.constant 1 : index
    %c0_127 = arith.constant 0 : index
    %c0_128 = arith.constant 0 : index
    %219 = vector.load %arg3[%c4_125, %c1_126, %c0_127, %c0_128] : memref<9x4x1x128xf32, #tpu.memory_space<vmem>>, vector<1x1x1x128xf32>
    %220 = vector.shape_cast %219 : vector<1x1x1x128xf32> to vector<1x128xf32>
    %221 = vector.extract_strided_slice %220 {offsets = [0, 0], sizes = [1, 72], strides = [1, 1]} : vector<1x128xf32> to vector<1x72xf32>
    %222 = vector.broadcast %221 : vector<1x72xf32> to vector<16x72xf32>
    %223 = arith.mulf %222, %212 : vector<16x72xf32>
    %224 = arith.addf %199, %223 : vector<16x72xf32>
    %c4_129 = arith.constant 4 : index
    %c2_130 = arith.constant 2 : index
    %c0_131 = arith.constant 0 : index
    %c0_132 = arith.constant 0 : index
    %225 = vector.load %arg3[%c4_129, %c2_130, %c0_131, %c0_132] : memref<9x4x1x128xf32, #tpu.memory_space<vmem>>, vector<1x1x1x128xf32>
    %226 = vector.shape_cast %225 : vector<1x1x1x128xf32> to vector<1x128xf32>
    %227 = vector.extract_strided_slice %226 {offsets = [0, 0], sizes = [1, 72], strides = [1, 1]} : vector<1x128xf32> to vector<1x72xf32>
    %228 = vector.broadcast %227 : vector<1x72xf32> to vector<16x72xf32>
    %229 = arith.mulf %228, %212 : vector<16x72xf32>
    %230 = arith.addf %205, %229 : vector<16x72xf32>
    %c4_133 = arith.constant 4 : index
    %c3_134 = arith.constant 3 : index
    %c0_135 = arith.constant 0 : index
    %c0_136 = arith.constant 0 : index
    %231 = vector.load %arg3[%c4_133, %c3_134, %c0_135, %c0_136] : memref<9x4x1x128xf32, #tpu.memory_space<vmem>>, vector<1x1x1x128xf32>
    %232 = vector.shape_cast %231 : vector<1x1x1x128xf32> to vector<1x128xf32>
    %233 = vector.extract_strided_slice %232 {offsets = [0, 0], sizes = [1, 72], strides = [1, 1]} : vector<1x128xf32> to vector<1x72xf32>
    %234 = vector.broadcast %233 : vector<1x72xf32> to vector<16x72xf32>
    %235 = arith.mulf %234, %212 : vector<16x72xf32>
    %236 = arith.addf %211, %235 : vector<16x72xf32>
    %c1_137 = arith.constant 1 : index
    %c2_138 = arith.constant 2 : index
    %237 = vector.load %arg6[%c1_137, %c2_138] : memref<18x128xf32, #tpu.memory_space<vmem>>, vector<16x72xf32>
    %c5 = arith.constant 5 : index
    %c0_139 = arith.constant 0 : index
    %c0_140 = arith.constant 0 : index
    %c0_141 = arith.constant 0 : index
    %238 = vector.load %arg3[%c5, %c0_139, %c0_140, %c0_141] : memref<9x4x1x128xf32, #tpu.memory_space<vmem>>, vector<1x1x1x128xf32>
    %239 = vector.shape_cast %238 : vector<1x1x1x128xf32> to vector<1x128xf32>
    %240 = vector.extract_strided_slice %239 {offsets = [0, 0], sizes = [1, 72], strides = [1, 1]} : vector<1x128xf32> to vector<1x72xf32>
    %241 = vector.broadcast %240 : vector<1x72xf32> to vector<16x72xf32>
    %242 = arith.mulf %241, %237 : vector<16x72xf32>
    %243 = arith.addf %218, %242 : vector<16x72xf32>
    %c5_142 = arith.constant 5 : index
    %c1_143 = arith.constant 1 : index
    %c0_144 = arith.constant 0 : index
    %c0_145 = arith.constant 0 : index
    %244 = vector.load %arg3[%c5_142, %c1_143, %c0_144, %c0_145] : memref<9x4x1x128xf32, #tpu.memory_space<vmem>>, vector<1x1x1x128xf32>
    %245 = vector.shape_cast %244 : vector<1x1x1x128xf32> to vector<1x128xf32>
    %246 = vector.extract_strided_slice %245 {offsets = [0, 0], sizes = [1, 72], strides = [1, 1]} : vector<1x128xf32> to vector<1x72xf32>
    %247 = vector.broadcast %246 : vector<1x72xf32> to vector<16x72xf32>
    %248 = arith.mulf %247, %237 : vector<16x72xf32>
    %249 = arith.addf %224, %248 : vector<16x72xf32>
    %c5_146 = arith.constant 5 : index
    %c2_147 = arith.constant 2 : index
    %c0_148 = arith.constant 0 : index
    %c0_149 = arith.constant 0 : index
    %250 = vector.load %arg3[%c5_146, %c2_147, %c0_148, %c0_149] : memref<9x4x1x128xf32, #tpu.memory_space<vmem>>, vector<1x1x1x128xf32>
    %251 = vector.shape_cast %250 : vector<1x1x1x128xf32> to vector<1x128xf32>
    %252 = vector.extract_strided_slice %251 {offsets = [0, 0], sizes = [1, 72], strides = [1, 1]} : vector<1x128xf32> to vector<1x72xf32>
    %253 = vector.broadcast %252 : vector<1x72xf32> to vector<16x72xf32>
    %254 = arith.mulf %253, %237 : vector<16x72xf32>
    %255 = arith.addf %230, %254 : vector<16x72xf32>
    %c5_150 = arith.constant 5 : index
    %c3_151 = arith.constant 3 : index
    %c0_152 = arith.constant 0 : index
    %c0_153 = arith.constant 0 : index
    %256 = vector.load %arg3[%c5_150, %c3_151, %c0_152, %c0_153] : memref<9x4x1x128xf32, #tpu.memory_space<vmem>>, vector<1x1x1x128xf32>
    %257 = vector.shape_cast %256 : vector<1x1x1x128xf32> to vector<1x128xf32>
    %258 = vector.extract_strided_slice %257 {offsets = [0, 0], sizes = [1, 72], strides = [1, 1]} : vector<1x128xf32> to vector<1x72xf32>
    %259 = vector.broadcast %258 : vector<1x72xf32> to vector<16x72xf32>
    %260 = arith.mulf %259, %237 : vector<16x72xf32>
    %261 = arith.addf %236, %260 : vector<16x72xf32>
    %c2_154 = arith.constant 2 : index
    %c0_155 = arith.constant 0 : index
    %262 = vector.load %arg6[%c2_154, %c0_155] : memref<18x128xf32, #tpu.memory_space<vmem>>, vector<16x72xf32>
    %c6 = arith.constant 6 : index
    %c0_156 = arith.constant 0 : index
    %c0_157 = arith.constant 0 : index
    %c0_158 = arith.constant 0 : index
    %263 = vector.load %arg3[%c6, %c0_156, %c0_157, %c0_158] : memref<9x4x1x128xf32, #tpu.memory_space<vmem>>, vector<1x1x1x128xf32>
    %264 = vector.shape_cast %263 : vector<1x1x1x128xf32> to vector<1x128xf32>
    %265 = vector.extract_strided_slice %264 {offsets = [0, 0], sizes = [1, 72], strides = [1, 1]} : vector<1x128xf32> to vector<1x72xf32>
    %266 = vector.broadcast %265 : vector<1x72xf32> to vector<16x72xf32>
    %267 = arith.mulf %266, %262 : vector<16x72xf32>
    %268 = arith.addf %243, %267 : vector<16x72xf32>
    %c6_159 = arith.constant 6 : index
    %c1_160 = arith.constant 1 : index
    %c0_161 = arith.constant 0 : index
    %c0_162 = arith.constant 0 : index
    %269 = vector.load %arg3[%c6_159, %c1_160, %c0_161, %c0_162] : memref<9x4x1x128xf32, #tpu.memory_space<vmem>>, vector<1x1x1x128xf32>
    %270 = vector.shape_cast %269 : vector<1x1x1x128xf32> to vector<1x128xf32>
    %271 = vector.extract_strided_slice %270 {offsets = [0, 0], sizes = [1, 72], strides = [1, 1]} : vector<1x128xf32> to vector<1x72xf32>
    %272 = vector.broadcast %271 : vector<1x72xf32> to vector<16x72xf32>
    %273 = arith.mulf %272, %262 : vector<16x72xf32>
    %274 = arith.addf %249, %273 : vector<16x72xf32>
    %c6_163 = arith.constant 6 : index
    %c2_164 = arith.constant 2 : index
    %c0_165 = arith.constant 0 : index
    %c0_166 = arith.constant 0 : index
    %275 = vector.load %arg3[%c6_163, %c2_164, %c0_165, %c0_166] : memref<9x4x1x128xf32, #tpu.memory_space<vmem>>, vector<1x1x1x128xf32>
    %276 = vector.shape_cast %275 : vector<1x1x1x128xf32> to vector<1x128xf32>
    %277 = vector.extract_strided_slice %276 {offsets = [0, 0], sizes = [1, 72], strides = [1, 1]} : vector<1x128xf32> to vector<1x72xf32>
    %278 = vector.broadcast %277 : vector<1x72xf32> to vector<16x72xf32>
    %279 = arith.mulf %278, %262 : vector<16x72xf32>
    %280 = arith.addf %255, %279 : vector<16x72xf32>
    %c6_167 = arith.constant 6 : index
    %c3_168 = arith.constant 3 : index
    %c0_169 = arith.constant 0 : index
    %c0_170 = arith.constant 0 : index
    %281 = vector.load %arg3[%c6_167, %c3_168, %c0_169, %c0_170] : memref<9x4x1x128xf32, #tpu.memory_space<vmem>>, vector<1x1x1x128xf32>
    %282 = vector.shape_cast %281 : vector<1x1x1x128xf32> to vector<1x128xf32>
    %283 = vector.extract_strided_slice %282 {offsets = [0, 0], sizes = [1, 72], strides = [1, 1]} : vector<1x128xf32> to vector<1x72xf32>
    %284 = vector.broadcast %283 : vector<1x72xf32> to vector<16x72xf32>
    %285 = arith.mulf %284, %262 : vector<16x72xf32>
    %286 = arith.addf %261, %285 : vector<16x72xf32>
    %c2_171 = arith.constant 2 : index
    %c1_172 = arith.constant 1 : index
    %287 = vector.load %arg6[%c2_171, %c1_172] : memref<18x128xf32, #tpu.memory_space<vmem>>, vector<16x72xf32>
    %c7 = arith.constant 7 : index
    %c0_173 = arith.constant 0 : index
    %c0_174 = arith.constant 0 : index
    %c0_175 = arith.constant 0 : index
    %288 = vector.load %arg3[%c7, %c0_173, %c0_174, %c0_175] : memref<9x4x1x128xf32, #tpu.memory_space<vmem>>, vector<1x1x1x128xf32>
    %289 = vector.shape_cast %288 : vector<1x1x1x128xf32> to vector<1x128xf32>
    %290 = vector.extract_strided_slice %289 {offsets = [0, 0], sizes = [1, 72], strides = [1, 1]} : vector<1x128xf32> to vector<1x72xf32>
    %291 = vector.broadcast %290 : vector<1x72xf32> to vector<16x72xf32>
    %292 = arith.mulf %291, %287 : vector<16x72xf32>
    %293 = arith.addf %268, %292 : vector<16x72xf32>
    %c7_176 = arith.constant 7 : index
    %c1_177 = arith.constant 1 : index
    %c0_178 = arith.constant 0 : index
    %c0_179 = arith.constant 0 : index
    %294 = vector.load %arg3[%c7_176, %c1_177, %c0_178, %c0_179] : memref<9x4x1x128xf32, #tpu.memory_space<vmem>>, vector<1x1x1x128xf32>
    %295 = vector.shape_cast %294 : vector<1x1x1x128xf32> to vector<1x128xf32>
    %296 = vector.extract_strided_slice %295 {offsets = [0, 0], sizes = [1, 72], strides = [1, 1]} : vector<1x128xf32> to vector<1x72xf32>
    %297 = vector.broadcast %296 : vector<1x72xf32> to vector<16x72xf32>
    %298 = arith.mulf %297, %287 : vector<16x72xf32>
    %299 = arith.addf %274, %298 : vector<16x72xf32>
    %c7_180 = arith.constant 7 : index
    %c2_181 = arith.constant 2 : index
    %c0_182 = arith.constant 0 : index
    %c0_183 = arith.constant 0 : index
    %300 = vector.load %arg3[%c7_180, %c2_181, %c0_182, %c0_183] : memref<9x4x1x128xf32, #tpu.memory_space<vmem>>, vector<1x1x1x128xf32>
    %301 = vector.shape_cast %300 : vector<1x1x1x128xf32> to vector<1x128xf32>
    %302 = vector.extract_strided_slice %301 {offsets = [0, 0], sizes = [1, 72], strides = [1, 1]} : vector<1x128xf32> to vector<1x72xf32>
    %303 = vector.broadcast %302 : vector<1x72xf32> to vector<16x72xf32>
    %304 = arith.mulf %303, %287 : vector<16x72xf32>
    %305 = arith.addf %280, %304 : vector<16x72xf32>
    %c7_184 = arith.constant 7 : index
    %c3_185 = arith.constant 3 : index
    %c0_186 = arith.constant 0 : index
    %c0_187 = arith.constant 0 : index
    %306 = vector.load %arg3[%c7_184, %c3_185, %c0_186, %c0_187] : memref<9x4x1x128xf32, #tpu.memory_space<vmem>>, vector<1x1x1x128xf32>
    %307 = vector.shape_cast %306 : vector<1x1x1x128xf32> to vector<1x128xf32>
    %308 = vector.extract_strided_slice %307 {offsets = [0, 0], sizes = [1, 72], strides = [1, 1]} : vector<1x128xf32> to vector<1x72xf32>
    %309 = vector.broadcast %308 : vector<1x72xf32> to vector<16x72xf32>
    %310 = arith.mulf %309, %287 : vector<16x72xf32>
    %311 = arith.addf %286, %310 : vector<16x72xf32>
    %c2_188 = arith.constant 2 : index
    %c2_189 = arith.constant 2 : index
    %312 = vector.load %arg6[%c2_188, %c2_189] : memref<18x128xf32, #tpu.memory_space<vmem>>, vector<16x72xf32>
    %c8 = arith.constant 8 : index
    %c0_190 = arith.constant 0 : index
    %c0_191 = arith.constant 0 : index
    %c0_192 = arith.constant 0 : index
    %313 = vector.load %arg3[%c8, %c0_190, %c0_191, %c0_192] : memref<9x4x1x128xf32, #tpu.memory_space<vmem>>, vector<1x1x1x128xf32>
    %314 = vector.shape_cast %313 : vector<1x1x1x128xf32> to vector<1x128xf32>
    %315 = vector.extract_strided_slice %314 {offsets = [0, 0], sizes = [1, 72], strides = [1, 1]} : vector<1x128xf32> to vector<1x72xf32>
    %316 = vector.broadcast %315 : vector<1x72xf32> to vector<16x72xf32>
    %317 = arith.mulf %316, %312 : vector<16x72xf32>
    %318 = arith.addf %293, %317 : vector<16x72xf32>
    %c8_193 = arith.constant 8 : index
    %c1_194 = arith.constant 1 : index
    %c0_195 = arith.constant 0 : index
    %c0_196 = arith.constant 0 : index
    %319 = vector.load %arg3[%c8_193, %c1_194, %c0_195, %c0_196] : memref<9x4x1x128xf32, #tpu.memory_space<vmem>>, vector<1x1x1x128xf32>
    %320 = vector.shape_cast %319 : vector<1x1x1x128xf32> to vector<1x128xf32>
    %321 = vector.extract_strided_slice %320 {offsets = [0, 0], sizes = [1, 72], strides = [1, 1]} : vector<1x128xf32> to vector<1x72xf32>
    %322 = vector.broadcast %321 : vector<1x72xf32> to vector<16x72xf32>
    %323 = arith.mulf %322, %312 : vector<16x72xf32>
    %324 = arith.addf %299, %323 : vector<16x72xf32>
    %c8_197 = arith.constant 8 : index
    %c2_198 = arith.constant 2 : index
    %c0_199 = arith.constant 0 : index
    %c0_200 = arith.constant 0 : index
    %325 = vector.load %arg3[%c8_197, %c2_198, %c0_199, %c0_200] : memref<9x4x1x128xf32, #tpu.memory_space<vmem>>, vector<1x1x1x128xf32>
    %326 = vector.shape_cast %325 : vector<1x1x1x128xf32> to vector<1x128xf32>
    %327 = vector.extract_strided_slice %326 {offsets = [0, 0], sizes = [1, 72], strides = [1, 1]} : vector<1x128xf32> to vector<1x72xf32>
    %328 = vector.broadcast %327 : vector<1x72xf32> to vector<16x72xf32>
    %329 = arith.mulf %328, %312 : vector<16x72xf32>
    %330 = arith.addf %305, %329 : vector<16x72xf32>
    %c8_201 = arith.constant 8 : index
    %c3_202 = arith.constant 3 : index
    %c0_203 = arith.constant 0 : index
    %c0_204 = arith.constant 0 : index
    %331 = vector.load %arg3[%c8_201, %c3_202, %c0_203, %c0_204] : memref<9x4x1x128xf32, #tpu.memory_space<vmem>>, vector<1x1x1x128xf32>
    %332 = vector.shape_cast %331 : vector<1x1x1x128xf32> to vector<1x128xf32>
    %333 = vector.extract_strided_slice %332 {offsets = [0, 0], sizes = [1, 72], strides = [1, 1]} : vector<1x128xf32> to vector<1x72xf32>
    %334 = vector.broadcast %333 : vector<1x72xf32> to vector<16x72xf32>
    %335 = arith.mulf %334, %312 : vector<16x72xf32>
    %336 = arith.addf %311, %335 : vector<16x72xf32>
    %337 = vector.extract_strided_slice %318 {offsets = [0, 0], sizes = [16, 16], strides = [1, 1]} : vector<16x72xf32> to vector<16x16xf32>
    %338 = vector.extract_strided_slice %318 {offsets = [0, 18], sizes = [16, 16], strides = [1, 1]} : vector<16x72xf32> to vector<16x16xf32>
    %339 = arith.addf %337, %338 : vector<16x16xf32>
    %340 = vector.extract_strided_slice %318 {offsets = [0, 36], sizes = [16, 16], strides = [1, 1]} : vector<16x72xf32> to vector<16x16xf32>
    %341 = arith.addf %339, %340 : vector<16x16xf32>
    %342 = vector.extract_strided_slice %318 {offsets = [0, 54], sizes = [16, 16], strides = [1, 1]} : vector<16x72xf32> to vector<16x16xf32>
    %343 = arith.addf %341, %342 : vector<16x16xf32>
    %344 = vector.shape_cast %343 : vector<16x16xf32> to vector<1x16x16xf32>
    %cst_205 = arith.constant dense<0.000000e+00> : vector<1xf32>
    %345 = vector.multi_reduction <add>, %344, %cst_205 [1, 2] : vector<1x16x16xf32> to vector<1xf32>
    %346 = vector.shape_cast %345 : vector<1xf32> to vector<1x1x1xf32>
    %347 = vector.extract %346[0, 0, 0] : f32 from vector<1x1x1xf32>
    %348 = vector.broadcast %347 : f32 to vector<1x1xf32>
    %cst_206 = arith.constant 2.560000e+02 : f32
    %349 = vector.broadcast %cst_206 : f32 to vector<1x1xf32>
    %350 = arith.divf %348, %349 : vector<1x1xf32>
    %351 = vector.broadcast %350 : vector<1x1xf32> to vector<16x16xf32>
    %352 = arith.subf %343, %351 : vector<16x16xf32>
    %353 = arith.mulf %352, %352 : vector<16x16xf32>
    %354 = vector.shape_cast %353 : vector<16x16xf32> to vector<1x16x16xf32>
    %cst_207 = arith.constant dense<0.000000e+00> : vector<1xf32>
    %355 = vector.multi_reduction <add>, %354, %cst_207 [1, 2] : vector<1x16x16xf32> to vector<1xf32>
    %356 = vector.shape_cast %355 : vector<1xf32> to vector<1x1x1xf32>
    %357 = vector.extract %356[0, 0, 0] : f32 from vector<1x1x1xf32>
    %358 = vector.broadcast %357 : f32 to vector<1x1xf32>
    %cst_208 = arith.constant 2.560000e+02 : f32
    %359 = vector.broadcast %cst_208 : f32 to vector<1x1xf32>
    %360 = arith.divf %358, %359 : vector<1x1xf32>
    %cst_209 = arith.constant 9.99999974E-6 : f32
    %361 = vector.broadcast %cst_209 : f32 to vector<1x1xf32>
    %362 = arith.addf %360, %361 : vector<1x1xf32>
    %363 = math.rsqrt %362 : vector<1x1xf32>
    %364 = vector.broadcast %363 : vector<1x1xf32> to vector<16x16xf32>
    %365 = arith.mulf %352, %364 : vector<16x16xf32>
    %cst_210 = arith.constant 0.000000e+00 : f32
    %366 = vector.broadcast %cst_210 : f32 to vector<16x16xf32>
    %367 = arith.maximumf %365, %366 : vector<16x16xf32>
    %c3_211 = arith.constant 3 : index
    %c3_212 = arith.constant 3 : index
    %368 = vector.load %arg7[%c3_211, %c3_212] : memref<22x128xf32, #tpu.memory_space<vmem>>, vector<16x16xf32>
    tpu.vector_store %arg7[%c3_211, %c3_212], %367 {strides = array<i32>} : memref<22x128xf32, #tpu.memory_space<vmem>>, vector<16x16xf32>,
    %369 = vector.extract_strided_slice %324 {offsets = [0, 0], sizes = [16, 16], strides = [1, 1]} : vector<16x72xf32> to vector<16x16xf32>
    %370 = vector.extract_strided_slice %324 {offsets = [0, 18], sizes = [16, 16], strides = [1, 1]} : vector<16x72xf32> to vector<16x16xf32>
    %371 = arith.addf %369, %370 : vector<16x16xf32>
    %372 = vector.extract_strided_slice %324 {offsets = [0, 36], sizes = [16, 16], strides = [1, 1]} : vector<16x72xf32> to vector<16x16xf32>
    %373 = arith.addf %371, %372 : vector<16x16xf32>
    %374 = vector.extract_strided_slice %324 {offsets = [0, 54], sizes = [16, 16], strides = [1, 1]} : vector<16x72xf32> to vector<16x16xf32>
    %375 = arith.addf %373, %374 : vector<16x16xf32>
    %376 = vector.shape_cast %375 : vector<16x16xf32> to vector<1x16x16xf32>
    %cst_213 = arith.constant dense<0.000000e+00> : vector<1xf32>
    %377 = vector.multi_reduction <add>, %376, %cst_213 [1, 2] : vector<1x16x16xf32> to vector<1xf32>
    %378 = vector.shape_cast %377 : vector<1xf32> to vector<1x1x1xf32>
    %379 = vector.extract %378[0, 0, 0] : f32 from vector<1x1x1xf32>
    %380 = vector.broadcast %379 : f32 to vector<1x1xf32>
    %cst_214 = arith.constant 2.560000e+02 : f32
    %381 = vector.broadcast %cst_214 : f32 to vector<1x1xf32>
    %382 = arith.divf %380, %381 : vector<1x1xf32>
    %383 = vector.broadcast %382 : vector<1x1xf32> to vector<16x16xf32>
    %384 = arith.subf %375, %383 : vector<16x16xf32>
    %385 = arith.mulf %384, %384 : vector<16x16xf32>
    %386 = vector.shape_cast %385 : vector<16x16xf32> to vector<1x16x16xf32>
    %cst_215 = arith.constant dense<0.000000e+00> : vector<1xf32>
    %387 = vector.multi_reduction <add>, %386, %cst_215 [1, 2] : vector<1x16x16xf32> to vector<1xf32>
    %388 = vector.shape_cast %387 : vector<1xf32> to vector<1x1x1xf32>
    %389 = vector.extract %388[0, 0, 0] : f32 from vector<1x1x1xf32>
    %390 = vector.broadcast %389 : f32 to vector<1x1xf32>
    %cst_216 = arith.constant 2.560000e+02 : f32
    %391 = vector.broadcast %cst_216 : f32 to vector<1x1xf32>
    %392 = arith.divf %390, %391 : vector<1x1xf32>
    %cst_217 = arith.constant 9.99999974E-6 : f32
    %393 = vector.broadcast %cst_217 : f32 to vector<1x1xf32>
    %394 = arith.addf %392, %393 : vector<1x1xf32>
    %395 = math.rsqrt %394 : vector<1x1xf32>
    %396 = vector.broadcast %395 : vector<1x1xf32> to vector<16x16xf32>
    %397 = arith.mulf %384, %396 : vector<16x16xf32>
    %cst_218 = arith.constant 0.000000e+00 : f32
    %398 = vector.broadcast %cst_218 : f32 to vector<16x16xf32>
    %399 = arith.maximumf %397, %398 : vector<16x16xf32>
    %c3_219 = arith.constant 3 : index
    %c25 = arith.constant 25 : index
    %400 = vector.load %arg7[%c3_219, %c25] : memref<22x128xf32, #tpu.memory_space<vmem>>, vector<16x16xf32>
    tpu.vector_store %arg7[%c3_219, %c25], %399 {strides = array<i32>} : memref<22x128xf32, #tpu.memory_space<vmem>>, vector<16x16xf32>,
    %401 = vector.extract_strided_slice %330 {offsets = [0, 0], sizes = [16, 16], strides = [1, 1]} : vector<16x72xf32> to vector<16x16xf32>
    %402 = vector.extract_strided_slice %330 {offsets = [0, 18], sizes = [16, 16], strides = [1, 1]} : vector<16x72xf32> to vector<16x16xf32>
    %403 = arith.addf %401, %402 : vector<16x16xf32>
    %404 = vector.extract_strided_slice %330 {offsets = [0, 36], sizes = [16, 16], strides = [1, 1]} : vector<16x72xf32> to vector<16x16xf32>
    %405 = arith.addf %403, %404 : vector<16x16xf32>
    %406 = vector.extract_strided_slice %330 {offsets = [0, 54], sizes = [16, 16], strides = [1, 1]} : vector<16x72xf32> to vector<16x16xf32>
    %407 = arith.addf %405, %406 : vector<16x16xf32>
    %408 = vector.shape_cast %407 : vector<16x16xf32> to vector<1x16x16xf32>
    %cst_220 = arith.constant dense<0.000000e+00> : vector<1xf32>
    %409 = vector.multi_reduction <add>, %408, %cst_220 [1, 2] : vector<1x16x16xf32> to vector<1xf32>
    %410 = vector.shape_cast %409 : vector<1xf32> to vector<1x1x1xf32>
    %411 = vector.extract %410[0, 0, 0] : f32 from vector<1x1x1xf32>
    %412 = vector.broadcast %411 : f32 to vector<1x1xf32>
    %cst_221 = arith.constant 2.560000e+02 : f32
    %413 = vector.broadcast %cst_221 : f32 to vector<1x1xf32>
    %414 = arith.divf %412, %413 : vector<1x1xf32>
    %415 = vector.broadcast %414 : vector<1x1xf32> to vector<16x16xf32>
    %416 = arith.subf %407, %415 : vector<16x16xf32>
    %417 = arith.mulf %416, %416 : vector<16x16xf32>
    %418 = vector.shape_cast %417 : vector<16x16xf32> to vector<1x16x16xf32>
    %cst_222 = arith.constant dense<0.000000e+00> : vector<1xf32>
    %419 = vector.multi_reduction <add>, %418, %cst_222 [1, 2] : vector<1x16x16xf32> to vector<1xf32>
    %420 = vector.shape_cast %419 : vector<1xf32> to vector<1x1x1xf32>
    %421 = vector.extract %420[0, 0, 0] : f32 from vector<1x1x1xf32>
    %422 = vector.broadcast %421 : f32 to vector<1x1xf32>
    %cst_223 = arith.constant 2.560000e+02 : f32
    %423 = vector.broadcast %cst_223 : f32 to vector<1x1xf32>
    %424 = arith.divf %422, %423 : vector<1x1xf32>
    %cst_224 = arith.constant 9.99999974E-6 : f32
    %425 = vector.broadcast %cst_224 : f32 to vector<1x1xf32>
    %426 = arith.addf %424, %425 : vector<1x1xf32>
    %427 = math.rsqrt %426 : vector<1x1xf32>
    %428 = vector.broadcast %427 : vector<1x1xf32> to vector<16x16xf32>
    %429 = arith.mulf %416, %428 : vector<16x16xf32>
    %cst_225 = arith.constant 0.000000e+00 : f32
    %430 = vector.broadcast %cst_225 : f32 to vector<16x16xf32>
    %431 = arith.maximumf %429, %430 : vector<16x16xf32>
    %c3_226 = arith.constant 3 : index
    %c47 = arith.constant 47 : index
    %432 = vector.load %arg7[%c3_226, %c47] : memref<22x128xf32, #tpu.memory_space<vmem>>, vector<16x16xf32>
    tpu.vector_store %arg7[%c3_226, %c47], %431 {strides = array<i32>} : memref<22x128xf32, #tpu.memory_space<vmem>>, vector<16x16xf32>,
    %433 = vector.extract_strided_slice %336 {offsets = [0, 0], sizes = [16, 16], strides = [1, 1]} : vector<16x72xf32> to vector<16x16xf32>
    %434 = vector.extract_strided_slice %336 {offsets = [0, 18], sizes = [16, 16], strides = [1, 1]} : vector<16x72xf32> to vector<16x16xf32>
    %435 = arith.addf %433, %434 : vector<16x16xf32>
    %436 = vector.extract_strided_slice %336 {offsets = [0, 36], sizes = [16, 16], strides = [1, 1]} : vector<16x72xf32> to vector<16x16xf32>
    %437 = arith.addf %435, %436 : vector<16x16xf32>
    %438 = vector.extract_strided_slice %336 {offsets = [0, 54], sizes = [16, 16], strides = [1, 1]} : vector<16x72xf32> to vector<16x16xf32>
    %439 = arith.addf %437, %438 : vector<16x16xf32>
    %440 = vector.shape_cast %439 : vector<16x16xf32> to vector<1x16x16xf32>
    %cst_227 = arith.constant dense<0.000000e+00> : vector<1xf32>
    %441 = vector.multi_reduction <add>, %440, %cst_227 [1, 2] : vector<1x16x16xf32> to vector<1xf32>
    %442 = vector.shape_cast %441 : vector<1xf32> to vector<1x1x1xf32>
    %443 = vector.extract %442[0, 0, 0] : f32 from vector<1x1x1xf32>
    %444 = vector.broadcast %443 : f32 to vector<1x1xf32>
    %cst_228 = arith.constant 2.560000e+02 : f32
    %445 = vector.broadcast %cst_228 : f32 to vector<1x1xf32>
    %446 = arith.divf %444, %445 : vector<1x1xf32>
    %447 = vector.broadcast %446 : vector<1x1xf32> to vector<16x16xf32>
    %448 = arith.subf %439, %447 : vector<16x16xf32>
    %449 = arith.mulf %448, %448 : vector<16x16xf32>
    %450 = vector.shape_cast %449 : vector<16x16xf32> to vector<1x16x16xf32>
    %cst_229 = arith.constant dense<0.000000e+00> : vector<1xf32>
    %451 = vector.multi_reduction <add>, %450, %cst_229 [1, 2] : vector<1x16x16xf32> to vector<1xf32>
    %452 = vector.shape_cast %451 : vector<1xf32> to vector<1x1x1xf32>
    %453 = vector.extract %452[0, 0, 0] : f32 from vector<1x1x1xf32>
    %454 = vector.broadcast %453 : f32 to vector<1x1xf32>
    %cst_230 = arith.constant 2.560000e+02 : f32
    %455 = vector.broadcast %cst_230 : f32 to vector<1x1xf32>
    %456 = arith.divf %454, %455 : vector<1x1xf32>
    %cst_231 = arith.constant 9.99999974E-6 : f32
    %457 = vector.broadcast %cst_231 : f32 to vector<1x1xf32>
    %458 = arith.addf %456, %457 : vector<1x1xf32>
    %459 = math.rsqrt %458 : vector<1x1xf32>
    %460 = vector.broadcast %459 : vector<1x1xf32> to vector<16x16xf32>
    %461 = arith.mulf %448, %460 : vector<16x16xf32>
    %cst_232 = arith.constant 0.000000e+00 : f32
    %462 = vector.broadcast %cst_232 : f32 to vector<16x16xf32>
    %463 = arith.maximumf %461, %462 : vector<16x16xf32>
    %c3_233 = arith.constant 3 : index
    %c69 = arith.constant 69 : index
    %464 = vector.load %arg7[%c3_233, %c69] : memref<22x128xf32, #tpu.memory_space<vmem>>, vector<16x16xf32>
    tpu.vector_store %arg7[%c3_233, %c69], %463 {strides = array<i32>} : memref<22x128xf32, #tpu.memory_space<vmem>>, vector<16x16xf32>,
    %cst_234 = arith.constant 0.000000e+00 : f32
    %465 = vector.broadcast %cst_234 : f32 to vector<16x88xf32>
    %cst_235 = arith.constant 0.000000e+00 : f32
    %466 = vector.broadcast %cst_235 : f32 to vector<16x88xf32>
    %c0_236 = arith.constant 0 : index
    %c0_237 = arith.constant 0 : index
    %467 = vector.load %arg7[%c0_236, %c0_237] : memref<22x128xf32, #tpu.memory_space<vmem>>, vector<16x88xf32>
    %c0_238 = arith.constant 0 : index
    %c0_239 = arith.constant 0 : index
    %c0_240 = arith.constant 0 : index
    %468 = vector.load %arg4[%c0_238, %c0_239, %c0_240] : memref<49x1x128xf32, #tpu.memory_space<vmem>>, vector<1x1x128xf32>
    %469 = vector.shape_cast %468 : vector<1x1x128xf32> to vector<1x128xf32>
    %470 = vector.extract_strided_slice %469 {offsets = [0, 0], sizes = [1, 88], strides = [1, 1]} : vector<1x128xf32> to vector<1x88xf32>
    %471 = vector.broadcast %470 : vector<1x88xf32> to vector<16x88xf32>
    %472 = arith.mulf %471, %467 : vector<16x88xf32>
    %473 = arith.addf %465, %472 : vector<16x88xf32>
    %c0_241 = arith.constant 0 : index
    %c1_242 = arith.constant 1 : index
    %474 = vector.load %arg7[%c0_241, %c1_242] : memref<22x128xf32, #tpu.memory_space<vmem>>, vector<16x88xf32>
    %c1_243 = arith.constant 1 : index
    %c0_244 = arith.constant 0 : index
    %c0_245 = arith.constant 0 : index
    %475 = vector.load %arg4[%c1_243, %c0_244, %c0_245] : memref<49x1x128xf32, #tpu.memory_space<vmem>>, vector<1x1x128xf32>
    %476 = vector.shape_cast %475 : vector<1x1x128xf32> to vector<1x128xf32>
    %477 = vector.extract_strided_slice %476 {offsets = [0, 0], sizes = [1, 88], strides = [1, 1]} : vector<1x128xf32> to vector<1x88xf32>
    %478 = vector.broadcast %477 : vector<1x88xf32> to vector<16x88xf32>
    %479 = arith.mulf %478, %474 : vector<16x88xf32>
    %480 = arith.addf %466, %479 : vector<16x88xf32>
    %c0_246 = arith.constant 0 : index
    %c2_247 = arith.constant 2 : index
    %481 = vector.load %arg7[%c0_246, %c2_247] : memref<22x128xf32, #tpu.memory_space<vmem>>, vector<16x88xf32>
    %c2_248 = arith.constant 2 : index
    %c0_249 = arith.constant 0 : index
    %c0_250 = arith.constant 0 : index
    %482 = vector.load %arg4[%c2_248, %c0_249, %c0_250] : memref<49x1x128xf32, #tpu.memory_space<vmem>>, vector<1x1x128xf32>
    %483 = vector.shape_cast %482 : vector<1x1x128xf32> to vector<1x128xf32>
    %484 = vector.extract_strided_slice %483 {offsets = [0, 0], sizes = [1, 88], strides = [1, 1]} : vector<1x128xf32> to vector<1x88xf32>
    %485 = vector.broadcast %484 : vector<1x88xf32> to vector<16x88xf32>
    %486 = arith.mulf %485, %481 : vector<16x88xf32>
    %487 = arith.addf %473, %486 : vector<16x88xf32>
    %c0_251 = arith.constant 0 : index
    %c3_252 = arith.constant 3 : index
    %488 = vector.load %arg7[%c0_251, %c3_252] : memref<22x128xf32, #tpu.memory_space<vmem>>, vector<16x88xf32>
    %c3_253 = arith.constant 3 : index
    %c0_254 = arith.constant 0 : index
    %c0_255 = arith.constant 0 : index
    %489 = vector.load %arg4[%c3_253, %c0_254, %c0_255] : memref<49x1x128xf32, #tpu.memory_space<vmem>>, vector<1x1x128xf32>
    %490 = vector.shape_cast %489 : vector<1x1x128xf32> to vector<1x128xf32>
    %491 = vector.extract_strided_slice %490 {offsets = [0, 0], sizes = [1, 88], strides = [1, 1]} : vector<1x128xf32> to vector<1x88xf32>
    %492 = vector.broadcast %491 : vector<1x88xf32> to vector<16x88xf32>
    %493 = arith.mulf %492, %488 : vector<16x88xf32>
    %494 = arith.addf %480, %493 : vector<16x88xf32>
    %c0_256 = arith.constant 0 : index
    %c4_257 = arith.constant 4 : index
    %495 = vector.load %arg7[%c0_256, %c4_257] : memref<22x128xf32, #tpu.memory_space<vmem>>, vector<16x88xf32>
    %c4_258 = arith.constant 4 : index
    %c0_259 = arith.constant 0 : index
    %c0_260 = arith.constant 0 : index
    %496 = vector.load %arg4[%c4_258, %c0_259, %c0_260] : memref<49x1x128xf32, #tpu.memory_space<vmem>>, vector<1x1x128xf32>
    %497 = vector.shape_cast %496 : vector<1x1x128xf32> to vector<1x128xf32>
    %498 = vector.extract_strided_slice %497 {offsets = [0, 0], sizes = [1, 88], strides = [1, 1]} : vector<1x128xf32> to vector<1x88xf32>
    %499 = vector.broadcast %498 : vector<1x88xf32> to vector<16x88xf32>
    %500 = arith.mulf %499, %495 : vector<16x88xf32>
    %501 = arith.addf %487, %500 : vector<16x88xf32>
    %c0_261 = arith.constant 0 : index
    %c5_262 = arith.constant 5 : index
    %502 = vector.load %arg7[%c0_261, %c5_262] : memref<22x128xf32, #tpu.memory_space<vmem>>, vector<16x88xf32>
    %c5_263 = arith.constant 5 : index
    %c0_264 = arith.constant 0 : index
    %c0_265 = arith.constant 0 : index
    %503 = vector.load %arg4[%c5_263, %c0_264, %c0_265] : memref<49x1x128xf32, #tpu.memory_space<vmem>>, vector<1x1x128xf32>
    %504 = vector.shape_cast %503 : vector<1x1x128xf32> to vector<1x128xf32>
    %505 = vector.extract_strided_slice %504 {offsets = [0, 0], sizes = [1, 88], strides = [1, 1]} : vector<1x128xf32> to vector<1x88xf32>
    %506 = vector.broadcast %505 : vector<1x88xf32> to vector<16x88xf32>
    %507 = arith.mulf %506, %502 : vector<16x88xf32>
    %508 = arith.addf %494, %507 : vector<16x88xf32>
    %c0_266 = arith.constant 0 : index
    %c6_267 = arith.constant 6 : index
    %509 = vector.load %arg7[%c0_266, %c6_267] : memref<22x128xf32, #tpu.memory_space<vmem>>, vector<16x88xf32>
    %c6_268 = arith.constant 6 : index
    %c0_269 = arith.constant 0 : index
    %c0_270 = arith.constant 0 : index
    %510 = vector.load %arg4[%c6_268, %c0_269, %c0_270] : memref<49x1x128xf32, #tpu.memory_space<vmem>>, vector<1x1x128xf32>
    %511 = vector.shape_cast %510 : vector<1x1x128xf32> to vector<1x128xf32>
    %512 = vector.extract_strided_slice %511 {offsets = [0, 0], sizes = [1, 88], strides = [1, 1]} : vector<1x128xf32> to vector<1x88xf32>
    %513 = vector.broadcast %512 : vector<1x88xf32> to vector<16x88xf32>
    %514 = arith.mulf %513, %509 : vector<16x88xf32>
    %515 = arith.addf %501, %514 : vector<16x88xf32>
    %c1_271 = arith.constant 1 : index
    %c0_272 = arith.constant 0 : index
    %516 = vector.load %arg7[%c1_271, %c0_272] : memref<22x128xf32, #tpu.memory_space<vmem>>, vector<16x88xf32>
    %c7_273 = arith.constant 7 : index
    %c0_274 = arith.constant 0 : index
    %c0_275 = arith.constant 0 : index
    %517 = vector.load %arg4[%c7_273, %c0_274, %c0_275] : memref<49x1x128xf32, #tpu.memory_space<vmem>>, vector<1x1x128xf32>
    %518 = vector.shape_cast %517 : vector<1x1x128xf32> to vector<1x128xf32>
    %519 = vector.extract_strided_slice %518 {offsets = [0, 0], sizes = [1, 88], strides = [1, 1]} : vector<1x128xf32> to vector<1x88xf32>
    %520 = vector.broadcast %519 : vector<1x88xf32> to vector<16x88xf32>
    %521 = arith.mulf %520, %516 : vector<16x88xf32>
    %522 = arith.addf %508, %521 : vector<16x88xf32>
    %c1_276 = arith.constant 1 : index
    %c1_277 = arith.constant 1 : index
    %523 = vector.load %arg7[%c1_276, %c1_277] : memref<22x128xf32, #tpu.memory_space<vmem>>, vector<16x88xf32>
    %c8_278 = arith.constant 8 : index
    %c0_279 = arith.constant 0 : index
    %c0_280 = arith.constant 0 : index
    %524 = vector.load %arg4[%c8_278, %c0_279, %c0_280] : memref<49x1x128xf32, #tpu.memory_space<vmem>>, vector<1x1x128xf32>
    %525 = vector.shape_cast %524 : vector<1x1x128xf32> to vector<1x128xf32>
    %526 = vector.extract_strided_slice %525 {offsets = [0, 0], sizes = [1, 88], strides = [1, 1]} : vector<1x128xf32> to vector<1x88xf32>
    %527 = vector.broadcast %526 : vector<1x88xf32> to vector<16x88xf32>
    %528 = arith.mulf %527, %523 : vector<16x88xf32>
    %529 = arith.addf %515, %528 : vector<16x88xf32>
    %c1_281 = arith.constant 1 : index
    %c2_282 = arith.constant 2 : index
    %530 = vector.load %arg7[%c1_281, %c2_282] : memref<22x128xf32, #tpu.memory_space<vmem>>, vector<16x88xf32>
    %c9 = arith.constant 9 : index
    %c0_283 = arith.constant 0 : index
    %c0_284 = arith.constant 0 : index
    %531 = vector.load %arg4[%c9, %c0_283, %c0_284] : memref<49x1x128xf32, #tpu.memory_space<vmem>>, vector<1x1x128xf32>
    %532 = vector.shape_cast %531 : vector<1x1x128xf32> to vector<1x128xf32>
    %533 = vector.extract_strided_slice %532 {offsets = [0, 0], sizes = [1, 88], strides = [1, 1]} : vector<1x128xf32> to vector<1x88xf32>
    %534 = vector.broadcast %533 : vector<1x88xf32> to vector<16x88xf32>
    %535 = arith.mulf %534, %530 : vector<16x88xf32>
    %536 = arith.addf %522, %535 : vector<16x88xf32>
    %c1_285 = arith.constant 1 : index
    %c3_286 = arith.constant 3 : index
    %537 = vector.load %arg7[%c1_285, %c3_286] : memref<22x128xf32, #tpu.memory_space<vmem>>, vector<16x88xf32>
    %c10 = arith.constant 10 : index
    %c0_287 = arith.constant 0 : index
    %c0_288 = arith.constant 0 : index
    %538 = vector.load %arg4[%c10, %c0_287, %c0_288] : memref<49x1x128xf32, #tpu.memory_space<vmem>>, vector<1x1x128xf32>
    %539 = vector.shape_cast %538 : vector<1x1x128xf32> to vector<1x128xf32>
    %540 = vector.extract_strided_slice %539 {offsets = [0, 0], sizes = [1, 88], strides = [1, 1]} : vector<1x128xf32> to vector<1x88xf32>
    %541 = vector.broadcast %540 : vector<1x88xf32> to vector<16x88xf32>
    %542 = arith.mulf %541, %537 : vector<16x88xf32>
    %543 = arith.addf %529, %542 : vector<16x88xf32>
    %c1_289 = arith.constant 1 : index
    %c4_290 = arith.constant 4 : index
    %544 = vector.load %arg7[%c1_289, %c4_290] : memref<22x128xf32, #tpu.memory_space<vmem>>, vector<16x88xf32>
    %c11 = arith.constant 11 : index
    %c0_291 = arith.constant 0 : index
    %c0_292 = arith.constant 0 : index
    %545 = vector.load %arg4[%c11, %c0_291, %c0_292] : memref<49x1x128xf32, #tpu.memory_space<vmem>>, vector<1x1x128xf32>
    %546 = vector.shape_cast %545 : vector<1x1x128xf32> to vector<1x128xf32>
    %547 = vector.extract_strided_slice %546 {offsets = [0, 0], sizes = [1, 88], strides = [1, 1]} : vector<1x128xf32> to vector<1x88xf32>
    %548 = vector.broadcast %547 : vector<1x88xf32> to vector<16x88xf32>
    %549 = arith.mulf %548, %544 : vector<16x88xf32>
    %550 = arith.addf %536, %549 : vector<16x88xf32>
    %c1_293 = arith.constant 1 : index
    %c5_294 = arith.constant 5 : index
    %551 = vector.load %arg7[%c1_293, %c5_294] : memref<22x128xf32, #tpu.memory_space<vmem>>, vector<16x88xf32>
    %c12 = arith.constant 12 : index
    %c0_295 = arith.constant 0 : index
    %c0_296 = arith.constant 0 : index
    %552 = vector.load %arg4[%c12, %c0_295, %c0_296] : memref<49x1x128xf32, #tpu.memory_space<vmem>>, vector<1x1x128xf32>
    %553 = vector.shape_cast %552 : vector<1x1x128xf32> to vector<1x128xf32>
    %554 = vector.extract_strided_slice %553 {offsets = [0, 0], sizes = [1, 88], strides = [1, 1]} : vector<1x128xf32> to vector<1x88xf32>
    %555 = vector.broadcast %554 : vector<1x88xf32> to vector<16x88xf32>
    %556 = arith.mulf %555, %551 : vector<16x88xf32>
    %557 = arith.addf %543, %556 : vector<16x88xf32>
    %c1_297 = arith.constant 1 : index
    %c6_298 = arith.constant 6 : index
    %558 = vector.load %arg7[%c1_297, %c6_298] : memref<22x128xf32, #tpu.memory_space<vmem>>, vector<16x88xf32>
    %c13 = arith.constant 13 : index
    %c0_299 = arith.constant 0 : index
    %c0_300 = arith.constant 0 : index
    %559 = vector.load %arg4[%c13, %c0_299, %c0_300] : memref<49x1x128xf32, #tpu.memory_space<vmem>>, vector<1x1x128xf32>
    %560 = vector.shape_cast %559 : vector<1x1x128xf32> to vector<1x128xf32>
    %561 = vector.extract_strided_slice %560 {offsets = [0, 0], sizes = [1, 88], strides = [1, 1]} : vector<1x128xf32> to vector<1x88xf32>
    %562 = vector.broadcast %561 : vector<1x88xf32> to vector<16x88xf32>
    %563 = arith.mulf %562, %558 : vector<16x88xf32>
    %564 = arith.addf %550, %563 : vector<16x88xf32>
    %c2_301 = arith.constant 2 : index
    %c0_302 = arith.constant 0 : index
    %565 = vector.load %arg7[%c2_301, %c0_302] : memref<22x128xf32, #tpu.memory_space<vmem>>, vector<16x88xf32>
    %c14 = arith.constant 14 : index
    %c0_303 = arith.constant 0 : index
    %c0_304 = arith.constant 0 : index
    %566 = vector.load %arg4[%c14, %c0_303, %c0_304] : memref<49x1x128xf32, #tpu.memory_space<vmem>>, vector<1x1x128xf32>
    %567 = vector.shape_cast %566 : vector<1x1x128xf32> to vector<1x128xf32>
    %568 = vector.extract_strided_slice %567 {offsets = [0, 0], sizes = [1, 88], strides = [1, 1]} : vector<1x128xf32> to vector<1x88xf32>
    %569 = vector.broadcast %568 : vector<1x88xf32> to vector<16x88xf32>
    %570 = arith.mulf %569, %565 : vector<16x88xf32>
    %571 = arith.addf %557, %570 : vector<16x88xf32>
    %c2_305 = arith.constant 2 : index
    %c1_306 = arith.constant 1 : index
    %572 = vector.load %arg7[%c2_305, %c1_306] : memref<22x128xf32, #tpu.memory_space<vmem>>, vector<16x88xf32>
    %c15 = arith.constant 15 : index
    %c0_307 = arith.constant 0 : index
    %c0_308 = arith.constant 0 : index
    %573 = vector.load %arg4[%c15, %c0_307, %c0_308] : memref<49x1x128xf32, #tpu.memory_space<vmem>>, vector<1x1x128xf32>
    %574 = vector.shape_cast %573 : vector<1x1x128xf32> to vector<1x128xf32>
    %575 = vector.extract_strided_slice %574 {offsets = [0, 0], sizes = [1, 88], strides = [1, 1]} : vector<1x128xf32> to vector<1x88xf32>
    %576 = vector.broadcast %575 : vector<1x88xf32> to vector<16x88xf32>
    %577 = arith.mulf %576, %572 : vector<16x88xf32>
    %578 = arith.addf %564, %577 : vector<16x88xf32>
    %c2_309 = arith.constant 2 : index
    %c2_310 = arith.constant 2 : index
    %579 = vector.load %arg7[%c2_309, %c2_310] : memref<22x128xf32, #tpu.memory_space<vmem>>, vector<16x88xf32>
    %c16 = arith.constant 16 : index
    %c0_311 = arith.constant 0 : index
    %c0_312 = arith.constant 0 : index
    %580 = vector.load %arg4[%c16, %c0_311, %c0_312] : memref<49x1x128xf32, #tpu.memory_space<vmem>>, vector<1x1x128xf32>
    %581 = vector.shape_cast %580 : vector<1x1x128xf32> to vector<1x128xf32>
    %582 = vector.extract_strided_slice %581 {offsets = [0, 0], sizes = [1, 88], strides = [1, 1]} : vector<1x128xf32> to vector<1x88xf32>
    %583 = vector.broadcast %582 : vector<1x88xf32> to vector<16x88xf32>
    %584 = arith.mulf %583, %579 : vector<16x88xf32>
    %585 = arith.addf %571, %584 : vector<16x88xf32>
    %c2_313 = arith.constant 2 : index
    %c3_314 = arith.constant 3 : index
    %586 = vector.load %arg7[%c2_313, %c3_314] : memref<22x128xf32, #tpu.memory_space<vmem>>, vector<16x88xf32>
    %c17 = arith.constant 17 : index
    %c0_315 = arith.constant 0 : index
    %c0_316 = arith.constant 0 : index
    %587 = vector.load %arg4[%c17, %c0_315, %c0_316] : memref<49x1x128xf32, #tpu.memory_space<vmem>>, vector<1x1x128xf32>
    %588 = vector.shape_cast %587 : vector<1x1x128xf32> to vector<1x128xf32>
    %589 = vector.extract_strided_slice %588 {offsets = [0, 0], sizes = [1, 88], strides = [1, 1]} : vector<1x128xf32> to vector<1x88xf32>
    %590 = vector.broadcast %589 : vector<1x88xf32> to vector<16x88xf32>
    %591 = arith.mulf %590, %586 : vector<16x88xf32>
    %592 = arith.addf %578, %591 : vector<16x88xf32>
    %c2_317 = arith.constant 2 : index
    %c4_318 = arith.constant 4 : index
    %593 = vector.load %arg7[%c2_317, %c4_318] : memref<22x128xf32, #tpu.memory_space<vmem>>, vector<16x88xf32>
    %c18 = arith.constant 18 : index
    %c0_319 = arith.constant 0 : index
    %c0_320 = arith.constant 0 : index
    %594 = vector.load %arg4[%c18, %c0_319, %c0_320] : memref<49x1x128xf32, #tpu.memory_space<vmem>>, vector<1x1x128xf32>
    %595 = vector.shape_cast %594 : vector<1x1x128xf32> to vector<1x128xf32>
    %596 = vector.extract_strided_slice %595 {offsets = [0, 0], sizes = [1, 88], strides = [1, 1]} : vector<1x128xf32> to vector<1x88xf32>
    %597 = vector.broadcast %596 : vector<1x88xf32> to vector<16x88xf32>
    %598 = arith.mulf %597, %593 : vector<16x88xf32>
    %599 = arith.addf %585, %598 : vector<16x88xf32>
    %c2_321 = arith.constant 2 : index
    %c5_322 = arith.constant 5 : index
    %600 = vector.load %arg7[%c2_321, %c5_322] : memref<22x128xf32, #tpu.memory_space<vmem>>, vector<16x88xf32>
    %c19_323 = arith.constant 19 : index
    %c0_324 = arith.constant 0 : index
    %c0_325 = arith.constant 0 : index
    %601 = vector.load %arg4[%c19_323, %c0_324, %c0_325] : memref<49x1x128xf32, #tpu.memory_space<vmem>>, vector<1x1x128xf32>
    %602 = vector.shape_cast %601 : vector<1x1x128xf32> to vector<1x128xf32>
    %603 = vector.extract_strided_slice %602 {offsets = [0, 0], sizes = [1, 88], strides = [1, 1]} : vector<1x128xf32> to vector<1x88xf32>
    %604 = vector.broadcast %603 : vector<1x88xf32> to vector<16x88xf32>
    %605 = arith.mulf %604, %600 : vector<16x88xf32>
    %606 = arith.addf %592, %605 : vector<16x88xf32>
    %c2_326 = arith.constant 2 : index
    %c6_327 = arith.constant 6 : index
    %607 = vector.load %arg7[%c2_326, %c6_327] : memref<22x128xf32, #tpu.memory_space<vmem>>, vector<16x88xf32>
    %c20 = arith.constant 20 : index
    %c0_328 = arith.constant 0 : index
    %c0_329 = arith.constant 0 : index
    %608 = vector.load %arg4[%c20, %c0_328, %c0_329] : memref<49x1x128xf32, #tpu.memory_space<vmem>>, vector<1x1x128xf32>
    %609 = vector.shape_cast %608 : vector<1x1x128xf32> to vector<1x128xf32>
    %610 = vector.extract_strided_slice %609 {offsets = [0, 0], sizes = [1, 88], strides = [1, 1]} : vector<1x128xf32> to vector<1x88xf32>
    %611 = vector.broadcast %610 : vector<1x88xf32> to vector<16x88xf32>
    %612 = arith.mulf %611, %607 : vector<16x88xf32>
    %613 = arith.addf %599, %612 : vector<16x88xf32>
    %c3_330 = arith.constant 3 : index
    %c0_331 = arith.constant 0 : index
    %614 = vector.load %arg7[%c3_330, %c0_331] : memref<22x128xf32, #tpu.memory_space<vmem>>, vector<16x88xf32>
    %c21 = arith.constant 21 : index
    %c0_332 = arith.constant 0 : index
    %c0_333 = arith.constant 0 : index
    %615 = vector.load %arg4[%c21, %c0_332, %c0_333] : memref<49x1x128xf32, #tpu.memory_space<vmem>>, vector<1x1x128xf32>
    %616 = vector.shape_cast %615 : vector<1x1x128xf32> to vector<1x128xf32>
    %617 = vector.extract_strided_slice %616 {offsets = [0, 0], sizes = [1, 88], strides = [1, 1]} : vector<1x128xf32> to vector<1x88xf32>
    %618 = vector.broadcast %617 : vector<1x88xf32> to vector<16x88xf32>
    %619 = arith.mulf %618, %614 : vector<16x88xf32>
    %620 = arith.addf %606, %619 : vector<16x88xf32>
    %c3_334 = arith.constant 3 : index
    %c1_335 = arith.constant 1 : index
    %621 = vector.load %arg7[%c3_334, %c1_335] : memref<22x128xf32, #tpu.memory_space<vmem>>, vector<16x88xf32>
    %c22 = arith.constant 22 : index
    %c0_336 = arith.constant 0 : index
    %c0_337 = arith.constant 0 : index
    %622 = vector.load %arg4[%c22, %c0_336, %c0_337] : memref<49x1x128xf32, #tpu.memory_space<vmem>>, vector<1x1x128xf32>
    %623 = vector.shape_cast %622 : vector<1x1x128xf32> to vector<1x128xf32>
    %624 = vector.extract_strided_slice %623 {offsets = [0, 0], sizes = [1, 88], strides = [1, 1]} : vector<1x128xf32> to vector<1x88xf32>
    %625 = vector.broadcast %624 : vector<1x88xf32> to vector<16x88xf32>
    %626 = arith.mulf %625, %621 : vector<16x88xf32>
    %627 = arith.addf %613, %626 : vector<16x88xf32>
    %c3_338 = arith.constant 3 : index
    %c2_339 = arith.constant 2 : index
    %628 = vector.load %arg7[%c3_338, %c2_339] : memref<22x128xf32, #tpu.memory_space<vmem>>, vector<16x88xf32>
    %c23 = arith.constant 23 : index
    %c0_340 = arith.constant 0 : index
    %c0_341 = arith.constant 0 : index
    %629 = vector.load %arg4[%c23, %c0_340, %c0_341] : memref<49x1x128xf32, #tpu.memory_space<vmem>>, vector<1x1x128xf32>
    %630 = vector.shape_cast %629 : vector<1x1x128xf32> to vector<1x128xf32>
    %631 = vector.extract_strided_slice %630 {offsets = [0, 0], sizes = [1, 88], strides = [1, 1]} : vector<1x128xf32> to vector<1x88xf32>
    %632 = vector.broadcast %631 : vector<1x88xf32> to vector<16x88xf32>
    %633 = arith.mulf %632, %628 : vector<16x88xf32>
    %634 = arith.addf %620, %633 : vector<16x88xf32>
    %c3_342 = arith.constant 3 : index
    %c3_343 = arith.constant 3 : index
    %635 = vector.load %arg7[%c3_342, %c3_343] : memref<22x128xf32, #tpu.memory_space<vmem>>, vector<16x88xf32>
    %c24 = arith.constant 24 : index
    %c0_344 = arith.constant 0 : index
    %c0_345 = arith.constant 0 : index
    %636 = vector.load %arg4[%c24, %c0_344, %c0_345] : memref<49x1x128xf32, #tpu.memory_space<vmem>>, vector<1x1x128xf32>
    %637 = vector.shape_cast %636 : vector<1x1x128xf32> to vector<1x128xf32>
    %638 = vector.extract_strided_slice %637 {offsets = [0, 0], sizes = [1, 88], strides = [1, 1]} : vector<1x128xf32> to vector<1x88xf32>
    %639 = vector.broadcast %638 : vector<1x88xf32> to vector<16x88xf32>
    %640 = arith.mulf %639, %635 : vector<16x88xf32>
    %641 = arith.addf %627, %640 : vector<16x88xf32>
    %c3_346 = arith.constant 3 : index
    %c4_347 = arith.constant 4 : index
    %642 = vector.load %arg7[%c3_346, %c4_347] : memref<22x128xf32, #tpu.memory_space<vmem>>, vector<16x88xf32>
    %c25_348 = arith.constant 25 : index
    %c0_349 = arith.constant 0 : index
    %c0_350 = arith.constant 0 : index
    %643 = vector.load %arg4[%c25_348, %c0_349, %c0_350] : memref<49x1x128xf32, #tpu.memory_space<vmem>>, vector<1x1x128xf32>
    %644 = vector.shape_cast %643 : vector<1x1x128xf32> to vector<1x128xf32>
    %645 = vector.extract_strided_slice %644 {offsets = [0, 0], sizes = [1, 88], strides = [1, 1]} : vector<1x128xf32> to vector<1x88xf32>
    %646 = vector.broadcast %645 : vector<1x88xf32> to vector<16x88xf32>
    %647 = arith.mulf %646, %642 : vector<16x88xf32>
    %648 = arith.addf %634, %647 : vector<16x88xf32>
    %c3_351 = arith.constant 3 : index
    %c5_352 = arith.constant 5 : index
    %649 = vector.load %arg7[%c3_351, %c5_352] : memref<22x128xf32, #tpu.memory_space<vmem>>, vector<16x88xf32>
    %c26 = arith.constant 26 : index
    %c0_353 = arith.constant 0 : index
    %c0_354 = arith.constant 0 : index
    %650 = vector.load %arg4[%c26, %c0_353, %c0_354] : memref<49x1x128xf32, #tpu.memory_space<vmem>>, vector<1x1x128xf32>
    %651 = vector.shape_cast %650 : vector<1x1x128xf32> to vector<1x128xf32>
    %652 = vector.extract_strided_slice %651 {offsets = [0, 0], sizes = [1, 88], strides = [1, 1]} : vector<1x128xf32> to vector<1x88xf32>
    %653 = vector.broadcast %652 : vector<1x88xf32> to vector<16x88xf32>
    %654 = arith.mulf %653, %649 : vector<16x88xf32>
    %655 = arith.addf %641, %654 : vector<16x88xf32>
    %c3_355 = arith.constant 3 : index
    %c6_356 = arith.constant 6 : index
    %656 = vector.load %arg7[%c3_355, %c6_356] : memref<22x128xf32, #tpu.memory_space<vmem>>, vector<16x88xf32>
    %c27 = arith.constant 27 : index
    %c0_357 = arith.constant 0 : index
    %c0_358 = arith.constant 0 : index
    %657 = vector.load %arg4[%c27, %c0_357, %c0_358] : memref<49x1x128xf32, #tpu.memory_space<vmem>>, vector<1x1x128xf32>
    %658 = vector.shape_cast %657 : vector<1x1x128xf32> to vector<1x128xf32>
    %659 = vector.extract_strided_slice %658 {offsets = [0, 0], sizes = [1, 88], strides = [1, 1]} : vector<1x128xf32> to vector<1x88xf32>
    %660 = vector.broadcast %659 : vector<1x88xf32> to vector<16x88xf32>
    %661 = arith.mulf %660, %656 : vector<16x88xf32>
    %662 = arith.addf %648, %661 : vector<16x88xf32>
    %c4_359 = arith.constant 4 : index
    %c0_360 = arith.constant 0 : index
    %663 = vector.load %arg7[%c4_359, %c0_360] : memref<22x128xf32, #tpu.memory_space<vmem>>, vector<16x88xf32>
    %c28 = arith.constant 28 : index
    %c0_361 = arith.constant 0 : index
    %c0_362 = arith.constant 0 : index
    %664 = vector.load %arg4[%c28, %c0_361, %c0_362] : memref<49x1x128xf32, #tpu.memory_space<vmem>>, vector<1x1x128xf32>
    %665 = vector.shape_cast %664 : vector<1x1x128xf32> to vector<1x128xf32>
    %666 = vector.extract_strided_slice %665 {offsets = [0, 0], sizes = [1, 88], strides = [1, 1]} : vector<1x128xf32> to vector<1x88xf32>
    %667 = vector.broadcast %666 : vector<1x88xf32> to vector<16x88xf32>
    %668 = arith.mulf %667, %663 : vector<16x88xf32>
    %669 = arith.addf %655, %668 : vector<16x88xf32>
    %c4_363 = arith.constant 4 : index
    %c1_364 = arith.constant 1 : index
    %670 = vector.load %arg7[%c4_363, %c1_364] : memref<22x128xf32, #tpu.memory_space<vmem>>, vector<16x88xf32>
    %c29 = arith.constant 29 : index
    %c0_365 = arith.constant 0 : index
    %c0_366 = arith.constant 0 : index
    %671 = vector.load %arg4[%c29, %c0_365, %c0_366] : memref<49x1x128xf32, #tpu.memory_space<vmem>>, vector<1x1x128xf32>
    %672 = vector.shape_cast %671 : vector<1x1x128xf32> to vector<1x128xf32>
    %673 = vector.extract_strided_slice %672 {offsets = [0, 0], sizes = [1, 88], strides = [1, 1]} : vector<1x128xf32> to vector<1x88xf32>
    %674 = vector.broadcast %673 : vector<1x88xf32> to vector<16x88xf32>
    %675 = arith.mulf %674, %670 : vector<16x88xf32>
    %676 = arith.addf %662, %675 : vector<16x88xf32>
    %c4_367 = arith.constant 4 : index
    %c2_368 = arith.constant 2 : index
    %677 = vector.load %arg7[%c4_367, %c2_368] : memref<22x128xf32, #tpu.memory_space<vmem>>, vector<16x88xf32>
    %c30 = arith.constant 30 : index
    %c0_369 = arith.constant 0 : index
    %c0_370 = arith.constant 0 : index
    %678 = vector.load %arg4[%c30, %c0_369, %c0_370] : memref<49x1x128xf32, #tpu.memory_space<vmem>>, vector<1x1x128xf32>
    %679 = vector.shape_cast %678 : vector<1x1x128xf32> to vector<1x128xf32>
    %680 = vector.extract_strided_slice %679 {offsets = [0, 0], sizes = [1, 88], strides = [1, 1]} : vector<1x128xf32> to vector<1x88xf32>
    %681 = vector.broadcast %680 : vector<1x88xf32> to vector<16x88xf32>
    %682 = arith.mulf %681, %677 : vector<16x88xf32>
    %683 = arith.addf %669, %682 : vector<16x88xf32>
    %c4_371 = arith.constant 4 : index
    %c3_372 = arith.constant 3 : index
    %684 = vector.load %arg7[%c4_371, %c3_372] : memref<22x128xf32, #tpu.memory_space<vmem>>, vector<16x88xf32>
    %c31 = arith.constant 31 : index
    %c0_373 = arith.constant 0 : index
    %c0_374 = arith.constant 0 : index
    %685 = vector.load %arg4[%c31, %c0_373, %c0_374] : memref<49x1x128xf32, #tpu.memory_space<vmem>>, vector<1x1x128xf32>
    %686 = vector.shape_cast %685 : vector<1x1x128xf32> to vector<1x128xf32>
    %687 = vector.extract_strided_slice %686 {offsets = [0, 0], sizes = [1, 88], strides = [1, 1]} : vector<1x128xf32> to vector<1x88xf32>
    %688 = vector.broadcast %687 : vector<1x88xf32> to vector<16x88xf32>
    %689 = arith.mulf %688, %684 : vector<16x88xf32>
    %690 = arith.addf %676, %689 : vector<16x88xf32>
    %c4_375 = arith.constant 4 : index
    %c4_376 = arith.constant 4 : index
    %691 = vector.load %arg7[%c4_375, %c4_376] : memref<22x128xf32, #tpu.memory_space<vmem>>, vector<16x88xf32>
    %c32 = arith.constant 32 : index
    %c0_377 = arith.constant 0 : index
    %c0_378 = arith.constant 0 : index
    %692 = vector.load %arg4[%c32, %c0_377, %c0_378] : memref<49x1x128xf32, #tpu.memory_space<vmem>>, vector<1x1x128xf32>
    %693 = vector.shape_cast %692 : vector<1x1x128xf32> to vector<1x128xf32>
    %694 = vector.extract_strided_slice %693 {offsets = [0, 0], sizes = [1, 88], strides = [1, 1]} : vector<1x128xf32> to vector<1x88xf32>
    %695 = vector.broadcast %694 : vector<1x88xf32> to vector<16x88xf32>
    %696 = arith.mulf %695, %691 : vector<16x88xf32>
    %697 = arith.addf %683, %696 : vector<16x88xf32>
    %c4_379 = arith.constant 4 : index
    %c5_380 = arith.constant 5 : index
    %698 = vector.load %arg7[%c4_379, %c5_380] : memref<22x128xf32, #tpu.memory_space<vmem>>, vector<16x88xf32>
    %c33 = arith.constant 33 : index
    %c0_381 = arith.constant 0 : index
    %c0_382 = arith.constant 0 : index
    %699 = vector.load %arg4[%c33, %c0_381, %c0_382] : memref<49x1x128xf32, #tpu.memory_space<vmem>>, vector<1x1x128xf32>
    %700 = vector.shape_cast %699 : vector<1x1x128xf32> to vector<1x128xf32>
    %701 = vector.extract_strided_slice %700 {offsets = [0, 0], sizes = [1, 88], strides = [1, 1]} : vector<1x128xf32> to vector<1x88xf32>
    %702 = vector.broadcast %701 : vector<1x88xf32> to vector<16x88xf32>
    %703 = arith.mulf %702, %698 : vector<16x88xf32>
    %704 = arith.addf %690, %703 : vector<16x88xf32>
    %c4_383 = arith.constant 4 : index
    %c6_384 = arith.constant 6 : index
    %705 = vector.load %arg7[%c4_383, %c6_384] : memref<22x128xf32, #tpu.memory_space<vmem>>, vector<16x88xf32>
    %c34 = arith.constant 34 : index
    %c0_385 = arith.constant 0 : index
    %c0_386 = arith.constant 0 : index
    %706 = vector.load %arg4[%c34, %c0_385, %c0_386] : memref<49x1x128xf32, #tpu.memory_space<vmem>>, vector<1x1x128xf32>
    %707 = vector.shape_cast %706 : vector<1x1x128xf32> to vector<1x128xf32>
    %708 = vector.extract_strided_slice %707 {offsets = [0, 0], sizes = [1, 88], strides = [1, 1]} : vector<1x128xf32> to vector<1x88xf32>
    %709 = vector.broadcast %708 : vector<1x88xf32> to vector<16x88xf32>
    %710 = arith.mulf %709, %705 : vector<16x88xf32>
    %711 = arith.addf %697, %710 : vector<16x88xf32>
    %c5_387 = arith.constant 5 : index
    %c0_388 = arith.constant 0 : index
    %712 = vector.load %arg7[%c5_387, %c0_388] : memref<22x128xf32, #tpu.memory_space<vmem>>, vector<16x88xf32>
    %c35 = arith.constant 35 : index
    %c0_389 = arith.constant 0 : index
    %c0_390 = arith.constant 0 : index
    %713 = vector.load %arg4[%c35, %c0_389, %c0_390] : memref<49x1x128xf32, #tpu.memory_space<vmem>>, vector<1x1x128xf32>
    %714 = vector.shape_cast %713 : vector<1x1x128xf32> to vector<1x128xf32>
    %715 = vector.extract_strided_slice %714 {offsets = [0, 0], sizes = [1, 88], strides = [1, 1]} : vector<1x128xf32> to vector<1x88xf32>
    %716 = vector.broadcast %715 : vector<1x88xf32> to vector<16x88xf32>
    %717 = arith.mulf %716, %712 : vector<16x88xf32>
    %718 = arith.addf %704, %717 : vector<16x88xf32>
    %c5_391 = arith.constant 5 : index
    %c1_392 = arith.constant 1 : index
    %719 = vector.load %arg7[%c5_391, %c1_392] : memref<22x128xf32, #tpu.memory_space<vmem>>, vector<16x88xf32>
    %c36 = arith.constant 36 : index
    %c0_393 = arith.constant 0 : index
    %c0_394 = arith.constant 0 : index
    %720 = vector.load %arg4[%c36, %c0_393, %c0_394] : memref<49x1x128xf32, #tpu.memory_space<vmem>>, vector<1x1x128xf32>
    %721 = vector.shape_cast %720 : vector<1x1x128xf32> to vector<1x128xf32>
    %722 = vector.extract_strided_slice %721 {offsets = [0, 0], sizes = [1, 88], strides = [1, 1]} : vector<1x128xf32> to vector<1x88xf32>
    %723 = vector.broadcast %722 : vector<1x88xf32> to vector<16x88xf32>
    %724 = arith.mulf %723, %719 : vector<16x88xf32>
    %725 = arith.addf %711, %724 : vector<16x88xf32>
    %c5_395 = arith.constant 5 : index
    %c2_396 = arith.constant 2 : index
    %726 = vector.load %arg7[%c5_395, %c2_396] : memref<22x128xf32, #tpu.memory_space<vmem>>, vector<16x88xf32>
    %c37_397 = arith.constant 37 : index
    %c0_398 = arith.constant 0 : index
    %c0_399 = arith.constant 0 : index
    %727 = vector.load %arg4[%c37_397, %c0_398, %c0_399] : memref<49x1x128xf32, #tpu.memory_space<vmem>>, vector<1x1x128xf32>
    %728 = vector.shape_cast %727 : vector<1x1x128xf32> to vector<1x128xf32>
    %729 = vector.extract_strided_slice %728 {offsets = [0, 0], sizes = [1, 88], strides = [1, 1]} : vector<1x128xf32> to vector<1x88xf32>
    %730 = vector.broadcast %729 : vector<1x88xf32> to vector<16x88xf32>
    %731 = arith.mulf %730, %726 : vector<16x88xf32>
    %732 = arith.addf %718, %731 : vector<16x88xf32>
    %c5_400 = arith.constant 5 : index
    %c3_401 = arith.constant 3 : index
    %733 = vector.load %arg7[%c5_400, %c3_401] : memref<22x128xf32, #tpu.memory_space<vmem>>, vector<16x88xf32>
    %c38 = arith.constant 38 : index
    %c0_402 = arith.constant 0 : index
    %c0_403 = arith.constant 0 : index
    %734 = vector.load %arg4[%c38, %c0_402, %c0_403] : memref<49x1x128xf32, #tpu.memory_space<vmem>>, vector<1x1x128xf32>
    %735 = vector.shape_cast %734 : vector<1x1x128xf32> to vector<1x128xf32>
    %736 = vector.extract_strided_slice %735 {offsets = [0, 0], sizes = [1, 88], strides = [1, 1]} : vector<1x128xf32> to vector<1x88xf32>
    %737 = vector.broadcast %736 : vector<1x88xf32> to vector<16x88xf32>
    %738 = arith.mulf %737, %733 : vector<16x88xf32>
    %739 = arith.addf %725, %738 : vector<16x88xf32>
    %c5_404 = arith.constant 5 : index
    %c4_405 = arith.constant 4 : index
    %740 = vector.load %arg7[%c5_404, %c4_405] : memref<22x128xf32, #tpu.memory_space<vmem>>, vector<16x88xf32>
    %c39 = arith.constant 39 : index
    %c0_406 = arith.constant 0 : index
    %c0_407 = arith.constant 0 : index
    %741 = vector.load %arg4[%c39, %c0_406, %c0_407] : memref<49x1x128xf32, #tpu.memory_space<vmem>>, vector<1x1x128xf32>
    %742 = vector.shape_cast %741 : vector<1x1x128xf32> to vector<1x128xf32>
    %743 = vector.extract_strided_slice %742 {offsets = [0, 0], sizes = [1, 88], strides = [1, 1]} : vector<1x128xf32> to vector<1x88xf32>
    %744 = vector.broadcast %743 : vector<1x88xf32> to vector<16x88xf32>
    %745 = arith.mulf %744, %740 : vector<16x88xf32>
    %746 = arith.addf %732, %745 : vector<16x88xf32>
    %c5_408 = arith.constant 5 : index
    %c5_409 = arith.constant 5 : index
    %747 = vector.load %arg7[%c5_408, %c5_409] : memref<22x128xf32, #tpu.memory_space<vmem>>, vector<16x88xf32>
    %c40 = arith.constant 40 : index
    %c0_410 = arith.constant 0 : index
    %c0_411 = arith.constant 0 : index
    %748 = vector.load %arg4[%c40, %c0_410, %c0_411] : memref<49x1x128xf32, #tpu.memory_space<vmem>>, vector<1x1x128xf32>
    %749 = vector.shape_cast %748 : vector<1x1x128xf32> to vector<1x128xf32>
    %750 = vector.extract_strided_slice %749 {offsets = [0, 0], sizes = [1, 88], strides = [1, 1]} : vector<1x128xf32> to vector<1x88xf32>
    %751 = vector.broadcast %750 : vector<1x88xf32> to vector<16x88xf32>
    %752 = arith.mulf %751, %747 : vector<16x88xf32>
    %753 = arith.addf %739, %752 : vector<16x88xf32>
    %c5_412 = arith.constant 5 : index
    %c6_413 = arith.constant 6 : index
    %754 = vector.load %arg7[%c5_412, %c6_413] : memref<22x128xf32, #tpu.memory_space<vmem>>, vector<16x88xf32>
    %c41 = arith.constant 41 : index
    %c0_414 = arith.constant 0 : index
    %c0_415 = arith.constant 0 : index
    %755 = vector.load %arg4[%c41, %c0_414, %c0_415] : memref<49x1x128xf32, #tpu.memory_space<vmem>>, vector<1x1x128xf32>
    %756 = vector.shape_cast %755 : vector<1x1x128xf32> to vector<1x128xf32>
    %757 = vector.extract_strided_slice %756 {offsets = [0, 0], sizes = [1, 88], strides = [1, 1]} : vector<1x128xf32> to vector<1x88xf32>
    %758 = vector.broadcast %757 : vector<1x88xf32> to vector<16x88xf32>
    %759 = arith.mulf %758, %754 : vector<16x88xf32>
    %760 = arith.addf %746, %759 : vector<16x88xf32>
    %c6_416 = arith.constant 6 : index
    %c0_417 = arith.constant 0 : index
    %761 = vector.load %arg7[%c6_416, %c0_417] : memref<22x128xf32, #tpu.memory_space<vmem>>, vector<16x88xf32>
    %c42 = arith.constant 42 : index
    %c0_418 = arith.constant 0 : index
    %c0_419 = arith.constant 0 : index
    %762 = vector.load %arg4[%c42, %c0_418, %c0_419] : memref<49x1x128xf32, #tpu.memory_space<vmem>>, vector<1x1x128xf32>
    %763 = vector.shape_cast %762 : vector<1x1x128xf32> to vector<1x128xf32>
    %764 = vector.extract_strided_slice %763 {offsets = [0, 0], sizes = [1, 88], strides = [1, 1]} : vector<1x128xf32> to vector<1x88xf32>
    %765 = vector.broadcast %764 : vector<1x88xf32> to vector<16x88xf32>
    %766 = arith.mulf %765, %761 : vector<16x88xf32>
    %767 = arith.addf %753, %766 : vector<16x88xf32>
    %c6_420 = arith.constant 6 : index
    %c1_421 = arith.constant 1 : index
    %768 = vector.load %arg7[%c6_420, %c1_421] : memref<22x128xf32, #tpu.memory_space<vmem>>, vector<16x88xf32>
    %c43 = arith.constant 43 : index
    %c0_422 = arith.constant 0 : index
    %c0_423 = arith.constant 0 : index
    %769 = vector.load %arg4[%c43, %c0_422, %c0_423] : memref<49x1x128xf32, #tpu.memory_space<vmem>>, vector<1x1x128xf32>
    %770 = vector.shape_cast %769 : vector<1x1x128xf32> to vector<1x128xf32>
    %771 = vector.extract_strided_slice %770 {offsets = [0, 0], sizes = [1, 88], strides = [1, 1]} : vector<1x128xf32> to vector<1x88xf32>
    %772 = vector.broadcast %771 : vector<1x88xf32> to vector<16x88xf32>
    %773 = arith.mulf %772, %768 : vector<16x88xf32>
    %774 = arith.addf %760, %773 : vector<16x88xf32>
    %c6_424 = arith.constant 6 : index
    %c2_425 = arith.constant 2 : index
    %775 = vector.load %arg7[%c6_424, %c2_425] : memref<22x128xf32, #tpu.memory_space<vmem>>, vector<16x88xf32>
    %c44 = arith.constant 44 : index
    %c0_426 = arith.constant 0 : index
    %c0_427 = arith.constant 0 : index
    %776 = vector.load %arg4[%c44, %c0_426, %c0_427] : memref<49x1x128xf32, #tpu.memory_space<vmem>>, vector<1x1x128xf32>
    %777 = vector.shape_cast %776 : vector<1x1x128xf32> to vector<1x128xf32>
    %778 = vector.extract_strided_slice %777 {offsets = [0, 0], sizes = [1, 88], strides = [1, 1]} : vector<1x128xf32> to vector<1x88xf32>
    %779 = vector.broadcast %778 : vector<1x88xf32> to vector<16x88xf32>
    %780 = arith.mulf %779, %775 : vector<16x88xf32>
    %781 = arith.addf %767, %780 : vector<16x88xf32>
    %c6_428 = arith.constant 6 : index
    %c3_429 = arith.constant 3 : index
    %782 = vector.load %arg7[%c6_428, %c3_429] : memref<22x128xf32, #tpu.memory_space<vmem>>, vector<16x88xf32>
    %c45 = arith.constant 45 : index
    %c0_430 = arith.constant 0 : index
    %c0_431 = arith.constant 0 : index
    %783 = vector.load %arg4[%c45, %c0_430, %c0_431] : memref<49x1x128xf32, #tpu.memory_space<vmem>>, vector<1x1x128xf32>
    %784 = vector.shape_cast %783 : vector<1x1x128xf32> to vector<1x128xf32>
    %785 = vector.extract_strided_slice %784 {offsets = [0, 0], sizes = [1, 88], strides = [1, 1]} : vector<1x128xf32> to vector<1x88xf32>
    %786 = vector.broadcast %785 : vector<1x88xf32> to vector<16x88xf32>
    %787 = arith.mulf %786, %782 : vector<16x88xf32>
    %788 = arith.addf %774, %787 : vector<16x88xf32>
    %c6_432 = arith.constant 6 : index
    %c4_433 = arith.constant 4 : index
    %789 = vector.load %arg7[%c6_432, %c4_433] : memref<22x128xf32, #tpu.memory_space<vmem>>, vector<16x88xf32>
    %c46 = arith.constant 46 : index
    %c0_434 = arith.constant 0 : index
    %c0_435 = arith.constant 0 : index
    %790 = vector.load %arg4[%c46, %c0_434, %c0_435] : memref<49x1x128xf32, #tpu.memory_space<vmem>>, vector<1x1x128xf32>
    %791 = vector.shape_cast %790 : vector<1x1x128xf32> to vector<1x128xf32>
    %792 = vector.extract_strided_slice %791 {offsets = [0, 0], sizes = [1, 88], strides = [1, 1]} : vector<1x128xf32> to vector<1x88xf32>
    %793 = vector.broadcast %792 : vector<1x88xf32> to vector<16x88xf32>
    %794 = arith.mulf %793, %789 : vector<16x88xf32>
    %795 = arith.addf %781, %794 : vector<16x88xf32>
    %c6_436 = arith.constant 6 : index
    %c5_437 = arith.constant 5 : index
    %796 = vector.load %arg7[%c6_436, %c5_437] : memref<22x128xf32, #tpu.memory_space<vmem>>, vector<16x88xf32>
    %c47_438 = arith.constant 47 : index
    %c0_439 = arith.constant 0 : index
    %c0_440 = arith.constant 0 : index
    %797 = vector.load %arg4[%c47_438, %c0_439, %c0_440] : memref<49x1x128xf32, #tpu.memory_space<vmem>>, vector<1x1x128xf32>
    %798 = vector.shape_cast %797 : vector<1x1x128xf32> to vector<1x128xf32>
    %799 = vector.extract_strided_slice %798 {offsets = [0, 0], sizes = [1, 88], strides = [1, 1]} : vector<1x128xf32> to vector<1x88xf32>
    %800 = vector.broadcast %799 : vector<1x88xf32> to vector<16x88xf32>
    %801 = arith.mulf %800, %796 : vector<16x88xf32>
    %802 = arith.addf %788, %801 : vector<16x88xf32>
    %c6_441 = arith.constant 6 : index
    %c6_442 = arith.constant 6 : index
    %803 = vector.load %arg7[%c6_441, %c6_442] : memref<22x128xf32, #tpu.memory_space<vmem>>, vector<16x88xf32>
    %c48 = arith.constant 48 : index
    %c0_443 = arith.constant 0 : index
    %c0_444 = arith.constant 0 : index
    %804 = vector.load %arg4[%c48, %c0_443, %c0_444] : memref<49x1x128xf32, #tpu.memory_space<vmem>>, vector<1x1x128xf32>
    %805 = vector.shape_cast %804 : vector<1x1x128xf32> to vector<1x128xf32>
    %806 = vector.extract_strided_slice %805 {offsets = [0, 0], sizes = [1, 88], strides = [1, 1]} : vector<1x128xf32> to vector<1x88xf32>
    %807 = vector.broadcast %806 : vector<1x88xf32> to vector<16x88xf32>
    %808 = arith.mulf %807, %803 : vector<16x88xf32>
    %809 = arith.addf %795, %808 : vector<16x88xf32>
    %810 = arith.addf %809, %802 : vector<16x88xf32>
    %811 = vector.extract_strided_slice %810 {offsets = [0, 0], sizes = [16, 16], strides = [1, 1]} : vector<16x88xf32> to vector<16x16xf32>
    %812 = vector.extract_strided_slice %810 {offsets = [0, 22], sizes = [16, 16], strides = [1, 1]} : vector<16x88xf32> to vector<16x16xf32>
    %813 = arith.addf %811, %812 : vector<16x16xf32>
    %814 = vector.extract_strided_slice %810 {offsets = [0, 44], sizes = [16, 16], strides = [1, 1]} : vector<16x88xf32> to vector<16x16xf32>
    %815 = arith.addf %813, %814 : vector<16x16xf32>
    %816 = vector.extract_strided_slice %810 {offsets = [0, 66], sizes = [16, 16], strides = [1, 1]} : vector<16x88xf32> to vector<16x16xf32>
    %817 = arith.addf %815, %816 : vector<16x16xf32>
    %818 = vector.shape_cast %817 : vector<16x16xf32> to vector<1x16x16xf32>
    %cst_445 = arith.constant dense<0.000000e+00> : vector<1xf32>
    %819 = vector.multi_reduction <add>, %818, %cst_445 [1, 2] : vector<1x16x16xf32> to vector<1xf32>
    %820 = vector.shape_cast %819 : vector<1xf32> to vector<1x1x1xf32>
    %821 = vector.extract %820[0, 0, 0] : f32 from vector<1x1x1xf32>
    %822 = vector.broadcast %821 : f32 to vector<1x1xf32>
    %cst_446 = arith.constant 2.560000e+02 : f32
    %823 = vector.broadcast %cst_446 : f32 to vector<1x1xf32>
    %824 = arith.divf %822, %823 : vector<1x1xf32>
    %825 = vector.broadcast %824 : vector<1x1xf32> to vector<16x16xf32>
    %826 = arith.subf %817, %825 : vector<16x16xf32>
    %827 = arith.mulf %826, %826 : vector<16x16xf32>
    %828 = vector.shape_cast %827 : vector<16x16xf32> to vector<1x16x16xf32>
    %cst_447 = arith.constant dense<0.000000e+00> : vector<1xf32>
    %829 = vector.multi_reduction <add>, %828, %cst_447 [1, 2] : vector<1x16x16xf32> to vector<1xf32>
    %830 = vector.shape_cast %829 : vector<1xf32> to vector<1x1x1xf32>
    %831 = vector.extract %830[0, 0, 0] : f32 from vector<1x1x1xf32>
    %832 = vector.broadcast %831 : f32 to vector<1x1xf32>
    %cst_448 = arith.constant 2.560000e+02 : f32
    %833 = vector.broadcast %cst_448 : f32 to vector<1x1xf32>
    %834 = arith.divf %832, %833 : vector<1x1xf32>
    %cst_449 = arith.constant 9.99999974E-6 : f32
    %835 = vector.broadcast %cst_449 : f32 to vector<1x1xf32>
    %836 = arith.addf %834, %835 : vector<1x1xf32>
    %837 = math.rsqrt %836 : vector<1x1xf32>
    %838 = vector.broadcast %837 : vector<1x1xf32> to vector<16x16xf32>
    %839 = arith.mulf %826, %838 : vector<16x16xf32>
    %840 = arith.negf %839 : vector<16x16xf32>
    %841 = math.exp %840 : vector<16x16xf32>
    %cst_450 = arith.constant 1.000000e+00 : f32
    %842 = vector.broadcast %cst_450 : f32 to vector<16x16xf32>
    %843 = arith.addf %842, %841 : vector<16x16xf32>
    %844 = arith.divf %842, %843 : vector<16x16xf32>
    %cst_451 = arith.constant 1.000000e+00 : f32
    %845 = vector.broadcast %cst_451 : f32 to vector<16x16xf32>
    %846 = arith.addf %845, %844 : vector<16x16xf32>
    %c1_452 = arith.constant 1 : index
    %c1_453 = arith.constant 1 : index
    %847 = vector.load %arg6[%c1_452, %c1_453] : memref<18x128xf32, #tpu.memory_space<vmem>>, vector<16x16xf32>
    %848 = arith.mulf %847, %846 : vector<16x16xf32>
    %c1_454 = arith.constant 1 : index
    %c19_455 = arith.constant 19 : index
    %849 = vector.load %arg6[%c1_454, %c19_455] : memref<18x128xf32, #tpu.memory_space<vmem>>, vector<16x16xf32>
    %850 = arith.mulf %849, %846 : vector<16x16xf32>
    %c1_456 = arith.constant 1 : index
    %c37_457 = arith.constant 37 : index
    %851 = vector.load %arg6[%c1_456, %c37_457] : memref<18x128xf32, #tpu.memory_space<vmem>>, vector<16x16xf32>
    %852 = arith.mulf %851, %846 : vector<16x16xf32>
    %c1_458 = arith.constant 1 : index
    %c55_459 = arith.constant 55 : index
    %853 = vector.load %arg6[%c1_458, %c55_459] : memref<18x128xf32, #tpu.memory_space<vmem>>, vector<16x16xf32>
    %854 = arith.mulf %853, %846 : vector<16x16xf32>
    %855 = vector.shape_cast %848 : vector<16x16xf32> to vector<1x16x16xf32>
    %856 = vector.shape_cast %850 : vector<16x16xf32> to vector<1x16x16xf32>
    %857 = vector.shape_cast %852 : vector<16x16xf32> to vector<1x16x16xf32>
    %858 = vector.shape_cast %854 : vector<16x16xf32> to vector<1x16x16xf32>
    %859 = tpu.concatenate %855, %856, %857, %858 in 0 : vector<1x16x16xf32>, vector<1x16x16xf32>, vector<1x16x16xf32>, vector<1x16x16xf32> -> vector<4x16x16xf32>
    %c0_460 = arith.constant 0 : index
    %c0_461 = arith.constant 0 : index
    %c0_462 = arith.constant 0 : index
    %c0_463 = arith.constant 0 : index
    %860 = vector.load %arg5[%c0_460, %c0_461, %c0_462, %c0_463] : memref<1x4x16x16xf32, #tpu.memory_space<vmem>>, vector<1x4x16x16xf32>
    %861 = vector.shape_cast %860 : vector<1x4x16x16xf32> to vector<4x16x16xf32>
    %862 = vector.shape_cast %859 : vector<4x16x16xf32> to vector<1x4x16x16xf32>
    tpu.vector_store %arg5[%c0_460, %c0_461, %c0_462, %c0_463], %862 {strides = array<i32>} : memref<1x4x16x16xf32, #tpu.memory_space<vmem>>, vector<1x4x16x16xf32>,
    return
  }
  func.func @transform_0(%arg0: i32) -> (i32, i32, i32, i32) {
    %c0_i32 = arith.constant 0 : i32
    %c0_i32_0 = arith.constant 0 : i32
    %c0_i32_1 = arith.constant 0 : i32
    %c0_i32_2 = arith.constant 0 : i32
    return %arg0, %c0_i32, %c0_i32_0, %c0_i32_1 : i32, i32, i32, i32
  }
  func.func @transform_1(%arg0: i32) -> i32 {
    %c0_i32 = arith.constant 0 : i32
    %c0_i32_0 = arith.constant 0 : i32
    return %c0_i32 : i32
  }
  func.func @transform_2(%arg0: i32) -> (i32, i32, i32, i32) {
    %c0_i32 = arith.constant 0 : i32
    %c0_i32_0 = arith.constant 0 : i32
    %c0_i32_1 = arith.constant 0 : i32
    %c0_i32_2 = arith.constant 0 : i32
    %c0_i32_3 = arith.constant 0 : i32
    return %c0_i32, %c0_i32_0, %c0_i32_1, %c0_i32_2 : i32, i32, i32, i32
  }
  func.func @transform_3(%arg0: i32) -> (i32, i32, i32) {
    %c0_i32 = arith.constant 0 : i32
    %c0_i32_0 = arith.constant 0 : i32
    %c0_i32_1 = arith.constant 0 : i32
    %c0_i32_2 = arith.constant 0 : i32
    return %c0_i32, %c0_i32_0, %c0_i32_1 : i32, i32, i32
  }
  func.func @transform_4(%arg0: i32) -> (i32, i32, i32, i32) {
    %c0_i32 = arith.constant 0 : i32
    %c0_i32_0 = arith.constant 0 : i32
    %c0_i32_1 = arith.constant 0 : i32
    %c0_i32_2 = arith.constant 0 : i32
    return %arg0, %c0_i32, %c0_i32_0, %c0_i32_1 : i32, i32, i32, i32
  }
}

</mosaic_0001>

<bundles_post_ra>
// kernel: tpu_custom_call.1
= control target key start
LH: loop header
LB: loop body
LE: loop exit
PB: predicated region body
PF: predicated region fallthrough
CT: control target
= control target key end

     0   :  { %9 = vsyncpa [#allocation5], 0  ;;  %s3481_s0 = inlined_call_operand.hbm [shape: f32[2,4,16,16], index: 0, kind: input, shape index: {}]   ;;  %s3482_s1 = inlined_call_operand.hbm [shape: f32[3], index: 1, kind: input, shape index: {}]   ;;  %s3483_s2 = inlined_call_operand.hbm [shape: f32[9,4,1,128], index: 2, kind: input, shape index: {}]   ;;  %s3484_s3 = inlined_call_operand.hbm [shape: f32[49,1,128], index: 3, kind: input, shape index: {}]   ;;  %s3485_s4 = inlined_call_operand.hbm [shape: f32[2,4,16,16], index: 4, kind: output, shape index: {}]  }
   0x1   :  { %11 = vsyncpa [#allocation5 + $0x1], 0 }
   0x2   :  { %12 = vsyncpa [#allocation7], 0 }
   0x3   :  { %13 = vsyncpa [#allocation10], 0 }
   0x4   :  { %14 = vsyncpa [#allocation6], 0 }
   0x5   :  { %16 = vsyncpa [#allocation6 + $0x1], 0  ;;  %s2790_s15 = smov 0   ;;  %s2792_s16 = smov 0  }
   0x6   :  { %s2794_s17 = smov 0   ;;  %s2796_s18 = smov 0  }
   0x7 LB: > { %s2811_s19 = sadd.s32 4294967295, %s2732_s18   ;;  %s2258_s20 = sadd.s32 4294967294, %s2732_s18   ;;  %s2732_s18 = sphi %s2796_s18, %s3496_s18   ;;  %s2728_s17 = sphi %s2794_s17, %s3495_s17   ;;  %s2724_s16 = sphi %s2792_s16, %s3494_s16   ;;  %s2720_s15 = sphi %s2790_s15, %s3493_s15  }
   0x8   : > { %p42_p0 = scmp.ne.s32.totalorder %s2724_s16, %s2720_s15  ;;  %p43_p1 = scmp.eq.s32.totalorder %s2811_s19, 0 }
   0x9   : > { %p129_p2 = scmp.eq.s32.totalorder %s2811_s19, 1  ;;  %p135_p3 = scmp.eq.s32.totalorder %s2258_s20, 1 }
   0xa   : > { %p2820_p4 = por %p43_p1, %p42_p0  ;;  %p2259_p5 = scmp.ge.s32.totalorder %s2732_s18, 1 }
   0xb   : > { %p2825_p6 = por %p135_p3, %p42_p0  ;;  %p142_p7 = scmp.lt.s32.totalorder %s2732_s18, 3 }
   0xc   : > { %s163_s25 = sshll.u32 %s3483_s2, 4  ;;  %s2734_s27 = smov [#allocation9]   ;;  %s164_s25 = int_to_ptr.hbm [resolvable:$true] %s163_s25 }
   0xd   : > { %p2833_p8 = pnand %p2259_p5, %p142_p7  ;;  %s165_s28 = sshll.u32 %s2734_s27, 4  ;;  %s166_s28 = int_to_ptr.vmem [resolvable:$true] %s165_s28 }
   0xe   : > { %s154_s6 = sshll.u32 %s3482_s1, 4  ;;  %s2735_s7 = smov 16   ;;  %s155_s6 = int_to_ptr.hbm [resolvable:$true] %s154_s6 }
   0xf   : > { %p2343_p9 = pneg %p2833_p8  ;;  %s2736_s8 = smov 1  }
  0x10   : > { %s2737_s9 = smov [#allocation8]   ;;  %s177_s12 = sshll.u32 %s3484_s3, 4  ;;  %s178_s12 = int_to_ptr.hbm [resolvable:$true] %s177_s12 }
  0x11   : > { %p2841_p10 = pnand %p2343_p9, %p43_p1  ;;  %s2738_s13 = smov [#allocation11]  }
  0x12   : > { %s179_s14 = sshll.u32 %s2738_s13, 4  ;;  %s2859_s20 = sadd.s32 1, %s2732_s18   ;;  %s180_s14 = int_to_ptr.vmem [resolvable:$true] %s179_s14 }
  0x13   : > { %2349 = dma.hbm_to_vmem [thread:$0]  (!%p2841_p10), %s164_s25, 576, %s166_s28, [#allocation10], %s2735_s7, %s2735_s7, %s2736_s8  }
  0x14   : > { %2346 = dma.hbm_to_smem (!%p2841_p10), %s155_s6, 16, %s2737_s9, [#allocation7]  }
  0x15   : > { %2352 = dma.hbm_to_vmem [thread:$0]  (!%p2841_p10), %s178_s12, 784, %s180_s14, [#allocation10], %s2735_s7, %s2735_s7, %s2736_s8  }
  0x16   : > { %s26_s23 = ssub.s32 %s2732_s18, %s2859_s20  ;;  %s29_s24 = sadd.s32 1, %s2728_s17 }
  0x17   : > { %p27_p12 = scmp.eq.s32.totalorder %s26_s23, 0  ;;  %p36_p13 = scmp.ne.s32.totalorder %s2728_s17, %s2724_s16 }
  0x18   : > { %p37_p0 = scmp.eq.s32.totalorder %s2732_s18, 0  ;;  %p2364_p3 = scmp.lt.s32.totalorder %s2732_s18, 2 }
  0x19   : > { %s2869_s25 = scalar_select %p27_p12, %s2728_s17, %s29_s24  }
  0x1a   : > { %p38_p5 = por %p37_p0, %p36_p13  ;;  %p2873_p7 = por %p129_p2, %p36_p13 }
  0x1b   : > { %s193_s28 = sand.u32 1, %s2728_s17   ;;  %s2297_s29 = sshll.u32 %s2732_s18, 6 }
  0x1c   : > { %s2264_s30 = sshll.u32 %s193_s28, 6  ;;  %s202_s7 = scalar_lea.hbm %s3481_s0, %s2297_s29 }
  0x1d   : > { %s203_s8 = sshll.u32 %s202_s7, 4  ;;  %s197_s9 = scalar_lea.vmem [#allocation4], %s2264_s30  ;;  %s204_s8 = int_to_ptr.hbm [resolvable:$true] %s203_s8 }
  0x1e   : > { %s205_s10 = sshll.u32 %s197_s9, 4  ;;  %p2884_p9 = pnand %p2364_p3, %p38_p5  ;;  %s206_s10 = int_to_ptr.vmem [resolvable:$true] %s205_s10 }
  0x1f   : > { %s194_s12 = scalar_lea.sflag [#allocation5], %s193_s28  ;;  %s2628_s13 = sshra.s32 %s204_s8, 4  ;;  %s2629_s13 = int_to_ptr.hbm [resolvable:$true] %s2628_s13 }
  0x20   : > { %s2630_s14 = scalar_lea.hbm %s2629_s13, 64  ;;  %p2632_p10 = pneg %p2884_p9 }
  0x21   : > { %p2631_p2 = scmp.ne.s32.totalorder %s2629_s13, %s2630_s14  ;;  %s2635_s29 = scalar_lea.hbm %s3481_s0, 128 }
  0x22   : > { %p2636_p0 = scmp.lt.s32.totalorder %s2629_s13, %s3481_s0  ;;  %p2637_p3 = scmp.lt.s32.totalorder %s2635_s29, %s2630_s14 }
  0x23   : > { %p2633_p12 = pnand %p2632_p10, %p2631_p2 }
  0x24   : > { %p2638_p5 = por %p2637_p3, %p2636_p0 }
  0x25   : > { %p2634_p13 = pneg %p2633_p12 }
  0x27   : > { %p2639_p11 = pnand %p2638_p5, %p2634_p13 }
  0x29   : > { %2642 = shalt.err (!%p2639_p11)
}
  0x2a   : > { %s2739_s28 = smov 128   ;;  %s2740_s6 = smov 8  }
  0x2b   : > { %2356 = dma.hbm_to_vmem [thread:$0]  (!%p2884_p9), %s204_s8, 1024, %s206_s10, %s194_s12, %s2739_s28, %s2739_s28, %s2740_s6  }
  0x2c   : > { %217 = sbr.rel (%p2833_p8) target bundleno = 3049 (0xbe9), region = 36  ;;  %s2901_s7 = sand.u32 (!%p2833_p8), 1, %s2724_s16  }
  0x2d   : > { %s2268_s9 = sshll.u32 (!%p2833_p8), %s2901_s7, 6  ;;  %s220_s13 = scalar_lea.sflag (!%p2833_p8), [#allocation5], %s2901_s7 }
  0x2e   : > { %s223_s14 = scalar_lea.vmem (!%p2833_p8), [#allocation4], %s2268_s9 }
  0x31   : > { %2703 = dma.done.wait (%p2820_p4), %s220_s13, 1024  }
  0x32   : > { %2705 = vsyncadd (%p2820_p4), %s220_s13, 4294966272 }
  0x33   : > { %2707 = dma.done.wait (%p43_p1), [#allocation7], 16  }
  0x34   : > { %2709 = vsyncadd (%p43_p1), [#allocation7], 4294967280 }
  0x35   : > { %2711 = dma.done.wait (%p43_p1), [#allocation10], 1360  }
  0x36   : > { %2713 = vsyncadd (%p43_p1), [#allocation10], 4294965936 }
  0x37   : > { %244 = sfence }
  0x38   : > { %v2919_v0 = vld [vmem:[%s223_s14 + $0x20] sm:$0xff]  ;;  %v2921_v1 = vld [vmem:[%s223_s14 + $0x28] sm:$0xff]  ;;  %vm282_vm0 = vcmask 130048   ;;  %v2933_v7 = vld [vmem:[%s223_s14 + $0x30] sm:$0xff]  ;;  %v2741_v48 = vmov 256.0   ;;  %s2279_s21 = sld [smem:[#allocation8 + $0x1]] }
  0x39   : > { %v2923_v2 = vld [vmem:[%s223_s14] sm:$0xff]  ;;  %v318_v3 = vsel %vm282_vm0, %v2919_v0, 0.0  ;;  %v319_v4 = vsel %vm282_vm0, %v2921_v1, 0.0  ;;  %v2929_v5 = vld [vmem:[%s223_s14 + $0x8] sm:$0xff]  ;;  %v2935_v8 = vld [vmem:[%s223_s14 + $0x38] sm:$0xff]  ;;  %v332_v11 = vsel %vm282_vm0, %v2933_v7, 0.0  ;;  %2517 = vrcp.f32 %v2741_v48 }
  0x3a   : > { %v283_v6 = vsel %vm282_vm0, %v2923_v2, 0.0  ;;  %v320_v9 = vadd.f32 %v319_v4, %v318_v3  ;;  %v284_v10 = vsel %vm282_vm0, %v2929_v5, 0.0  ;;  %v333_v12 = vsel %vm282_vm0, %v2935_v8, 0.0  ;;  %v2943_v13 = vld [vmem:[%s223_s14 + $0x10] sm:$0xff]  ;;  %v2945_v14 = vld [vmem:[%s223_s14 + $0x18] sm:$0xff]  ;;  %s388_s26 = sld [smem:[#allocation8]] }
  0x3b   : > { %v285_v15 = vadd.f32 %v284_v10, %v283_v6  ;;  %v304_v16 = vsel %vm282_vm0, %v2943_v13, 0.0  ;;  %v305_v17 = vsel %vm282_vm0, %v2945_v14, 0.0  ;;  %v334_v18 = vadd.f32 %v333_v12, %v332_v11  ;;  %s2280_s10 = sld [smem:[#allocation8 + $0x2]]  ;;  %s2742_s24 = smov 1  }
  0x3c   : > { %321 = vadd.xlane.f32.xlu1 %v320_v9  ;;  %v306_v19 = vadd.f32 %v305_v17, %v304_v16  ;;  %s2743_s29 = smov 19   ;;  %s2744_s30 = smov 55  }
  0x3d   : > { %286 = vadd.xlane.f32.xlu0 %v285_v15  ;;  %s2745_s5 = smov 37   ;;  %s2747_s28 = smov 126  }
  0x3e   : > { %v347_v57 = vstv %s2279_s21  ;;  %s2748_s6 = smov 127   ;;  %s2749_s13 = smov 110  }
  0x3f   : > { %v2518_v49 = vpop.eup %2517  ;;  %s2750_s14 = smov 92   ;;  %s2751_s21 = smov 74  }
  0x40   : > { %v297_v50 = vmul.f32 256.0, %v2518_v49  ;;  %vm301_vm1 = vweird.f32 %v2518_v49  ;;  %v389_v58 = vstv %s388_s26 }
  0x41   : > { %v350_v60 = vstv %s2280_s10 }
  0x42   : > { %v298_v51 = vsub.f32 1.0, %v297_v50 }
  0x44   : > { %335 = vadd.xlane.f32.xlu1 %v334_v18  ;;  %v299_v52 = vmul.f32 %v2518_v49, %v298_v51 }
  0x45   : > { %307 = vadd.xlane.f32.xlu0 %v306_v19 }
  0x46   : > { %v300_v53 = vadd.f32 %v2518_v49, %v299_v52 }
  0x48   : > { %v2951_v55 = vsel %vm301_vm1, %v2518_v49, %v300_v53 }
  0xaf   : > { %v322_v20 = vpop.xlane.xlu1 %321 }
  0xb0   : > { %v323_v21 = vrot.slane %v322_v20, 4  ;;  %v287_v22 = vpop.xlane.xlu0 %286 }
  0xb1   : > { %v288_v23 = vrot.slane %v287_v22, 4 }
  0xb2   : > { %v324_v25 = vadd.f32 %v323_v21, %v322_v20 }
  0xb3   : > { %v289_v24 = vadd.f32 %v288_v23, %v287_v22 }
  0xb4   : > { %v325_v31 = vrot.slane %v324_v25, 2 }
  0xb5   : > { %v290_v26 = vrot.slane %v289_v24, 2 }
  0xb6   : > { %v326_v37 = vadd.f32 %v325_v31, %v324_v25 }
  0xb7   : > { %v336_v27 = vpop.xlane.xlu1 %335  ;;  %v291_v28 = vadd.f32 %v290_v26, %v289_v24 }
  0xb8   : > { %v337_v29 = vrot.slane %v336_v27, 4  ;;  %v308_v30 = vpop.xlane.xlu0 %307  ;;  %v327_v42 = vrot.slane %v326_v37, 1 }
  0xb9   : > { %v309_v32 = vrot.slane %v308_v30, 4  ;;  %v292_v33 = vrot.slane %v291_v28, 1 }
  0xba   : > { %v338_v34 = vadd.f32 %v337_v29, %v336_v27  ;;  %v328_v47 = vadd.f32 %v327_v42, %v326_v37 }
  0xbb   : > { %v310_v35 = vadd.f32 %v309_v32, %v308_v30  ;;  %v293_v36 = vadd.f32 %v292_v33, %v291_v28 }
  0xbc   : > { %v339_v38 = vrot.slane %v338_v34, 2 }
  0xbd   : > { %2299 = vpush %v293_v36  ;;  %v311_v39 = vrot.slane %v310_v35, 2 }
  0xbe   : > { %v340_v40 = vadd.f32 %v339_v38, %v338_v34 }
  0xbf   : > { %v312_v41 = vadd.f32 %v311_v39, %v310_v35 }
  0xc0   : > { %v341_v43 = vrot.slane %v340_v40, 1 }
  0xc1   : > { %v313_v44 = vrot.slane %v312_v41, 1 }
  0xc2   : > { %v342_v46 = vadd.f32 %v341_v43, %v340_v40 }
  0xc3   : > { %v314_v45 = vadd.f32 %v313_v44, %v312_v41 }
  0xc5   : > { %2301 = vpush %v314_v45 }
  0xc6   : > { %2303 = vpush %v328_v47 }
  0xc7   : > { %2305 = vpush %v342_v46 }
  0xee   : > { %s2300_s8 = spop %2299 }
  0xef   : > { %v295_v54 = vstv %s2300_s8 }
  0xf0   : > { %v303_v56 = vmul.f32 %v2951_v55, %v295_v54 }
  0xf2   : > { %v348_v63 = vmul.f32 %v347_v57, %v303_v56  ;;  %v390_v3 = vmul.f32 %v389_v58, %v303_v56 }
  0xf6   : > { %s2302_s11 = spop %2301 }
  0xf7   : > { %v316_v59 = vstv %s2302_s11  ;;  %s2304_s12 = spop %2303  ;;  %s2752_s11 = smov 3  }
  0xf8   : > { %v317_v61 = vmul.f32 %v316_v59, %v2951_v55  ;;  %v330_v62 = vstv %s2304_s12  ;;  %s2306_s23 = spop %2305 }
  0xf9   : > { %v331_v4 = vmul.f32 %v330_v62, %v2951_v55  ;;  %v344_v6 = vstv %s2306_s23 }
  0xfa   : > { %v351_v9 = vmul.f32 %v350_v60, %v317_v61  ;;  %v387_v10 = vmul.f32 %v347_v57, %v317_v61  ;;  %v433_v11 = vmul.f32 %v389_v58, %v317_v61  ;;  %v345_v12 = vmul.f32 %v344_v6, %v2951_v55 }
  0xfb   : > { %v394_v15 = vmul.f32 %v350_v60, %v331_v4  ;;  %v430_v16 = vmul.f32 %v347_v57, %v331_v4  ;;  %v476_v17 = vmul.f32 %v389_v58, %v331_v4 }
  0xfc   : > { %v352_v18 = vadd.f32 %v351_v9, %v348_v63  ;;  %v391_v19 = vadd.f32 %v390_v3, %v387_v10  ;;  %v437_v20 = vmul.f32 %v350_v60, %v345_v12  ;;  %v473_v21 = vmul.f32 %v347_v57, %v345_v12 }
  0xfd   : > { %v434_v22 = vadd.f32 %v433_v11, %v430_v16 }
  0xfe   : > { %v2281_v23 = vmul.f32 -1.442695, %v352_v18  ;;  %v395_v24 = vadd.f32 %v394_v15, %v391_v19  ;;  %v477_v25 = vadd.f32 %v476_v17, %v473_v21 }
  0xff   : > { %v438_v26 = vadd.f32 %v437_v20, %v434_v22 }
 0x100   : > { %2519 = vpow2.f32 %v2281_v23  ;;  %v2284_v27 = vmul.f32 -1.442695, %v395_v24  ;;  %v2289_v28 = vmul.f32 -1.442695, %v477_v25 }
 0x101   : > { %v2287_v29 = vmul.f32 -1.442695, %v438_v26 }
 0x102   : > { %2521 = vpow2.f32 %v2284_v27 }
 0x103   : > { %2523 = vpow2.f32 %v2287_v29 }
 0x104   : > { %2525 = vpow2.f32 %v2289_v28 }
 0x106   : > { %v2520_v30 = vpop.eup %2519 }
 0x107   : > { %v356_v31 = vadd.f32 1.0, %v2520_v30 }
 0x108   : > { %v2522_v32 = vpop.eup %2521 }
 0x109   : > { %v2524_v33 = vpop.eup %2523  ;;  %2527 = vrcp.f32 %v356_v31  ;;  %v399_v34 = vadd.f32 1.0, %v2522_v32  ;;  %v366_v45 = vand.u32 2147483647, %v356_v31  ;;  %v368_v46 = vand.u32 2147483648, %v356_v31 }
 0x10a   : > { %v2526_v35 = vpop.eup %2525  ;;  %v2957_v36 = vadd.f32 1.0, %v2524_v33  ;;  %vm362_vm3 = vweird.f32 %v356_v31 }
 0x10b   : > { %2529 = vrcp.f32 %v399_v34  ;;  %v481_v37 = vadd.f32 1.0, %v2526_v35  ;;  %v409_v51 = vand.u32 2147483647, %v399_v34  ;;  %v411_v52 = vand.u32 2147483648, %v399_v34 }
 0x10c   : > { %2531 = vrcp.f32 %v2957_v36  ;;  %vm367_vm6 = vcmp.eq.f32.partialorder %v366_v45, 8.507059e+37  ;;  %v369_v57 = vor.u32 1.1754944e-38, %v368_v46  ;;  %vm405_vm7 = vweird.f32 %v399_v34  ;;  %v2434_v45 = vld [vmem:[#allocation9 + $0x2] ss:$0 sm:$0xff]  ;;  %v2435_v46 = vld [vmem:[#allocation9 + $0x3] ss:$0 sm:$0xff] }
 0x10d   : > { %2533 = vrcp.f32 %v481_v37  ;;  %vm410_vm9 = vcmp.eq.f32.partialorder %v409_v51, 8.507059e+37  ;;  %v412_v63 = vor.u32 1.1754944e-38, %v411_v52  ;;  %vm487_vm11 = vweird.f32 %v481_v37 }
 0x10e   : > { %v493_v10 = vand.u32 2147483648, %v481_v37  ;;  %v491_v15 = vand.u32 2147483647, %v481_v37  ;;  %vm448_vm15 = vweird.f32 %v2957_v36  ;;  %v452_v20 = vand.u32 2147483647, %v2957_v36 }
 0x10f   : > { %v2528_v38 = vpop.eup %2527 }
 0x110   : > { %v358_v39 = vmul.f32 %v2528_v38, %v356_v31  ;;  %vm363_vm2 = vweird.f32 %v2528_v38  ;;  %v494_v17 = vor.u32 1.1754944e-38, %v493_v10  ;;  %vm492_vm13 = vcmp.eq.f32.partialorder %v491_v15, 8.507059e+37 }
 0x111   : > { %v2530_v40 = vpop.eup %2529  ;;  %vm364_vm5 = vmor %vm362_vm3, %vm363_vm2  ;;  %vm453_vm2 = vcmp.eq.f32.partialorder %v452_v20, 8.507059e+37  ;;  %vm382_vm3 = vcmask 138248  }
 0x112   : > { %v2960_v41 = vpop.eup %2531  ;;  %v359_v42 = vsub.f32 1.0, %v358_v39  ;;  %v401_v43 = vmul.f32 %v2530_v40, %v399_v34  ;;  %vm406_vm4 = vweird.f32 %v2530_v40  ;;  %v2432_v39 = vld [vmem:[#allocation9] ss:$0 sm:$0xff] }
 0x113   : > { %v2534_v44 = vpop.eup %2533  ;;  %v444_v50 = vmul.f32 %v2960_v41, %v2957_v36  ;;  %vm407_vm8 = vmor %vm405_vm7, %vm406_vm4  ;;  %vm449_vm14 = vweird.f32 %v2960_v41  ;;  %vm425_vm4 = vcmask 285848  }
 0x114   : > { %v360_v47 = vmul.f32 %v2528_v38, %v359_v42  ;;  %v402_v48 = vsub.f32 1.0, %v401_v43  ;;  %v483_v49 = vmul.f32 %v2534_v44, %v481_v37  ;;  %vm488_vm10 = vweird.f32 %v2534_v44  ;;  %vm450_vm1 = vmor %vm448_vm15, %vm449_vm14  ;;  %v2438_v42 = vld [vmem:[#allocation9 + $0x6] ss:$0 sm:$0xff]  ;;  %v2439_v43 = vld [vmem:[#allocation9 + $0x7] ss:$0 sm:$0xff] }
 0x115   : > { %v445_v61 = vsub.f32 1.0, %v444_v50  ;;  %vm489_vm12 = vmor %vm487_vm11, %vm488_vm10  ;;  %v2455_v50 = vld [vmem:[#allocation9 + $0xf] ss:$0 sm:$0xff]  ;;  %vm962_vm10 = vcmask 154648   ;;  %vm1046_vm14 = vcmask 335048  }
 0x116   : > { %v361_v53 = vadd.f32 %v2528_v38, %v360_v47  ;;  %v403_v54 = vmul.f32 %v2530_v40, %v402_v48  ;;  %v484_v56 = vsub.f32 1.0, %v483_v49  ;;  %v2452_v47 = vld [vmem:[#allocation9 + $0xc] ss:$0 sm:$0xff]  ;;  %v2453_v48 = vld [vmem:[#allocation9 + $0xd] ss:$0 sm:$0xff] }
 0x117   : > { %v446_v16 = vmul.f32 %v2960_v41, %v445_v61  ;;  %v2454_v49 = vld [vmem:[#allocation9 + $0xe] ss:$0 sm:$0xff]  ;;  %v2440_v61 = vld [vmem:[#allocation9 + $0x8] ss:$0 sm:$0xff] }
 0x118   : > { %v365_v58 = vsel %vm364_vm5, %v2528_v38, %v361_v53  ;;  %v404_v59 = vadd.f32 %v2530_v40, %v403_v54  ;;  %v485_v60 = vmul.f32 %v2534_v44, %v484_v56  ;;  %vm468_vm5 = vcmask 433448  }
 0x119   : > { %v370_v62 = vsel %vm367_vm6, %v369_v57, %v365_v58  ;;  %v447_v18 = vadd.f32 %v2960_v41, %v446_v16  ;;  %vm507_vm6 = vcmask 581048  }
 0x11a   : > { %v372_v3 = vmul.f32 %v370_v62, %v2923_v2  ;;  %v408_v4 = vsel %vm407_vm8, %v2530_v40, %v404_v59  ;;  %v486_v6 = vadd.f32 %v2534_v44, %v485_v60  ;;  %v2436_v40 = vld [vmem:[#allocation9 + $0x4] ss:$0 sm:$0xff] }
 0x11b   : > { %v413_v9 = vsel %vm410_vm9, %v412_v63, %v408_v4  ;;  %v451_v22 = vsel %vm450_vm1, %v2960_v41, %v447_v18  ;;  %v2437_v41 = vld [vmem:[#allocation9 + $0x5] ss:$0 sm:$0xff]  ;;  %v2442_v63 = vld [vmem:[#allocation9 + $0xa] ss:$0 sm:$0xff] }
 0x11c   : > { %376 = vrot.lane.b32.xlu2 %v372_v3, %s2742_s24  ;;  %v416_v11 = vmul.f32 %v2945_v14, %v413_v9  ;;  %v415_v12 = vmul.f32 %v2943_v13, %v413_v9  ;;  %v490_v2 = vsel %vm489_vm12, %v2534_v44, %v486_v6  ;;  %v454_v14 = vand.u32 2147483648, %v2957_v36  ;;  %v2433_v44 = vld [vmem:[#allocation9 + $0x1] ss:$0 sm:$0xff]  ;;  %v2443_v3 = vld [vmem:[#allocation9 + $0xb] ss:$0 sm:$0xff] }
 0x11d   : > { %v495_v19 = vsel %vm492_vm13, %v494_v17, %v490_v2  ;;  %v373_v13 = vmul.f32 %v370_v62, %v2929_v5  ;;  %v2441_v62 = vld [vmem:[#allocation9 + $0x9] ss:$0 sm:$0xff] }
 0x11e   : > { %421 = vrot.lane.b32.xlu1 %v416_v11, %s2743_s29  ;;  %419 = vrot.lane.b32.xlu0 %v415_v12, %s2743_s29  ;;  %v498_v21 = vmul.f32 %v2935_v8, %v495_v19  ;;  %v455_v23 = vor.u32 1.1754944e-38, %v454_v14  ;;  %v497_v26 = vmul.f32 %v2933_v7, %v495_v19  ;;  %v2746_v8 = vmov 0.0  }
 0x11f   : > { %265 = vst [vmem:[#allocation2] sm:$0xff] %v2746_v8 }
 0x120   : > { %v456_v24 = vsel %vm453_vm2, %v455_v23, %v451_v22  ;;  %266 = vst [vmem:[#allocation2 + $0x8] sm:$0xff] %v2746_v8 }
 0x121   : > { %v458_v25 = vmul.f32 %v2919_v0, %v456_v24  ;;  %v459_v5 = vmul.f32 %v2921_v1, %v456_v24  ;;  %267 = vst [vmem:[#allocation2 + $0x10] sm:$0x3] %v2746_v8 }
 0x122   : > { %268 = vst [vmem:[#allocation3] sm:$0xff] %v2746_v8 }
 0x123   : > { %269 = vst [vmem:[#allocation3 + $0x8] sm:$0xff] %v2746_v8 }
 0x124   : > { %378 = vrot.lane.b32.xlu2 %v373_v13, %s2742_s24  ;;  %270 = vst [vmem:[#allocation3 + $0x10] sm:$0x3f] %v2746_v8 }
 0x126   : > { %503 = vrot.lane.b32.xlu0 %v498_v21, %s2744_s30 }
 0x12c   : > { %462 = vrot.lane.b32.xlu2 %v458_v25, %s2745_s5 }
 0x134   : > { %464 = vrot.lane.b32.xlu2 %v459_v5, %s2745_s5 }
 0x13c   : > { %501 = vrot.lane.b32.xlu2 %v497_v26, %s2744_s30 }
 0x176   : > { %v377_v0 = vpop.permute.xlu2 %376 }
 0x177   : > { %383 = vst.msk [vmem:[#allocation2 + $0x1] sm:$0xff] %vm382_vm3, %v377_v0 }
 0x17e   : > { %v379_v27 = vpop.permute.xlu2 %378 }
 0x17f   : > { %384 = vst.msk [vmem:[#allocation2 + $0x9] sm:$0xff] %vm382_vm3, %v379_v27  ;;  %vm1130_vm3 = vcmask 515448  }
 0x186   : > { %v463_v28 = vpop.permute.xlu2 %462 }
 0x18e   : > { %v465_v1 = vpop.permute.xlu2 %464 }
 0x190   : > { %v422_v29 = vpop.permute.xlu1 %421  ;;  %v420_v30 = vpop.permute.xlu0 %419 }
 0x191   : > { %427 = vst.msk [vmem:[#allocation2 + $0x9] sm:$0xff] %vm425_vm4, %v422_v29 }
 0x192   : > { %426 = vst.msk [vmem:[#allocation2 + $0x1] sm:$0xff] %vm425_vm4, %v420_v30 }
 0x193   : > { %469 = vst.msk [vmem:[#allocation2 + $0x1] sm:$0xff] %vm468_vm5, %v463_v28 }
 0x194   : > { %470 = vst.msk [vmem:[#allocation2 + $0x9] sm:$0xff] %vm468_vm5, %v465_v1  ;;  %v3011_v1 = vld [vmem:[#allocation9 + $0x14] ss:$0 sm:$0xff] }
 0x196   : > { %v502_v7 = vpop.permute.xlu2 %501 }
 0x197   : > { %508 = vst.msk [vmem:[#allocation2 + $0x1] sm:$0xff] %vm507_vm6, %v502_v7 }
 0x198   : > { %v504_v31 = vpop.permute.xlu0 %503 }
 0x199   : > { %509 = vst.msk [vmem:[#allocation2 + $0x9] sm:$0xff] %vm507_vm6, %v504_v31 }
 0x19e   : > { %v510_v32 = vld [vmem:[#allocation2] sm:$0xff] }
 0x19f   : > { %596 = vrot.lane.b32.xlu0 %v510_v32, %s2747_s28  ;;  %554 = vrot.lane.b32.xlu2 %v510_v32, %s2748_s6  ;;  %v633_v35 = vld [vmem:[#allocation2 + $0x1] sm:$0xff]  ;;  %v516_v57 = vmul.f32 %v2432_v39, %v510_v32  ;;  %v525_v58 = vmul.f32 %v2433_v44, %v510_v32  ;;  %v534_v59 = vmul.f32 %v2434_v45, %v510_v32 }
 0x1a0   : > { %v511_v33 = vld [vmem:[#allocation2 + $0x8] sm:$0xff]  ;;  %v543_v60 = vmul.f32 %v2435_v46, %v510_v32  ;;  %v640_v6 = vmul.f32 %v2452_v47, %v633_v35  ;;  %v649_v9 = vmul.f32 %v2453_v48, %v633_v35  ;;  %v658_v10 = vmul.f32 %v2454_v49, %v633_v35  ;;  %v3013_v32 = vld [vmem:[#allocation9 + $0x15] ss:$0 sm:$0xff] }
 0x1a1   : > { %556 = vrot.lane.b32.xlu1 %v511_v33, %s2748_s6  ;;  %v2990_v34 = vld [vmem:[#allocation2 + $0x9] sm:$0xff]  ;;  %v517_v4 = vmul.f32 %v2432_v39, %v511_v33  ;;  %v526_v11 = vmul.f32 %v2433_v44, %v511_v33  ;;  %v535_v12 = vmul.f32 %v2434_v45, %v511_v33  ;;  %v544_v15 = vmul.f32 %v2435_v46, %v511_v33 }
 0x1a2   : > { %v2996_v36 = vld [vmem:[#allocation2 + $0x2] sm:$0xff]  ;;  %v3003_v37 = vld [vmem:[#allocation2 + $0xa] sm:$0xff]  ;;  %v667_v16 = vmul.f32 %v2455_v50, %v633_v35 }
 0x1a7   : > { %680 = vrot.lane.b32.xlu0 %v2990_v34, %s2748_s6  ;;  %598 = vrot.lane.b32.xlu2 %v511_v33, %s2747_s28  ;;  %v3015_v33 = vld [vmem:[#allocation9 + $0x16] ss:$0 sm:$0xff] }
 0x1a9   : > { %678 = vrot.lane.b32.xlu1 %v633_v35, %s2748_s6 }
 0x1af   : > { %802 = vrot.lane.b32.xlu0 %v2996_v36, %s2748_s6  ;;  %720 = vrot.lane.b32.xlu2 %v633_v35, %s2747_s28  ;;  %v3017_v35 = vld [vmem:[#allocation9 + $0x17] ss:$0 sm:$0xff] }
 0x1b1   : > { %722 = vrot.lane.b32.xlu1 %v2990_v34, %s2747_s28 }
 0x1b7   : > { %846 = vrot.lane.b32.xlu0 %v3003_v37, %s2747_s28  ;;  %804 = vrot.lane.b32.xlu2 %v3003_v37, %s2748_s6 }
 0x1b9   : > { %844 = vrot.lane.b32.xlu1 %v2996_v36, %s2747_s28 }
 0x1f9   : > { %v555_v38 = vpop.permute.xlu2 %554 }
 0x1fa   : > { %v560_v51 = vmul.f32 %v2436_v40, %v555_v38  ;;  %v569_v52 = vmul.f32 %v2437_v41, %v555_v38  ;;  %v578_v53 = vmul.f32 %v2438_v42, %v555_v38  ;;  %v587_v54 = vmul.f32 %v2439_v43, %v555_v38 }
 0x1fc   : > { %v562_v2 = vadd.f32 %v560_v51, %v516_v57  ;;  %v571_v17 = vadd.f32 %v569_v52, %v525_v58  ;;  %v580_v18 = vadd.f32 %v578_v53, %v534_v59  ;;  %v589_v19 = vadd.f32 %v587_v54, %v543_v60 }
 0x201   : > { %v599_v56 = vpop.permute.xlu2 %598 }
 0x202   : > { %v603_v23 = vmul.f32 %v2440_v61, %v599_v56  ;;  %v612_v24 = vmul.f32 %v2441_v62, %v599_v56  ;;  %v621_v25 = vmul.f32 %v2442_v63, %v599_v56  ;;  %v630_v5 = vmul.f32 %v2443_v3, %v599_v56  ;;  %v2456_v56 = vld [vmem:[#allocation9 + $0x10] ss:$0 sm:$0xff] }
 0x209   : > { %v721_v46 = vpop.permute.xlu2 %720 }
 0x211   : > { %v597_v14 = vpop.permute.xlu0 %596 }
 0x212   : > { %v602_v13 = vmul.f32 %v2440_v61, %v597_v14  ;;  %v611_v20 = vmul.f32 %v2441_v62, %v597_v14  ;;  %v620_v21 = vmul.f32 %v2442_v63, %v597_v14  ;;  %v629_v22 = vmul.f32 %v2443_v3, %v597_v14  ;;  %v2457_v61 = vld [vmem:[#allocation9 + $0x11] ss:$0 sm:$0xff]  ;;  %v2458_v62 = vld [vmem:[#allocation9 + $0x12] ss:$0 sm:$0xff]  ;;  %v2459_v63 = vld [vmem:[#allocation9 + $0x13] ss:$0 sm:$0xff] }
 0x213   : > { %v557_v26 = vpop.permute.xlu1 %556 }
 0x214   : > { %v604_v8 = vadd.f32 %v602_v13, %v562_v2  ;;  %v613_v0 = vadd.f32 %v611_v20, %v571_v17  ;;  %v622_v27 = vadd.f32 %v620_v21, %v580_v18  ;;  %v631_v28 = vadd.f32 %v629_v22, %v589_v19  ;;  %v2464_v2 = vld [vmem:[#allocation9 + $0x18] ss:$0 sm:$0xff]  ;;  %v2465_v13 = vld [vmem:[#allocation9 + $0x19] ss:$0 sm:$0xff]  ;;  %v2466_v20 = vld [vmem:[#allocation9 + $0x1a] ss:$0 sm:$0xff] }
 0x215   : > { %v561_v29 = vmul.f32 %v2436_v40, %v557_v26  ;;  %v570_v30 = vmul.f32 %v2437_v41, %v557_v26  ;;  %v579_v7 = vmul.f32 %v2438_v42, %v557_v26  ;;  %v588_v31 = vmul.f32 %v2439_v43, %v557_v26  ;;  %v2467_v21 = vld [vmem:[#allocation9 + $0x1b] ss:$0 sm:$0xff] }
 0x216   : > { %v642_v38 = vadd.f32 %v640_v6, %v604_v8  ;;  %v651_v39 = vadd.f32 %v649_v9, %v613_v0  ;;  %v660_v44 = vadd.f32 %v658_v10, %v622_v27  ;;  %v669_v45 = vadd.f32 %v667_v16, %v631_v28 }
 0x217   : > { %v563_v51 = vadd.f32 %v561_v29, %v517_v4  ;;  %v572_v52 = vadd.f32 %v570_v30, %v526_v11  ;;  %v581_v53 = vadd.f32 %v579_v7, %v535_v12  ;;  %v590_v54 = vadd.f32 %v588_v31, %v544_v15 }
 0x218   : > { %v641_v40 = vmul.f32 %v2452_v47, %v2990_v34  ;;  %v650_v41 = vmul.f32 %v2453_v48, %v2990_v34  ;;  %v659_v42 = vmul.f32 %v2454_v49, %v2990_v34  ;;  %v668_v43 = vmul.f32 %v2455_v50, %v2990_v34 }
 0x219   : > { %v605_v57 = vadd.f32 %v603_v23, %v563_v51  ;;  %v614_v58 = vadd.f32 %v612_v24, %v572_v52  ;;  %v623_v59 = vadd.f32 %v621_v25, %v581_v53  ;;  %v632_v60 = vadd.f32 %v630_v5, %v590_v54  ;;  %v681_v3 = vpop.permute.xlu0 %680 }
 0x21a   : > { %v726_v4 = vmul.f32 %v3011_v1, %v721_v46  ;;  %v735_v6 = vmul.f32 %v3013_v32, %v721_v46  ;;  %v744_v47 = vmul.f32 %v3015_v33, %v721_v46  ;;  %v753_v48 = vmul.f32 %v3017_v35, %v721_v46 }
 0x21b   : > { %v643_v49 = vadd.f32 %v641_v40, %v605_v57  ;;  %v652_v9 = vadd.f32 %v650_v41, %v614_v58  ;;  %v661_v34 = vadd.f32 %v659_v42, %v623_v59  ;;  %v670_v50 = vadd.f32 %v668_v43, %v632_v60  ;;  %v679_v10 = vpop.permute.xlu1 %678  ;;  %v3045_v59 = vpop.permute.xlu2 %804 }
 0x21c   : > { %v684_v11 = vmul.f32 %v2456_v56, %v679_v10  ;;  %v693_v12 = vmul.f32 %v2457_v61, %v679_v10  ;;  %v702_v15 = vmul.f32 %v2458_v62, %v679_v10  ;;  %v711_v16 = vmul.f32 %v2459_v63, %v679_v10 }
 0x21d   : > { %v685_v17 = vmul.f32 %v2456_v56, %v681_v3  ;;  %v694_v18 = vmul.f32 %v2457_v61, %v681_v3  ;;  %v703_v19 = vmul.f32 %v2458_v62, %v681_v3  ;;  %v712_v14 = vmul.f32 %v2459_v63, %v681_v3 }
 0x21e   : > { %v686_v22 = vadd.f32 %v684_v11, %v642_v38  ;;  %v695_v23 = vadd.f32 %v693_v12, %v651_v39  ;;  %v704_v24 = vadd.f32 %v702_v15, %v660_v44  ;;  %v713_v25 = vadd.f32 %v711_v16, %v669_v45  ;;  %v2449_v11 = vld [vmem:[#allocation9 + $0x1d] ss:$0 sm:$0xff]  ;;  %v2461_v12 = vld [vmem:[#allocation9 + $0x21] ss:$0 sm:$0xff] }
 0x21f   : > { %v764_v28 = vmul.f32 %v2464_v2, %v2996_v36  ;;  %v773_v29 = vmul.f32 %v2465_v13, %v2996_v36  ;;  %v782_v30 = vmul.f32 %v2466_v20, %v2996_v36  ;;  %v791_v7 = vmul.f32 %v2467_v21, %v2996_v36  ;;  %v2448_v36 = vld [vmem:[#allocation9 + $0x1c] ss:$0 sm:$0xff] }
 0x220   : > { %v728_v5 = vadd.f32 %v726_v4, %v686_v22  ;;  %v737_v26 = vadd.f32 %v735_v6, %v695_v23  ;;  %v746_v8 = vadd.f32 %v744_v47, %v704_v24  ;;  %v755_v0 = vadd.f32 %v753_v48, %v713_v25 }
 0x221   : > { %v3027_v27 = vpop.permute.xlu0 %802  ;;  %v687_v31 = vadd.f32 %v685_v17, %v643_v49  ;;  %v696_v46 = vadd.f32 %v694_v18, %v652_v9  ;;  %v705_v38 = vadd.f32 %v703_v19, %v661_v34  ;;  %v714_v39 = vadd.f32 %v712_v14, %v670_v50 }
 0x222   : > { %v766_v45 = vadd.f32 %v764_v28, %v728_v5  ;;  %v775_v51 = vadd.f32 %v773_v29, %v737_v26  ;;  %v3033_v52 = vadd.f32 %v782_v30, %v746_v8  ;;  %v3035_v53 = vadd.f32 %v791_v7, %v755_v0 }
 0x223   : > { %v723_v44 = vpop.permute.xlu1 %722  ;;  %v765_v43 = vmul.f32 %v2464_v2, %v3003_v37  ;;  %v774_v56 = vmul.f32 %v2465_v13, %v3003_v37  ;;  %v783_v57 = vmul.f32 %v2466_v20, %v3003_v37  ;;  %v792_v58 = vmul.f32 %v2467_v21, %v3003_v37 }
 0x224   : > { %v727_v54 = vmul.f32 %v3011_v1, %v723_v44  ;;  %v736_v40 = vmul.f32 %v3013_v32, %v723_v44  ;;  %v745_v41 = vmul.f32 %v3015_v33, %v723_v44  ;;  %v754_v42 = vmul.f32 %v3017_v35, %v723_v44  ;;  %v2460_v32 = vld [vmem:[#allocation9 + $0x20] ss:$0 sm:$0xff] }
 0x225   : > { %v808_v33 = vmul.f32 %v2448_v36, %v3027_v27  ;;  %v809_v6 = vmul.f32 %v2448_v36, %v3045_v59  ;;  %v817_v15 = vmul.f32 %v2449_v11, %v3027_v27  ;;  %v818_v16 = vmul.f32 %v2449_v11, %v3045_v59 }
 0x226   : > { %v729_v60 = vadd.f32 %v727_v54, %v687_v31  ;;  %v738_v61 = vadd.f32 %v736_v40, %v696_v46  ;;  %v747_v1 = vadd.f32 %v745_v41, %v705_v38  ;;  %v756_v62 = vadd.f32 %v754_v42, %v714_v39  ;;  %v2462_v41 = vld [vmem:[#allocation9 + $0x22] ss:$0 sm:$0xff] }
 0x227   : > { %v810_v34 = vadd.f32 %v808_v33, %v766_v45  ;;  %v819_v19 = vadd.f32 %v817_v15, %v775_v51  ;;  %v2450_v45 = vld [vmem:[#allocation9 + $0x1e] ss:$0 sm:$0xff] }
 0x228   : > { %v767_v63 = vadd.f32 %v765_v43, %v729_v60  ;;  %v776_v35 = vadd.f32 %v774_v56, %v738_v61  ;;  %v3048_v3 = vadd.f32 %v783_v57, %v747_v1  ;;  %v3050_v4 = vadd.f32 %v792_v58, %v756_v62 }
 0x229   : > { %v3053_v47 = vpop.permute.xlu0 %846  ;;  %v826_v40 = vmul.f32 %v2450_v45, %v3027_v27 }
 0x22a   : > { %v851_v37 = vmul.f32 %v2460_v32, %v3053_v47  ;;  %v811_v49 = vadd.f32 %v809_v6, %v767_v63  ;;  %v860_v17 = vmul.f32 %v2461_v12, %v3053_v47  ;;  %v820_v18 = vadd.f32 %v818_v16, %v776_v35 }
 0x22b   : > { %v3056_v48 = vpop.permute.xlu1 %844  ;;  %v828_v61 = vadd.f32 %v826_v40, %v3033_v52  ;;  %v827_v63 = vmul.f32 %v2450_v45, %v3045_v59  ;;  %v869_v35 = vmul.f32 %v2462_v41, %v3053_v47 }
 0x22c   : > { %v850_v9 = vmul.f32 %v2460_v32, %v3056_v48  ;;  %v853_v50 = vadd.f32 %v851_v37, %v811_v49  ;;  %v859_v2 = vmul.f32 %v2461_v12, %v3056_v48  ;;  %v862_v13 = vadd.f32 %v860_v17, %v820_v18 }
 0x22d   : > { %v868_v56 = vmul.f32 %v2462_v41, %v3056_v48  ;;  %v829_v6 = vadd.f32 %v827_v63, %v3048_v3 }
 0x22e   : > { %v852_v10 = vadd.f32 %v850_v9, %v810_v34  ;;  %885 = vrot.lane.b32.xlu1 %v853_v50, %s2749_s13  ;;  %v861_v14 = vadd.f32 %v859_v2, %v819_v19 }
 0x22f   : > { %v3088_v33 = vadd.f32 %v868_v56, %v828_v61  ;;  %v871_v52 = vadd.f32 %v869_v35, %v829_v6 }
 0x230   : > { %891 = vrot.lane.b32.xlu0 %v852_v10, %s2750_s14  ;;  %883 = vrot.lane.b32.xlu2 %v852_v10, %s2749_s13 }
 0x236   : > { %899 = vrot.lane.b32.xlu1 %v852_v10, %s2751_s21 }
 0x238   : > { %901 = vrot.lane.b32.xlu0 %v853_v50, %s2751_s21  ;;  %893 = vrot.lane.b32.xlu2 %v853_v50, %s2750_s14 }
 0x23e   : > { %967 = vrot.lane.b32.xlu1 %v861_v14, %s2749_s13 }
 0x240   : > { %969 = vrot.lane.b32.xlu0 %v862_v13, %s2749_s13 }
 0x246   : > { %975 = vrot.lane.b32.xlu1 %v861_v14, %s2750_s14 }
 0x248   : > { %977 = vrot.lane.b32.xlu0 %v862_v13, %s2750_s14 }
 0x24e   : > { %983 = vrot.lane.b32.xlu1 %v861_v14, %s2751_s21 }
 0x250   : > { %985 = vrot.lane.b32.xlu0 %v862_v13, %s2751_s21 }
 0x28a   : > { %v884_v20 = vpop.permute.xlu2 %883 }
 0x28b   : > { %v889_v24 = vadd.f32 %v884_v20, %v852_v10 }
 0x292   : > { %v894_v25 = vpop.permute.xlu2 %893 }
 0x2a0   : > { %v886_v21 = vpop.permute.xlu1 %885 }
 0x2a1   : > { %v890_v23 = vadd.f32 %v886_v21, %v853_v50  ;;  %v2463_v21 = vld [vmem:[#allocation9 + $0x23] ss:$0 sm:$0xff] }
 0x2a2   : > { %v892_v22 = vpop.permute.xlu0 %891 }
 0x2a3   : > { %v897_v5 = vadd.f32 %v892_v22, %v889_v24  ;;  %v898_v26 = vadd.f32 %v894_v25, %v890_v23  ;;  %v877_v22 = vmul.f32 %v2463_v21, %v3056_v48 }
 0x2a8   : > { %v900_v8 = vpop.permute.xlu1 %899 }
 0x2a9   : > { %v905_v0 = vadd.f32 %v900_v8, %v897_v5  ;;  %v878_v5 = vmul.f32 %v2463_v21, %v3053_v47 }
 0x2aa   : > { %v902_v28 = vpop.permute.xlu0 %901 }
 0x2ab   : > { %v906_v29 = vadd.f32 %v902_v28, %v898_v26  ;;  %v907_v30 = vsel %vm282_vm0, %v905_v0, 0.0 }
 0x2ad   : > { %v908_v7 = vsel %vm282_vm0, %v906_v29, 0.0 }
 0x2ae   : > { %v909_v31 = vadd.f32 %v908_v7, %v907_v30 }
 0x2b0   : > { %910 = vadd.xlane.f32.xlu2 %v909_v31  ;;  %v968_v46 = vpop.permute.xlu1 %967 }
 0x2b1   : > { %v973_v51 = vadd.f32 %v968_v46, %v861_v14 }
 0x2b2   : > { %v970_v38 = vpop.permute.xlu0 %969 }
 0x2b3   : > { %v974_v54 = vadd.f32 %v970_v38, %v862_v13  ;;  %v2451_v13 = vld [vmem:[#allocation9 + $0x1f] ss:$0 sm:$0xff] }
 0x2b4   : > { %v835_v20 = vmul.f32 %v2451_v13, %v3027_v27  ;;  %v836_v25 = vmul.f32 %v2451_v13, %v3045_v59 }
 0x2b6   : > { %v837_v23 = vadd.f32 %v835_v20, %v3035_v53  ;;  %v838_v26 = vadd.f32 %v836_v25, %v3050_v4 }
 0x2b8   : > { %v976_v39 = vpop.permute.xlu1 %975  ;;  %v3116_v24 = vadd.f32 %v877_v22, %v837_v23  ;;  %v3123_v27 = vadd.f32 %v878_v5, %v838_v26 }
 0x2b9   : > { %v981_v42 = vadd.f32 %v976_v39, %v973_v51 }
 0x2ba   : > { %v978_v44 = vpop.permute.xlu0 %977 }
 0x2bb   : > { %v982_v36 = vadd.f32 %v978_v44, %v974_v54 }
 0x2c0   : > { %v984_v43 = vpop.permute.xlu1 %983 }
 0x2c1   : > { %v3079_v57 = vadd.f32 %v984_v43, %v981_v42 }
 0x2c2   : > { %v986_v58 = vpop.permute.xlu0 %985 }
 0x2c3   : > { %v3081_v60 = vadd.f32 %v986_v58, %v982_v36  ;;  %v991_v1 = vsel %vm282_vm0, %v3079_v57, 0.0 }
 0x2c5   : > { %v992_v62 = vsel %vm282_vm0, %v3081_v60, 0.0 }
 0x2c6   : > { %v993_v32 = vadd.f32 %v992_v62, %v991_v1 }
 0x2c8   : > { %994 = vadd.xlane.f32.xlu0 %v993_v32  ;;  %1051 = vrot.lane.b32.xlu2 %v3088_v33, %s2749_s13 }
 0x2d0   : > { %1053 = vrot.lane.b32.xlu2 %v871_v52, %s2749_s13 }
 0x2d8   : > { %1067 = vrot.lane.b32.xlu2 %v3088_v33, %s2751_s21 }
 0x2dc   : > { %1061 = vrot.lane.b32.xlu0 %v871_v52, %s2750_s14 }
 0x2e0   : > { %1069 = vrot.lane.b32.xlu2 %v871_v52, %s2751_s21 }
 0x323   : > { %v911_v37 = vpop.xlane.xlu2 %910 }
 0x324   : > { %v912_v49 = vrot.slane %v911_v37, 4 }
 0x326   : > { %v913_v9 = vadd.f32 %v912_v49, %v911_v37 }
 0x328   : > { %v914_v34 = vrot.slane %v913_v9, 2 }
 0x32a   : > { %v915_v50 = vadd.f32 %v914_v34, %v913_v9 }
 0x32b   : > { %v1052_v48 = vpop.permute.xlu2 %1051 }
 0x32c   : > { %v916_v10 = vrot.slane %v915_v50, 1  ;;  %v1057_v41 = vadd.f32 %v1052_v48, %v3088_v33 }
 0x32e   : > { %v917_v11 = vadd.f32 %v916_v10, %v915_v50 }
 0x330   : > { %2307 = vpush %v917_v11 }
 0x33b   : > { %v995_v53 = vpop.xlane.xlu0 %994 }
 0x33c   : > { %v996_v59 = vrot.slane %v995_v53, 4 }
 0x33e   : > { %v997_v47 = vadd.f32 %v996_v59, %v995_v53 }
 0x340   : > { %v998_v4 = vrot.slane %v997_v47, 2 }
 0x342   : > { %v999_v30 = vadd.f32 %v998_v4, %v997_v47 }
 0x344   : > { %v1000_v46 = vrot.slane %v999_v30, 1 }
 0x346   : > { %v1001_v44 = vadd.f32 %v1000_v46, %v999_v30 }
 0x34e   : > { %v1062_v51 = vpop.permute.xlu0 %1061 }
 0x361   : > { %s2308_s26 = spop %2307 }
 0x362   : > { %v919_v3 = vstv %s2308_s26  ;;  %s2753_s26 = smov 25  }
 0x363   : > { %v920_v12 = vmul.f32 %v919_v3, %v2951_v55 }
 0x365   : > { %v3101_v15 = vsub.f32 %v905_v0, %v920_v12  ;;  %v3103_v16 = vsub.f32 %v906_v29, %v920_v12  ;;  %v1054_v29 = vpop.permute.xlu2 %1053 }
 0x366   : > { %v1058_v54 = vadd.f32 %v1054_v29, %v871_v52 }
 0x367   : > { %v923_v2 = vmul.f32 %v3101_v15, %v3101_v15  ;;  %v924_v17 = vmul.f32 %v3103_v16, %v3103_v16 }
 0x368   : > { %v1066_v40 = vadd.f32 %v1062_v51, %v1058_v54 }
 0x369   : > { %v925_v18 = vsel %vm282_vm0, %v923_v2, 0.0  ;;  %v926_v19 = vsel %vm282_vm0, %v924_v17, 0.0 }
 0x36a   : > { %v927_v14 = vadd.f32 %v926_v19, %v925_v18 }
 0x36c   : > { %928 = vadd.xlane.f32.xlu1 %v927_v14 }
 0x36d   : > { %v1068_v45 = vpop.permute.xlu2 %1067 }
 0x375   : > { %v1070_v42 = vpop.permute.xlu2 %1069 }
 0x376   : > { %v3134_v43 = vadd.f32 %v1070_v42, %v1066_v40 }
 0x378   : > { %v1076_v1 = vsel %vm282_vm0, %v3134_v43, 0.0 }
 0x385   : > { %1059 = vrot.lane.b32.xlu1 %v3088_v33, %s2750_s14 }
 0x38d   : > { %1135 = vrot.lane.b32.xlu1 %v3116_v24, %s2749_s13 }
 0x395   : > { %1137 = vrot.lane.b32.xlu1 %v3123_v27, %s2749_s13 }
 0x39d   : > { %1143 = vrot.lane.b32.xlu1 %v3116_v24, %s2750_s14 }
 0x3a5   : > { %1145 = vrot.lane.b32.xlu1 %v3123_v27, %s2750_s14 }
 0x3ad   : > { %1151 = vrot.lane.b32.xlu1 %v3116_v24, %s2751_s21 }
 0x3df   : > { %v929_v8 = vpop.xlane.xlu1 %928 }
 0x3e0   : > { %v930_v0 = vrot.slane %v929_v8, 4 }
 0x3e2   : > { %v931_v28 = vadd.f32 %v930_v0, %v929_v8 }
 0x3e4   : > { %v932_v7 = vrot.slane %v931_v28, 2 }
 0x3e6   : > { %v933_v31 = vadd.f32 %v932_v7, %v931_v28 }
 0x3e8   : > { %v934_v38 = vrot.slane %v933_v31, 1 }
 0x3ea   : > { %v935_v39 = vadd.f32 %v934_v38, %v933_v31 }
 0x3ec   : > { %2309 = vpush %v935_v39 }
 0x3ed   : > { %2311 = vpush %v1001_v44 }
 0x3f7   : > { %v1060_v36 = vpop.permute.xlu1 %1059 }
 0x3f8   : > { %v1065_v56 = vadd.f32 %v1060_v36, %v1057_v41 }
 0x3fa   : > { %v3136_v58 = vadd.f32 %v1068_v45, %v1065_v56 }
 0x3fc   : > { %v1075_v61 = vsel %vm282_vm0, %v3136_v58, 0.0 }
 0x3fd   : > { %v1077_v62 = vadd.f32 %v1076_v1, %v1075_v61 }
 0x3ff   : > { %1078 = vadd.xlane.f32.xlu0 %v1077_v62  ;;  %v1136_v20 = vpop.permute.xlu1 %1135 }
 0x400   : > { %v1141_v48 = vadd.f32 %v1136_v20, %v3116_v24 }
 0x407   : > { %v1138_v21 = vpop.permute.xlu1 %1137 }
 0x408   : > { %v1142_v0 = vadd.f32 %v1138_v21, %v3123_v27 }
 0x40f   : > { %v1144_v22 = vpop.permute.xlu1 %1143 }
 0x417   : > { %v1146_v5 = vpop.permute.xlu1 %1145 }
 0x418   : > { %v1150_v29 = vadd.f32 %v1146_v5, %v1142_v0 }
 0x41d   : > { %s2310_s8 = spop %2309 }
 0x41e   : > { %v937_v32 = vstv %s2310_s8  ;;  %s2312_s10 = spop %2311 }
 0x41f   : > { %v938_v33 = vmul.f32 %v937_v32, %v2951_v55  ;;  %v1003_v63 = vstv %s2312_s10  ;;  %v1152_v8 = vpop.permute.xlu1 %1151 }
 0x420   : > { %v1004_v35 = vmul.f32 %v1003_v63, %v2951_v55 }
 0x421   : > { %v939_v6 = vadd.f32 1e-05, %v938_v33 }
 0x422   : > { %v3145_v52 = vsub.f32 %v3079_v57, %v1004_v35  ;;  %v3148_v37 = vsub.f32 %v3081_v60, %v1004_v35 }
 0x423   : > { %2535 = vrsqrt.f32 %v939_v6  ;;  %vm946_vm8 = vweird.f32 %v939_v6 }
 0x424   : > { %v1007_v49 = vmul.f32 %v3145_v52, %v3145_v52  ;;  %v1008_v9 = vmul.f32 %v3148_v37, %v3148_v37 }
 0x426   : > { %v1009_v34 = vsel %vm282_vm0, %v1007_v49, 0.0  ;;  %v1010_v50 = vsel %vm282_vm0, %v1008_v9, 0.0 }
 0x427   : > { %v1011_v10 = vadd.f32 %v1010_v50, %v1009_v34 }
 0x429   : > { %v2536_v11 = vpop.eup %2535  ;;  %1012 = vadd.xlane.f32.xlu2 %v1011_v10 }
 0x42a   : > { %v941_v3 = vmul.f32 %v2536_v11, %v939_v6  ;;  %vm947_vm7 = vweird.f32 %v2536_v11 }
 0x42b   : > { %vm948_vm9 = vmor %vm946_vm8, %vm947_vm7  ;;  %vm1214_vm7 = vcmask 695848  }
 0x42c   : > { %v942_v57 = vmul.f32 %v2536_v11, %v941_v3 }
 0x42e   : > { %v943_v12 = vmul.f32 0.5, %v942_v57 }
 0x430   : > { %v944_v2 = vsub.f32 1.5, %v943_v12 }
 0x432   : > { %v945_v60 = vmul.f32 %v2536_v11, %v944_v2 }
 0x434   : > { %v949_v17 = vsel %vm948_vm9, %v2536_v11, %v945_v60 }
 0x435   : > { %v950_v18 = vmul.f32 %v949_v17, %v3101_v15  ;;  %v951_v14 = vmul.f32 %v949_v17, %v3103_v16  ;;  %v1149_v16 = vadd.f32 %v1144_v22, %v1141_v48 }
 0x437   : > { %v952_v19 = vmax.f32 %v950_v18, 0.0  ;;  %v953_v13 = vmax.f32 %v951_v14, 0.0  ;;  %v3162_v30 = vadd.f32 %v1152_v8, %v1149_v16 }
 0x439   : > { %956 = vrot.lane.b32.xlu0 %v952_v19, %s2752_s11  ;;  %v1159_v24 = vsel %vm282_vm0, %v3162_v30, 0.0 }
 0x441   : > { %1153 = vrot.lane.b32.xlu2 %v3123_v27, %s2751_s21 }
 0x449   : > { %958 = vrot.lane.b32.xlu2 %v953_v13, %s2752_s11  ;;  %s2754_s11 = smov 47  }
 0x472   : > { %v1079_v23 = vpop.xlane.xlu0 %1078 }
 0x473   : > { %v1080_v25 = vrot.slane %v1079_v23, 4 }
 0x475   : > { %v1081_v26 = vadd.f32 %v1080_v25, %v1079_v23 }
 0x477   : > { %v1082_v53 = vrot.slane %v1081_v26, 2 }
 0x479   : > { %v1083_v4 = vadd.f32 %v1082_v53, %v1081_v26 }
 0x47b   : > { %v1084_v46 = vrot.slane %v1083_v4, 1 }
 0x47d   : > { %v1085_v51 = vadd.f32 %v1084_v46, %v1083_v4 }
 0x49c   : > { %v1013_v59 = vpop.xlane.xlu2 %1012 }
 0x49d   : > { %v1014_v15 = vrot.slane %v1013_v59, 4 }
 0x49f   : > { %v1015_v47 = vadd.f32 %v1014_v15, %v1013_v59 }
 0x4a1   : > { %v1016_v28 = vrot.slane %v1015_v47, 2 }
 0x4a3   : > { %v1017_v7 = vadd.f32 %v1016_v28, %v1015_v47 }
 0x4a4   : > { %v1154_v31 = vpop.permute.xlu2 %1153 }
 0x4a5   : > { %v3164_v38 = vadd.f32 %v1154_v31, %v1150_v29  ;;  %v1018_v39 = vrot.slane %v1017_v7, 1 }
 0x4a7   : > { %v1019_v44 = vadd.f32 %v1018_v39, %v1017_v7  ;;  %v1160_v45 = vsel %vm282_vm0, %v3164_v38, 0.0 }
 0x4a8   : > { %v1161_v27 = vadd.f32 %v1160_v45, %v1159_v24 }
 0x4a9   : > { %2313 = vpush %v1019_v44 }
 0x4aa   : > { %2315 = vpush %v1085_v51  ;;  %1162 = vadd.xlane.f32.xlu1 %v1161_v27 }
 0x4ab   : > { %v957_v54 = vpop.permute.xlu0 %956 }
 0x4ac   : > { %963 = vst.msk [vmem:[#allocation3 + $0x3] sm:$0xff] %vm962_vm10, %v957_v54  ;;  %v959_v40 = vpop.permute.xlu2 %958 }
 0x4ad   : > { %964 = vst.msk [vmem:[#allocation3 + $0xb] sm:$0xff] %vm962_vm10, %v959_v40 }
 0x4da   : > { %s2314_s12 = spop %2313 }
 0x4db   : > { %v1021_v41 = vstv %s2314_s12  ;;  %s2316_s23 = spop %2315 }
 0x4dc   : > { %v1022_v42 = vmul.f32 %v1021_v41, %v2951_v55  ;;  %v1087_v36 = vstv %s2316_s23  ;;  %s2755_s23 = smov 69  }
 0x4dd   : > { %v1088_v56 = vmul.f32 %v1087_v36, %v2951_v55 }
 0x4de   : > { %v1023_v61 = vadd.f32 1e-05, %v1022_v42 }
 0x4df   : > { %v3173_v1 = vsub.f32 %v3136_v58, %v1088_v56  ;;  %v3176_v62 = vsub.f32 %v3134_v43, %v1088_v56 }
 0x4e0   : > { %2537 = vrsqrt.f32 %v1023_v61  ;;  %vm1030_vm12 = vweird.f32 %v1023_v61 }
 0x4e1   : > { %v1091_v32 = vmul.f32 %v3173_v1, %v3173_v1  ;;  %v1092_v33 = vmul.f32 %v3176_v62, %v3176_v62 }
 0x4e3   : > { %v1093_v63 = vsel %vm282_vm0, %v1091_v32, 0.0  ;;  %v1094_v35 = vsel %vm282_vm0, %v1092_v33, 0.0 }
 0x4e4   : > { %v1095_v6 = vadd.f32 %v1094_v35, %v1093_v63 }
 0x4e6   : > { %v2538_v49 = vpop.eup %2537  ;;  %1096 = vadd.xlane.f32.xlu0 %v1095_v6 }
 0x4e7   : > { %v1025_v9 = vmul.f32 %v2538_v49, %v1023_v61  ;;  %vm1031_vm11 = vweird.f32 %v2538_v49 }
 0x4e8   : > { %vm1032_vm13 = vmor %vm1030_vm12, %vm1031_vm11 }
 0x4e9   : > { %v1026_v58 = vmul.f32 %v2538_v49, %v1025_v9 }
 0x4eb   : > { %v1027_v34 = vmul.f32 0.5, %v1026_v58 }
 0x4ed   : > { %v1028_v50 = vsub.f32 1.5, %v1027_v34 }
 0x4ef   : > { %v1029_v43 = vmul.f32 %v2538_v49, %v1028_v50 }
 0x4f1   : > { %v1033_v10 = vsel %vm1032_vm13, %v2538_v49, %v1029_v43 }
 0x4f2   : > { %v1034_v11 = vmul.f32 %v1033_v10, %v3145_v52  ;;  %v1035_v57 = vmul.f32 %v1033_v10, %v3148_v37 }
 0x4f4   : > { %v1036_v3 = vmax.f32 %v1034_v11, 0.0  ;;  %v1037_v12 = vmax.f32 %v1035_v57, 0.0 }
 0x4f6   : > { %1040 = vrot.lane.b32.xlu2 %v1036_v3, %s2753_s26 }
 0x4fa   : > { %1042 = vrot.lane.b32.xlu0 %v1037_v12, %s2753_s26  ;;  %s2756_s26 = smov 125  }
 0x51d   : > { %v1163_v2 = vpop.xlane.xlu1 %1162 }
 0x51e   : > { %v1164_v17 = vrot.slane %v1163_v2, 4 }
 0x520   : > { %v1165_v18 = vadd.f32 %v1164_v17, %v1163_v2 }
 0x522   : > { %v1166_v19 = vrot.slane %v1165_v18, 2 }
 0x524   : > { %v1167_v21 = vadd.f32 %v1166_v19, %v1165_v18 }
 0x526   : > { %v1168_v23 = vrot.slane %v1167_v21, 1 }
 0x528   : > { %v1169_v5 = vadd.f32 %v1168_v23, %v1167_v21  ;;  %v2468_v21 = vld [vmem:[#allocation11] ss:$0 sm:$0xff] }
 0x550   : > { %v1041_v60 = vpop.permute.xlu2 %1040 }
 0x551   : > { %1047 = vst.msk [vmem:[#allocation3 + $0x3] sm:$0xff] %vm1046_vm14, %v1041_v60 }
 0x559   : > { %v1097_v14 = vpop.xlane.xlu0 %1096 }
 0x55a   : > { %v1098_v13 = vrot.slane %v1097_v14, 4 }
 0x55c   : > { %v1099_v20 = vadd.f32 %v1098_v13, %v1097_v14 }
 0x55e   : > { %v1100_v52 = vrot.slane %v1099_v20, 2 }
 0x560   : > { %v1101_v22 = vadd.f32 %v1100_v52, %v1099_v20  ;;  %v2469_v52 = vld [vmem:[#allocation11 + $0x2] ss:$0 sm:$0xff] }
 0x562   : > { %v1102_v37 = vrot.slane %v1101_v22, 1 }
 0x564   : > { %v1103_v25 = vadd.f32 %v1102_v37, %v1101_v22 }
 0x566   : > { %2317 = vpush %v1103_v25 }
 0x567   : > { %2319 = vpush %v1169_v5 }
 0x56c   : > { %v1043_v26 = vpop.permute.xlu0 %1042 }
 0x56d   : > { %1048 = vst.msk [vmem:[#allocation3 + $0xb] sm:$0xff] %vm1046_vm14, %v1043_v26 }
 0x597   : > { %s2318_s8 = spop %2317 }
 0x598   : > { %v1105_v53 = vstv %s2318_s8  ;;  %s2320_s10 = spop %2319  ;;  %s2757_s8 = smov 124  }
 0x599   : > { %v1106_v59 = vmul.f32 %v1105_v53, %v2951_v55  ;;  %v1171_v15 = vstv %s2320_s10  ;;  %s2758_s10 = smov 122  }
 0x59a   : > { %v1172_v48 = vmul.f32 %v1171_v15, %v2951_v55 }
 0x59b   : > { %v1107_v47 = vadd.f32 1e-05, %v1106_v59  ;;  %v2471_v59 = vld [vmem:[#allocation11 + $0x4] ss:$0 sm:$0xff] }
 0x59c   : > { %v1173_v8 = vsub.f32 %v3162_v30, %v1172_v48  ;;  %v1174_v4 = vsub.f32 %v3164_v38, %v1172_v48 }
 0x59d   : > { %2539 = vrsqrt.f32 %v1107_v47  ;;  %vm1114_vm1 = vweird.f32 %v1107_v47 }
 0x59e   : > { %v1175_v0 = vmul.f32 %v1173_v8, %v1173_v8  ;;  %v1176_v16 = vmul.f32 %v1174_v4, %v1174_v4 }
 0x5a0   : > { %v1177_v28 = vsel %vm282_vm0, %v1175_v0, 0.0  ;;  %v1178_v29 = vsel %vm282_vm0, %v1176_v16, 0.0 }
 0x5a1   : > { %v1179_v7 = vadd.f32 %v1178_v29, %v1177_v28  ;;  %v2472_v28 = vld [vmem:[#allocation11 + $0x3] ss:$0 sm:$0xff] }
 0x5a3   : > { %v2540_v31 = vpop.eup %2539  ;;  %1180 = vadd.xlane.f32.xlu0 %v1179_v7 }
 0x5a4   : > { %v1109_v46 = vmul.f32 %v2540_v31, %v1107_v47  ;;  %vm1115_vm15 = vweird.f32 %v2540_v31 }
 0x5a5   : > { %vm1116_vm2 = vmor %vm1114_vm1, %vm1115_vm15 }
 0x5a6   : > { %v1110_v39 = vmul.f32 %v2540_v31, %v1109_v46 }
 0x5a8   : > { %v1111_v44 = vmul.f32 0.5, %v1110_v39 }
 0x5aa   : > { %v1112_v24 = vsub.f32 1.5, %v1111_v44 }
 0x5ac   : > { %v1113_v45 = vmul.f32 %v2540_v31, %v1112_v24 }
 0x5ae   : > { %v1117_v30 = vsel %vm1116_vm2, %v2540_v31, %v1113_v45  ;;  %v2470_v31 = vld [vmem:[#allocation11 + $0x1] ss:$0 sm:$0xff] }
 0x5af   : > { %v1118_v38 = vmul.f32 %v1117_v30, %v3173_v1  ;;  %v1119_v51 = vmul.f32 %v1117_v30, %v3176_v62 }
 0x5b1   : > { %v1120_v27 = vmax.f32 %v1118_v38, 0.0  ;;  %v1121_v54 = vmax.f32 %v1119_v51, 0.0 }
 0x5b3   : > { %1124 = vrot.lane.b32.xlu2 %v1120_v27, %s2754_s11  ;;  %1126 = vrot.lane.b32.xlu1 %v1121_v54, %s2754_s11  ;;  %s2759_s11 = smov 123   ;;  %v2475_v54 = vld [vmem:[#allocation11 + $0x6] ss:$0 sm:$0xff] }
 0x60d   : > { %v1125_v40 = vpop.permute.xlu2 %1124 }
 0x60e   : > { %1131 = vst.msk [vmem:[#allocation3 + $0x3] sm:$0xff] %vm1130_vm3, %v1125_v40  ;;  %v2473_v40 = vld [vmem:[#allocation11 + $0x5] ss:$0 sm:$0xff] }
 0x616   : > { %v1181_v41 = vpop.xlane.xlu0 %1180 }
 0x617   : > { %v1182_v42 = vrot.slane %v1181_v41, 4 }
 0x619   : > { %v1183_v36 = vadd.f32 %v1182_v42, %v1181_v41  ;;  %v2474_v41 = vld [vmem:[#allocation11 + $0x8] ss:$0 sm:$0xff] }
 0x61b   : > { %v1184_v56 = vrot.slane %v1183_v36, 2 }
 0x61d   : > { %v1185_v61 = vadd.f32 %v1184_v56, %v1183_v36 }
 0x61f   : > { %v1186_v32 = vrot.slane %v1185_v61, 1 }
 0x621   : > { %v1187_v33 = vadd.f32 %v1186_v32, %v1185_v61 }
 0x623   : > { %2321 = vpush %v1187_v33  ;;  %v2476_v33 = vld [vmem:[#allocation11 + $0x7] ss:$0 sm:$0xff] }
 0x625   : > { %v1127_v63 = vpop.permute.xlu1 %1126 }
 0x626   : > { %1132 = vst.msk [vmem:[#allocation3 + $0xb] sm:$0xff] %vm1130_vm3, %v1127_v63 }
 0x654   : > { %s2322_s12 = spop %2321 }
 0x655   : > { %v1189_v1 = vstv %s2322_s12  ;;  %s2761_s12 = smov 106  }
 0x656   : > { %v1190_v62 = vmul.f32 %v1189_v1, %v2951_v55 }
 0x658   : > { %v1191_v35 = vadd.f32 1e-05, %v1190_v62 }
 0x65a   : > { %2541 = vrsqrt.f32 %v1191_v35  ;;  %vm1198_vm5 = vweird.f32 %v1191_v35 }
 0x660   : > { %v2542_v6 = vpop.eup %2541 }
 0x661   : > { %v1193_v49 = vmul.f32 %v2542_v6, %v1191_v35  ;;  %vm1199_vm4 = vweird.f32 %v2542_v6 }
 0x662   : > { %vm1200_vm6 = vmor %vm1198_vm5, %vm1199_vm4 }
 0x663   : > { %v1194_v9 = vmul.f32 %v2542_v6, %v1193_v49  ;;  %v2477_v49 = vld [vmem:[#allocation11 + $0x9] ss:$0 sm:$0xff] }
 0x665   : > { %v1195_v58 = vmul.f32 0.5, %v1194_v9 }
 0x667   : > { %v1196_v34 = vsub.f32 1.5, %v1195_v58 }
 0x669   : > { %v1197_v50 = vmul.f32 %v2542_v6, %v1196_v34 }
 0x66b   : > { %v1201_v43 = vsel %vm1200_vm6, %v2542_v6, %v1197_v50 }
 0x66c   : > { %v1203_v10 = vmul.f32 %v1201_v43, %v1174_v4  ;;  %v1202_v11 = vmul.f32 %v1201_v43, %v1173_v8 }
 0x66e   : > { %v1205_v3 = vmax.f32 %v1203_v10, 0.0  ;;  %v1204_v57 = vmax.f32 %v1202_v11, 0.0 }
 0x670   : > { %1210 = vrot.lane.b32.xlu2 %v1205_v3, %s2755_s23  ;;  %1208 = vrot.lane.b32.xlu0 %v1204_v57, %s2755_s23  ;;  %s2762_s23 = smov 62  }
 0x6ca   : > { %v1211_v12 = vpop.permute.xlu2 %1210 }
 0x6cb   : > { %1216 = vst.msk [vmem:[#allocation3 + $0xb] sm:$0xff] %vm1214_vm7, %v1211_v12 }
 0x6d2   : > { %v3267_v20 = vld [vmem:[#allocation3 + $0xb] sm:$0xff] }
 0x6d3   : > { %v3296_v29 = vld [vmem:[#allocation3 + $0xc] sm:$0xff] }
 0x6e2   : > { %v1209_v2 = vpop.permute.xlu0 %1208 }
 0x6e3   : > { %1215 = vst.msk [vmem:[#allocation3 + $0x3] sm:$0xff] %vm1214_vm7, %v1209_v2 }
 0x6ea   : > { %v3197_v60 = vld [vmem:[#allocation3] sm:$0xff]  ;;  %v1218_v17 = vld [vmem:[#allocation3 + $0x8] sm:$0xff] }
 0x6eb   : > { %1264 = vrot.lane.b32.xlu1 %v3197_v60, %s2756_s26  ;;  %1249 = vrot.lane.b32.xlu0 %v3197_v60, %s2747_s28  ;;  %v3213_v18 = vld [vmem:[#allocation3 + $0x9] sm:$0xff]  ;;  %v3220_v19 = vld [vmem:[#allocation3 + $0x1] sm:$0xff]  ;;  %v1224_v23 = vmul.f32 %v2468_v21, %v1218_v17  ;;  %v1223_v47 = vmul.f32 %v2468_v21, %v3197_v60 }
 0x6ec   : > { %1251 = vrot.lane.b32.xlu2 %v1218_v17, %s2747_s28  ;;  %v3239_v14 = vld [vmem:[#allocation3 + $0xa] sm:$0xff]  ;;  %v3247_v13 = vld [vmem:[#allocation3 + $0x2] sm:$0xff]  ;;  %v1327_v58 = vmul.f32 %v2476_v33, %v3213_v18 }
 0x6ed   : > { %v3275_v5 = vld [vmem:[#allocation3 + $0x3] sm:$0xff] }
 0x6ee   : > { %v3304_v27 = vld [vmem:[#allocation3 + $0x4] sm:$0xff] }
 0x6f3   : > { %1234 = vrot.lane.b32.xlu0 %v3197_v60, %s2748_s6  ;;  %1281 = vrot.lane.b32.xlu1 %v1218_v17, %s2757_s8 }
 0x6f4   : > { %1236 = vrot.lane.b32.xlu2 %v1218_v17, %s2748_s6 }
 0x6fb   : > { %1309 = vrot.lane.b32.xlu1 %v3197_v60, %s2758_s10  ;;  %1266 = vrot.lane.b32.xlu0 %v1218_v17, %s2756_s26 }
 0x6fc   : > { %1279 = vrot.lane.b32.xlu2 %v3197_v60, %s2757_s8 }
 0x703   : > { %1339 = vrot.lane.b32.xlu1 %v3213_v18, %s2748_s6  ;;  %1294 = vrot.lane.b32.xlu0 %v3197_v60, %s2759_s11  ;;  %v1326_v60 = vmul.f32 %v2476_v33, %v3220_v19 }
 0x704   : > { %1296 = vrot.lane.b32.xlu2 %v1218_v17, %s2759_s11 }
 0x70b   : > { %1367 = vrot.lane.b32.xlu1 %v3220_v19, %s2756_s26  ;;  %1311 = vrot.lane.b32.xlu0 %v1218_v17, %s2758_s10  ;;  %v2479_v17 = vld [vmem:[#allocation11 + $0xa] ss:$0 sm:$0xff] }
 0x70c   : > { %1337 = vrot.lane.b32.xlu2 %v3220_v19, %s2748_s6 }
 0x713   : > { %1384 = vrot.lane.b32.xlu1 %v3213_v18, %s2757_s8  ;;  %1352 = vrot.lane.b32.xlu0 %v3220_v19, %s2747_s28 }
 0x714   : > { %1354 = vrot.lane.b32.xlu2 %v3213_v18, %s2747_s28 }
 0x71b   : > { %1412 = vrot.lane.b32.xlu1 %v3220_v19, %s2758_s10  ;;  %1369 = vrot.lane.b32.xlu0 %v3213_v18, %s2756_s26 }
 0x71c   : > { %1382 = vrot.lane.b32.xlu2 %v3220_v19, %s2757_s8 }
 0x723   : > { %1442 = vrot.lane.b32.xlu1 %v3239_v14, %s2748_s6  ;;  %1397 = vrot.lane.b32.xlu0 %v3220_v19, %s2759_s11  ;;  %v3326_v19 = vld [vmem:[#allocation3 + $0xd] sm:$0xff] }
 0x724   : > { %1399 = vrot.lane.b32.xlu2 %v3213_v18, %s2759_s11 }
 0x72b   : > { %1470 = vrot.lane.b32.xlu1 %v3247_v13, %s2756_s26  ;;  %1414 = vrot.lane.b32.xlu0 %v3213_v18, %s2758_s10 }
 0x72c   : > { %1440 = vrot.lane.b32.xlu2 %v3247_v13, %s2748_s6 }
 0x733   : > { %1487 = vrot.lane.b32.xlu1 %v3239_v14, %s2757_s8  ;;  %1455 = vrot.lane.b32.xlu0 %v3247_v13, %s2747_s28 }
 0x734   : > { %1457 = vrot.lane.b32.xlu2 %v3239_v14, %s2747_s28 }
 0x73b   : > { %1515 = vrot.lane.b32.xlu1 %v3247_v13, %s2758_s10  ;;  %1472 = vrot.lane.b32.xlu0 %v3239_v14, %s2756_s26 }
 0x73c   : > { %1485 = vrot.lane.b32.xlu2 %v3247_v13, %s2757_s8 }
 0x743   : > { %1545 = vrot.lane.b32.xlu1 %v3267_v20, %s2748_s6  ;;  %1500 = vrot.lane.b32.xlu0 %v3247_v13, %s2759_s11 }
 0x744   : > { %1502 = vrot.lane.b32.xlu2 %v3239_v14, %s2759_s11 }
 0x746   : > { %v1252_v22 = vpop.permute.xlu2 %1251 }
 0x747   : > { %v1256_v37 = vmul.f32 %v2469_v52, %v1252_v22 }
 0x749   : > { %v1258_v25 = vadd.f32 %v1256_v37, %v1224_v23 }
 0x74b   : > { %1573 = vrot.lane.b32.xlu1 %v3275_v5, %s2756_s26  ;;  %1517 = vrot.lane.b32.xlu0 %v3239_v14, %s2758_s10 }
 0x74c   : > { %1543 = vrot.lane.b32.xlu2 %v3275_v5, %s2748_s6 }
 0x74e   : > { %v1237_v26 = vpop.permute.xlu2 %1236 }
 0x74f   : > { %v1241_v56 = vmul.f32 %v2470_v31, %v1237_v26 }
 0x753   : > { %1590 = vrot.lane.b32.xlu1 %v3267_v20, %s2757_s8  ;;  %1558 = vrot.lane.b32.xlu0 %v3275_v5, %s2747_s28 }
 0x754   : > { %1560 = vrot.lane.b32.xlu2 %v3267_v20, %s2747_s28 }
 0x756   : > { %v1280_v53 = vpop.permute.xlu2 %1279 }
 0x757   : > { %v1285_v0 = vmul.f32 %v2471_v59, %v1280_v53 }
 0x75b   : > { %1618 = vrot.lane.b32.xlu1 %v3275_v5, %s2758_s10  ;;  %1575 = vrot.lane.b32.xlu0 %v3267_v20, %s2756_s26 }
 0x75c   : > { %1588 = vrot.lane.b32.xlu2 %v3275_v5, %s2757_s8 }
 0x75d   : > { %v1265_v15 = vpop.permute.xlu1 %1264  ;;  %v1250_v48 = vpop.permute.xlu0 %1249 }
 0x75e   : > { %v1255_v8 = vmul.f32 %v2469_v52, %v1250_v48  ;;  %v1297_v4 = vpop.permute.xlu2 %1296  ;;  %v1270_v44 = vmul.f32 %v2472_v28, %v1265_v15  ;;  %v2478_v15 = vld [vmem:[#allocation11 + $0xb] ss:$0 sm:$0xff] }
 0x75f   : > { %v1301_v1 = vmul.f32 %v2473_v40, %v1297_v4 }
 0x760   : > { %v1257_v16 = vadd.f32 %v1255_v8, %v1223_v47 }
 0x762   : > { %v1287_v7 = vadd.f32 %v1285_v0, %v1257_v16 }
 0x763   : > { %1648 = vrot.lane.b32.xlu1 %v3296_v29, %s2748_s6  ;;  %1603 = vrot.lane.b32.xlu0 %v3275_v5, %s2759_s11 }
 0x764   : > { %1605 = vrot.lane.b32.xlu2 %v3267_v20, %s2759_s11 }
 0x765   : > { %v1235_v46 = vpop.permute.xlu0 %1234  ;;  %v1282_v39 = vpop.permute.xlu1 %1281 }
 0x766   : > { %v1240_v24 = vmul.f32 %v2470_v31, %v1235_v46  ;;  %v1286_v45 = vmul.f32 %v2471_v59, %v1282_v39  ;;  %v1338_v30 = vpop.permute.xlu2 %1337  ;;  %v3334_v31 = vld [vmem:[#allocation3 + $0x5] sm:$0xff] }
 0x767   : > { %v1343_v62 = vmul.f32 %v2474_v41, %v1338_v30  ;;  %v2482_v46 = vld [vmem:[#allocation11 + $0xd] ss:$0 sm:$0xff] }
 0x768   : > { %v1272_v38 = vadd.f32 %v1270_v44, %v1240_v24  ;;  %v1288_v51 = vadd.f32 %v1286_v45, %v1258_v25  ;;  %v2480_v44 = vld [vmem:[#allocation11 + $0xc] ss:$0 sm:$0xff]  ;;  %v2481_v24 = vld [vmem:[#allocation11 + $0xf] ss:$0 sm:$0xff] }
 0x76b   : > { %1676 = vrot.lane.b32.xlu1 %v3304_v27, %s2756_s26  ;;  %1620 = vrot.lane.b32.xlu0 %v3267_v20, %s2758_s10 }
 0x76c   : > { %1646 = vrot.lane.b32.xlu2 %v3304_v27, %s2748_s6 }
 0x76d   : > { %v1310_v42 = vpop.permute.xlu1 %1309  ;;  %v1267_v36 = vpop.permute.xlu0 %1266 }
 0x76e   : > { %v1315_v61 = vmul.f32 %v2475_v54, %v1310_v42  ;;  %v1271_v32 = vmul.f32 %v2472_v28, %v1267_v36  ;;  %v1355_v63 = vpop.permute.xlu2 %1354 }
 0x76f   : > { %v1359_v43 = vmul.f32 %v2477_v49, %v1355_v63 }
 0x770   : > { %v1317_v35 = vadd.f32 %v1315_v61, %v1287_v7  ;;  %v1273_v6 = vadd.f32 %v1271_v32, %v1241_v56  ;;  %v2484_v61 = vld [vmem:[#allocation11 + $0x10] ss:$0 sm:$0xff] }
 0x772   : > { %v1303_v9 = vadd.f32 %v1301_v1, %v1273_v6  ;;  %v1345_v34 = vadd.f32 %v1343_v62, %v1317_v35 }
 0x773   : > { %1693 = vrot.lane.b32.xlu1 %v3296_v29, %s2757_s8  ;;  %1661 = vrot.lane.b32.xlu0 %v3304_v27, %s2747_s28 }
 0x774   : > { %v1329_v50 = vadd.f32 %v1327_v58, %v1303_v9  ;;  %1663 = vrot.lane.b32.xlu2 %v3296_v29, %s2747_s28 }
 0x775   : > { %v1340_v10 = vpop.permute.xlu1 %1339  ;;  %v1295_v11 = vpop.permute.xlu0 %1294 }
 0x776   : > { %v1361_v3 = vadd.f32 %v1359_v43, %v1329_v50  ;;  %v1300_v57 = vmul.f32 %v2473_v40, %v1295_v11  ;;  %v1383_v12 = vpop.permute.xlu2 %1382  ;;  %v1344_v25 = vmul.f32 %v2474_v41, %v1340_v10  ;;  %v2486_v50 = vld [vmem:[#allocation11 + $0x11] ss:$0 sm:$0xff] }
 0x777   : > { %v1388_v16 = vmul.f32 %v2478_v15, %v1383_v12 }
 0x778   : > { %v1302_v2 = vadd.f32 %v1300_v57, %v1272_v38 }
 0x77a   : > { %v1328_v18 = vadd.f32 %v1326_v60, %v1302_v2  ;;  %v3355_v60 = vld [vmem:[#allocation3 + $0xe] sm:$0xff] }
 0x77b   : > { %1721 = vrot.lane.b32.xlu1 %v3304_v27, %s2758_s10  ;;  %1678 = vrot.lane.b32.xlu0 %v3296_v29, %s2756_s26 }
 0x77c   : > { %1691 = vrot.lane.b32.xlu2 %v3304_v27, %s2757_s8 }
 0x77d   : > { %v1368_v21 = vpop.permute.xlu1 %1367  ;;  %v1312_v52 = vpop.permute.xlu0 %1311 }
 0x77e   : > { %v1373_v22 = vmul.f32 %v2479_v17, %v1368_v21  ;;  %v1316_v23 = vmul.f32 %v2475_v54, %v1312_v52  ;;  %v1400_v37 = vpop.permute.xlu2 %1399  ;;  %v2483_v54 = vld [vmem:[#allocation11 + $0xe] ss:$0 sm:$0xff] }
 0x77f   : > { %v1404_v41 = vmul.f32 %v2480_v44, %v1400_v37  ;;  %v1430_v33 = vmul.f32 %v2483_v54, %v3239_v14  ;;  %v1429_v21 = vmul.f32 %v2483_v54, %v3247_v13  ;;  %v2487_v13 = vld [vmem:[#allocation11 + $0x13] ss:$0 sm:$0xff] }
 0x780   : > { %v1375_v26 = vadd.f32 %v1373_v22, %v1345_v34  ;;  %v1318_v53 = vadd.f32 %v1316_v23, %v1288_v51 }
 0x782   : > { %v1346_v59 = vadd.f32 %v1344_v25, %v1318_v53 }
 0x783   : > { %1751 = vrot.lane.b32.xlu1 %v3326_v19, %s2748_s6  ;;  %1706 = vrot.lane.b32.xlu0 %v3304_v27, %s2759_s11 }
 0x784   : > { %1708 = vrot.lane.b32.xlu2 %v3296_v29, %s2759_s11 }
 0x785   : > { %v1385_v48 = vpop.permute.xlu1 %1384  ;;  %v1353_v47 = vpop.permute.xlu0 %1352 }
 0x786   : > { %v1389_v8 = vmul.f32 %v2478_v15, %v1385_v48  ;;  %v1358_v4 = vmul.f32 %v2477_v49, %v1353_v47  ;;  %v1441_v0 = vpop.permute.xlu2 %1440  ;;  %v3364_v48 = vld [vmem:[#allocation3 + $0x6] sm:$0xff]  ;;  %v2489_v47 = vld [vmem:[#allocation11 + $0x14] ss:$0 sm:$0xff] }
 0x787   : > { %v1446_v42 = vmul.f32 %v2481_v24, %v1441_v0 }
 0x788   : > { %v1391_v28 = vadd.f32 %v1389_v8, %v1361_v3  ;;  %v1360_v7 = vadd.f32 %v1358_v4, %v1328_v18  ;;  %v2485_v18 = vld [vmem:[#allocation11 + $0x12] ss:$0 sm:$0xff]  ;;  %v2488_v4 = vld [vmem:[#allocation11 + $0x16] ss:$0 sm:$0xff] }
 0x78a   : > { %v1390_v39 = vadd.f32 %v1388_v16, %v1360_v7 }
 0x78b   : > { %1779 = vrot.lane.b32.xlu1 %v3334_v31, %s2756_s26  ;;  %1723 = vrot.lane.b32.xlu0 %v3296_v29, %s2758_s10 }
 0x78c   : > { %1749 = vrot.lane.b32.xlu2 %v3334_v31, %s2748_s6 }
 0x78d   : > { %v1413_v45 = vpop.permute.xlu1 %1412  ;;  %v1370_v30 = vpop.permute.xlu0 %1369 }
 0x78e   : > { %v1418_v38 = vmul.f32 %v2482_v46, %v1413_v45  ;;  %v1374_v51 = vmul.f32 %v2479_v17, %v1370_v30  ;;  %v1458_v40 = vpop.permute.xlu2 %1457 }
 0x78f   : > { %v1462_v62 = vmul.f32 %v2484_v61, %v1458_v40 }
 0x790   : > { %v1420_v36 = vadd.f32 %v1418_v38, %v1390_v39  ;;  %v1376_v56 = vadd.f32 %v1374_v51, %v1346_v59  ;;  %v2491_v38 = vld [vmem:[#allocation11 + $0x17] ss:$0 sm:$0xff] }
 0x792   : > { %v1406_v32 = vadd.f32 %v1404_v41, %v1376_v56  ;;  %v1448_v63 = vadd.f32 %v1446_v42, %v1420_v36 }
 0x793   : > { %1796 = vrot.lane.b32.xlu1 %v3326_v19, %s2757_s8  ;;  %1764 = vrot.lane.b32.xlu0 %v3334_v31, %s2747_s28 }
 0x794   : > { %v1432_v1 = vadd.f32 %v1430_v33, %v1406_v32  ;;  %1766 = vrot.lane.b32.xlu2 %v3326_v19, %s2747_s28 }
 0x795   : > { %v1443_v35 = vpop.permute.xlu1 %1442  ;;  %v1398_v6 = vpop.permute.xlu0 %1397 }
 0x796   : > { %v1464_v49 = vadd.f32 %v1462_v62, %v1432_v1  ;;  %v1403_v9 = vmul.f32 %v2480_v44, %v1398_v6  ;;  %v1486_v58 = vpop.permute.xlu2 %1485  ;;  %v1447_v57 = vmul.f32 %v2481_v24, %v1443_v35  ;;  %v2493_v1 = vld [vmem:[#allocation11 + $0x18] ss:$0 sm:$0xff] }
 0x797   : > { %v1491_v53 = vmul.f32 %v2485_v18, %v1486_v58 }
 0x798   : > { %v1405_v34 = vadd.f32 %v1403_v9, %v1375_v26 }
 0x79a   : > { %v1431_v37 = vadd.f32 %v1429_v21, %v1405_v34 }
 0x79b   : > { %1824 = vrot.lane.b32.xlu1 %v3334_v31, %s2758_s10  ;;  %1781 = vrot.lane.b32.xlu0 %v3326_v19, %s2756_s26 }
 0x79c   : > { %1794 = vrot.lane.b32.xlu2 %v3334_v31, %s2757_s8 }
 0x79d   : > { %v1471_v14 = vpop.permute.xlu1 %1470  ;;  %v1415_v43 = vpop.permute.xlu0 %1414 }
 0x79e   : > { %v1476_v10 = vmul.f32 %v2486_v50, %v1471_v14  ;;  %v1419_v11 = vmul.f32 %v2482_v46, %v1415_v43  ;;  %v1503_v3 = vpop.permute.xlu2 %1502  ;;  %v2490_v46 = vld [vmem:[#allocation11 + $0x15] ss:$0 sm:$0xff]  ;;  %v2492_v14 = vld [vmem:[#allocation11 + $0x19] ss:$0 sm:$0xff] }
 0x79f   : > { %v1507_v44 = vmul.f32 %v2487_v13, %v1503_v3  ;;  %v1533_v54 = vmul.f32 %v2490_v46, %v3267_v20  ;;  %v1532_v43 = vmul.f32 %v2490_v46, %v3275_v5 }
 0x7a0   : > { %v1478_v12 = vadd.f32 %v1476_v10, %v1448_v63  ;;  %v1421_v2 = vadd.f32 %v1419_v11, %v1391_v28 }
 0x7a2   : > { %v1449_v17 = vadd.f32 %v1447_v57, %v1421_v2 }
 0x7a3   : > { %1854 = vrot.lane.b32.xlu1 %v3355_v60, %s2748_s6  ;;  %1809 = vrot.lane.b32.xlu0 %v3334_v31, %s2759_s11 }
 0x7a4   : > { %1811 = vrot.lane.b32.xlu2 %v3326_v19, %s2759_s11 }
 0x7a5   : > { %v1488_v52 = vpop.permute.xlu1 %1487  ;;  %v1456_v22 = vpop.permute.xlu0 %1455 }
 0x7a6   : > { %v1492_v23 = vmul.f32 %v2485_v18, %v1488_v52  ;;  %v1461_v25 = vmul.f32 %v2484_v61, %v1456_v22  ;;  %v1544_v26 = vpop.permute.xlu2 %1543  ;;  %v2496_v52 = vld [vmem:[#allocation11 + $0x1b] ss:$0 sm:$0xff] }
 0x7a7   : > { %v1549_v24 = vmul.f32 %v2488_v4, %v1544_v26 }
 0x7a8   : > { %v1494_v59 = vadd.f32 %v1492_v23, %v1464_v49  ;;  %v1463_v15 = vadd.f32 %v1461_v25, %v1431_v37  ;;  %v2494_v23 = vld [vmem:[#allocation11 + $0x1a] ss:$0 sm:$0xff]  ;;  %v2495_v37 = vld [vmem:[#allocation11 + $0x1d] ss:$0 sm:$0xff] }
 0x7aa   : > { %v1493_v8 = vadd.f32 %v1491_v53, %v1463_v15 }
 0x7ab   : > { %1882 = vrot.lane.b32.xlu1 %v3364_v48, %s2756_s26  ;;  %1826 = vrot.lane.b32.xlu0 %v3326_v19, %s2758_s10 }
 0x7ac   : > { %1852 = vrot.lane.b32.xlu2 %v3364_v48, %s2748_s6 }
 0x7ad   : > { %v1516_v0 = vpop.permute.xlu1 %1515  ;;  %v1473_v16 = vpop.permute.xlu0 %1472 }
 0x7ae   : > { %v1521_v28 = vmul.f32 %v2489_v47, %v1516_v0  ;;  %v1477_v7 = vmul.f32 %v2486_v50, %v1473_v16  ;;  %v1561_v39 = vpop.permute.xlu2 %1560 }
 0x7af   : > { %v1565_v42 = vmul.f32 %v2491_v38, %v1561_v39 }
 0x7b0   : > { %v1523_v45 = vadd.f32 %v1521_v28, %v1493_v8  ;;  %v1479_v30 = vadd.f32 %v1477_v7, %v1449_v17 }
 0x7b2   : > { %v1509_v51 = vadd.f32 %v1507_v44, %v1479_v30  ;;  %v1551_v40 = vadd.f32 %v1549_v24, %v1523_v45 }
 0x7b3   : > { %1899 = vrot.lane.b32.xlu1 %v3355_v60, %s2757_s8  ;;  %1867 = vrot.lane.b32.xlu0 %v3364_v48, %s2747_s28 }
 0x7b4   : > { %v1535_v41 = vadd.f32 %v1533_v54, %v1509_v51  ;;  %1869 = vrot.lane.b32.xlu2 %v3355_v60, %s2747_s28  ;;  %v2500_v51 = vld [vmem:[#allocation11 + $0x1f] ss:$0 sm:$0xff]  ;;  %s2760_s28 = smov 84  }
 0x7b5   : > { %v1546_v36 = vpop.permute.xlu1 %1545  ;;  %v1501_v56 = vpop.permute.xlu0 %1500 }
 0x7b6   : > { %v1567_v61 = vadd.f32 %v1565_v42, %v1535_v41  ;;  %v1506_v32 = vmul.f32 %v2487_v13, %v1501_v56  ;;  %v1589_v33 = vpop.permute.xlu2 %1588  ;;  %v1550_v9 = vmul.f32 %v2488_v4, %v1546_v36  ;;  %v2498_v4 = vld [vmem:[#allocation11 + $0x1e] ss:$0 sm:$0xff] }
 0x7b7   : > { %v1594_v17 = vmul.f32 %v2492_v14, %v1589_v33 }
 0x7b8   : > { %v1508_v63 = vadd.f32 %v1506_v32, %v1478_v12 }
 0x7ba   : > { %v1534_v57 = vadd.f32 %v1532_v43, %v1508_v63  ;;  %v2499_v63 = vld [vmem:[#allocation11 + $0x20] ss:$0 sm:$0xff] }
 0x7bb   : > { %1927 = vrot.lane.b32.xlu1 %v3364_v48, %s2758_s10  ;;  %1884 = vrot.lane.b32.xlu0 %v3355_v60, %s2756_s26 }
 0x7bc   : > { %1897 = vrot.lane.b32.xlu2 %v3364_v48, %s2757_s8 }
 0x7bd   : > { %v1574_v20 = vpop.permute.xlu1 %1573  ;;  %v1518_v62 = vpop.permute.xlu0 %1517 }
 0x7be   : > { %v1579_v35 = vmul.f32 %v2493_v1, %v1574_v20  ;;  %v1522_v6 = vmul.f32 %v2489_v47, %v1518_v62  ;;  %v1606_v49 = vpop.permute.xlu2 %1605 }
 0x7bf   : > { %v1610_v15 = vmul.f32 %v2494_v23, %v1606_v49 }
 0x7c0   : > { %v1581_v58 = vadd.f32 %v1579_v35, %v1551_v40  ;;  %v1524_v34 = vadd.f32 %v1522_v6, %v1494_v59  ;;  %v2497_v59 = vld [vmem:[#allocation11 + $0x1c] ss:$0 sm:$0xff] }
 0x7c1   : > { %v1636_v28 = vmul.f32 %v2497_v59, %v3296_v29 }
 0x7c2   : > { %v1552_v50 = vadd.f32 %v1550_v9, %v1524_v34 }
 0x7c3   : > { %1912 = vrot.lane.b32.xlu0 %v3364_v48, %s2759_s11 }
 0x7c4   : > { %1914 = vrot.lane.b32.xlu2 %v3355_v60, %s2759_s11 }
 0x7c5   : > { %v1591_v10 = vpop.permute.xlu1 %1590  ;;  %v1559_v11 = vpop.permute.xlu0 %1558 }
 0x7c6   : > { %v1595_v3 = vmul.f32 %v2492_v14, %v1591_v10  ;;  %v1564_v12 = vmul.f32 %v2491_v38, %v1559_v11  ;;  %v1647_v2 = vpop.permute.xlu2 %1646 }
 0x7c7   : > { %v1652_v47 = vmul.f32 %v2495_v37, %v1647_v2 }
 0x7c8   : > { %v1597_v18 = vadd.f32 %v1595_v3, %v1567_v61  ;;  %v1566_v21 = vadd.f32 %v1564_v12, %v1534_v57 }
 0x7ca   : > { %v1596_v22 = vadd.f32 %v1594_v17, %v1566_v21 }
 0x7cb   : > { %1929 = vrot.lane.b32.xlu0 %v3355_v60, %s2758_s10 }
 0x7cd   : > { %v1619_v25 = vpop.permute.xlu1 %1618  ;;  %v1576_v26 = vpop.permute.xlu0 %1575 }
 0x7ce   : > { %v1624_v53 = vmul.f32 %v2496_v52, %v1619_v25  ;;  %v1580_v5 = vmul.f32 %v2493_v1, %v1576_v26  ;;  %v1664_v0 = vpop.permute.xlu2 %1663  ;;  %v2503_v25 = vld [vmem:[#allocation11 + $0x22] ss:$0 sm:$0xff] }
 0x7cf   : > { %v1668_v39 = vmul.f32 %v2498_v4, %v1664_v0 }
 0x7d0   : > { %v1626_v8 = vadd.f32 %v1624_v53, %v1596_v22  ;;  %v1582_v13 = vadd.f32 %v1580_v5, %v1552_v50  ;;  %v1635_v22 = vmul.f32 %v2497_v59, %v3304_v27 }
 0x7d2   : > { %v1612_v16 = vadd.f32 %v1610_v15, %v1582_v13  ;;  %v1654_v7 = vadd.f32 %v1652_v47, %v1626_v8  ;;  %v2501_v15 = vld [vmem:[#allocation11 + $0x21] ss:$0 sm:$0xff] }
 0x7d4   : > { %v1638_v46 = vadd.f32 %v1636_v28, %v1612_v16  ;;  %v2502_v16 = vld [vmem:[#allocation11 + $0x24] ss:$0 sm:$0xff] }
 0x7d5   : > { %v1649_v44 = vpop.permute.xlu1 %1648  ;;  %v1604_v24 = vpop.permute.xlu0 %1603 }
 0x7d6   : > { %v1670_v45 = vadd.f32 %v1668_v39, %v1638_v46  ;;  %v1609_v30 = vmul.f32 %v2494_v23, %v1604_v24  ;;  %v1653_v36 = vmul.f32 %v2495_v37, %v1649_v44  ;;  %v1692_v56 = vpop.permute.xlu2 %1691  ;;  %v2504_v39 = vld [vmem:[#allocation11 + $0x23] ss:$0 sm:$0xff]  ;;  %v2505_v44 = vld [vmem:[#allocation11 + $0x25] ss:$0 sm:$0xff] }
 0x7d7   : > { %v1697_v8 = vmul.f32 %v2499_v63, %v1692_v56 }
 0x7d8   : > { %v1611_v38 = vadd.f32 %v1609_v30, %v1581_v58  ;;  %v2508_v30 = vld [vmem:[#allocation11 + $0x28] ss:$0 sm:$0xff] }
 0x7da   : > { %v1637_v37 = vadd.f32 %v1635_v22, %v1611_v38  ;;  %v1738_v38 = vmul.f32 %v2504_v39, %v3334_v31  ;;  %v2511_v31 = vld [vmem:[#allocation11 + $0x2a] ss:$0 sm:$0xff]  ;;  %v2509_v22 = vld [vmem:[#allocation11 + $0x2b] ss:$0 sm:$0xff] }
 0x7dd   : > { %v1677_v54 = vpop.permute.xlu1 %1676  ;;  %v1621_v40 = vpop.permute.xlu0 %1620 }
 0x7de   : > { %v1682_v41 = vmul.f32 %v2500_v51, %v1677_v54  ;;  %v1625_v42 = vmul.f32 %v2496_v52, %v1621_v40  ;;  %v1709_v35 = vpop.permute.xlu2 %1708 }
 0x7df   : > { %v1713_v54 = vmul.f32 %v2501_v15, %v1709_v35 }
 0x7e0   : > { %v1684_v61 = vadd.f32 %v1682_v41, %v1654_v7  ;;  %v1627_v32 = vadd.f32 %v1625_v42, %v1597_v18  ;;  %v2507_v7 = vld [vmem:[#allocation11 + $0x26] ss:$0 sm:$0xff]  ;;  %v2506_v42 = vld [vmem:[#allocation11 + $0x27] ss:$0 sm:$0xff] }
 0x7e2   : > { %v1655_v33 = vadd.f32 %v1653_v36, %v1627_v32  ;;  %v2510_v32 = vld [vmem:[#allocation11 + $0x29] ss:$0 sm:$0xff] }
 0x7e5   : > { %v1694_v29 = vpop.permute.xlu1 %1693  ;;  %v1662_v1 = vpop.permute.xlu0 %1661 }
 0x7e6   : > { %v1698_v20 = vmul.f32 %v2499_v63, %v1694_v29  ;;  %v1750_v34 = vpop.permute.xlu2 %1749  ;;  %v1667_v23 = vmul.f32 %v2498_v4, %v1662_v1 }
 0x7e7   : > { %v1755_v59 = vmul.f32 %v2502_v16, %v1750_v34 }
 0x7e8   : > { %v1700_v62 = vadd.f32 %v1698_v20, %v1670_v45  ;;  %v1669_v47 = vadd.f32 %v1667_v23, %v1637_v37  ;;  %v1739_v20 = vmul.f32 %v2504_v39, %v3326_v19  ;;  %v2514_v37 = vld [vmem:[#allocation11 + $0x2d] ss:$0 sm:$0xff] }
 0x7ea   : > { %v1699_v28 = vadd.f32 %v1697_v8, %v1669_v47 }
 0x7ed   : > { %v1722_v6 = vpop.permute.xlu1 %1721  ;;  %v1679_v49 = vpop.permute.xlu0 %1678 }
 0x7ee   : > { %v1683_v9 = vmul.f32 %v2500_v51, %v1679_v49  ;;  %v3393_v11 = vpop.permute.xlu2 %1766  ;;  %v1727_v13 = vmul.f32 %v2503_v25, %v1722_v6 }
 0x7f0   : > { %v1685_v58 = vadd.f32 %v1683_v9, %v1655_v33  ;;  %v1729_v46 = vadd.f32 %v1727_v13, %v1699_v28 }
 0x7f2   : > { %v1757_v36 = vadd.f32 %v1755_v59, %v1729_v46  ;;  %v1715_v63 = vadd.f32 %v1713_v54, %v1685_v58  ;;  %v1841_v58 = vmul.f32 %v2511_v31, %v3364_v48 }
 0x7f5   : > { %v1752_v50 = vpop.permute.xlu1 %1751  ;;  %v1707_v14 = vpop.permute.xlu0 %1706 }
 0x7f6   : > { %v1795_v12 = vpop.permute.xlu2 %1794  ;;  %v1712_v0 = vmul.f32 %v2501_v15, %v1707_v14  ;;  %v1756_v6 = vmul.f32 %v2502_v16, %v1752_v50  ;;  %v2512_v14 = vld [vmem:[#allocation11 + $0x2c] ss:$0 sm:$0xff] }
 0x7f7   : > { %v1800_v9 = vmul.f32 %v2506_v42, %v1795_v12  ;;  %v2513_v12 = vld [vmem:[#allocation11 + $0x2e] ss:$0 sm:$0xff] }
 0x7f8   : > { %v1714_v24 = vadd.f32 %v1712_v0, %v1684_v61 }
 0x7fa   : > { %v1740_v56 = vadd.f32 %v1738_v38, %v1714_v24 }
 0x7fd   : > { %v1780_v43 = vpop.permute.xlu1 %1779  ;;  %v1724_v10 = vpop.permute.xlu0 %1723 }
 0x7fe   : > { %v3397_v18 = vpop.permute.xlu2 %1811  ;;  %v1728_v45 = vmul.f32 %v2503_v25, %v1724_v10  ;;  %v1785_v4 = vmul.f32 %v2507_v7, %v1780_v43  ;;  %v1741_v43 = vadd.f32 %v1739_v20, %v1715_v63 }
 0x7ff   : > { %v1816_v47 = vmul.f32 %v2508_v30, %v3397_v18 }
 0x800   : > { %v1730_v29 = vadd.f32 %v1728_v45, %v1700_v62  ;;  %v1787_v1 = vadd.f32 %v1785_v4, %v1757_v36 }
 0x802   : > { %v1758_v10 = vadd.f32 %v1756_v6, %v1730_v29 }
 0x805   : > { %v3395_v3 = vpop.permute.xlu1 %1796  ;;  %v1765_v57 = vpop.permute.xlu0 %1764 }
 0x806   : > { %v1853_v26 = vpop.permute.xlu2 %1852  ;;  %v1770_v51 = vmul.f32 %v2505_v44, %v1765_v57  ;;  %v1801_v19 = vmul.f32 %v2506_v42, %v3395_v3  ;;  %v1842_v3 = vmul.f32 %v2511_v31, %v3355_v60 }
 0x807   : > { %v1858_v0 = vmul.f32 %v2509_v22, %v1853_v26 }
 0x808   : > { %v1772_v61 = vadd.f32 %v1770_v51, %v1740_v56 }
 0x80a   : > { %v1802_v23 = vadd.f32 %v1800_v9, %v1772_v61 }
 0x80d   : > { %v1825_v2 = vpop.permute.xlu1 %1824  ;;  %v1782_v17 = vpop.permute.xlu0 %1781 }
 0x80e   : > { %v1870_v40 = vpop.permute.xlu2 %1869  ;;  %v1786_v49 = vmul.f32 %v2507_v7, %v1782_v17  ;;  %v1830_v34 = vmul.f32 %v2510_v32, %v1825_v2  ;;  %v2516_v17 = vld [vmem:[#allocation11 + $0x30] ss:$0 sm:$0xff] }
 0x80f   : > { %v1874_v51 = vmul.f32 %v2512_v14, %v1870_v40 }
 0x810   : > { %v1788_v25 = vadd.f32 %v1786_v49, %v1758_v10  ;;  %v1832_v50 = vadd.f32 %v1830_v34, %v1802_v23 }
 0x812   : > { %v1818_v48 = vadd.f32 %v1816_v47, %v1788_v25 }
 0x814   : > { %v1844_v18 = vadd.f32 %v1842_v3, %v1818_v48 }
 0x815   : > { %v3399_v21 = vpop.permute.xlu1 %1854  ;;  %v1810_v52 = vpop.permute.xlu0 %1809 }
 0x816   : > { %v1815_v33 = vmul.f32 %v2508_v30, %v1810_v52  ;;  %v1771_v52 = vmul.f32 %v2505_v44, %v3393_v11  ;;  %v1898_v8 = vpop.permute.xlu2 %1897  ;;  %v1860_v11 = vadd.f32 %v1858_v0, %v1832_v50  ;;  %v2515_v44 = vld [vmem:[#allocation11 + $0x2f] ss:$0 sm:$0xff]  ;;  %v1859_v30 = vmul.f32 %v2509_v22, %v3399_v21 }
 0x817   : > { %v1903_v39 = vmul.f32 %v2513_v12, %v1898_v8 }
 0x818   : > { %v1817_v35 = vadd.f32 %v1815_v33, %v1787_v1  ;;  %v1773_v15 = vadd.f32 %v1771_v52, %v1741_v43 }
 0x81a   : > { %v1843_v2 = vadd.f32 %v1841_v58, %v1817_v35  ;;  %v1803_v46 = vadd.f32 %v1801_v19, %v1773_v15 }
 0x81d   : > { %v1883_v53 = vpop.permute.xlu1 %1882  ;;  %v1827_v5 = vpop.permute.xlu0 %1826 }
 0x81e   : > { %v1888_v16 = vmul.f32 %v2514_v37, %v1883_v53  ;;  %v1831_v28 = vmul.f32 %v2510_v32, %v1827_v5  ;;  %v1915_v56 = vpop.permute.xlu2 %1914  ;;  %v1876_v32 = vadd.f32 %v1874_v51, %v1844_v18 }
 0x81f   : > { %v1919_v63 = vmul.f32 %v2515_v44, %v1915_v56 }
 0x820   : > { %v1833_v59 = vadd.f32 %v1831_v28, %v1803_v46 }
 0x822   : > { %v1861_v42 = vadd.f32 %v1859_v30, %v1833_v59 }
 0x825   : > { %v1868_v27 = vpop.permute.xlu0 %1867  ;;  %v1900_v41 = vpop.permute.xlu1 %1899 }
 0x826   : > { %v1873_v62 = vmul.f32 %v2512_v14, %v1868_v27  ;;  %v1890_v27 = vadd.f32 %v1888_v16, %v1860_v11  ;;  %v1904_v54 = vmul.f32 %v2513_v12, %v1900_v41 }
 0x828   : > { %v1875_v7 = vadd.f32 %v1873_v62, %v1843_v2  ;;  %v1906_v29 = vadd.f32 %v1904_v54, %v1876_v32 }
 0x82a   : > { %v1905_v4 = vadd.f32 %v1903_v39, %v1875_v7 }
 0x82d   : > { %v1885_v57 = vpop.permute.xlu0 %1884  ;;  %v1928_v13 = vpop.permute.xlu1 %1927 }
 0x82e   : > { %v1933_v24 = vmul.f32 %v2516_v17, %v1928_v13  ;;  %v1889_v53 = vmul.f32 %v2514_v37, %v1885_v57 }
 0x830   : > { %v1935_v26 = vadd.f32 %v1933_v24, %v1905_v4  ;;  %v1891_v33 = vadd.f32 %v1889_v53, %v1861_v42 }
 0x832   : > { %v1921_v61 = vadd.f32 %v1919_v63, %v1891_v33 }
 0x835   : > { %v1913_v45 = vpop.permute.xlu0 %1912 }
 0x836   : > { %v1918_v38 = vmul.f32 %v2515_v44, %v1913_v45 }
 0x838   : > { %v1920_v5 = vadd.f32 %v1918_v38, %v1890_v27 }
 0x83a   : > { %v1937_v36 = vadd.f32 %v1935_v26, %v1920_v5 }
 0x83c   : > { %1949 = vrot.lane.b32.xlu0 %v1937_v36, %s2760_s28  ;;  %1941 = vrot.lane.b32.xlu2 %v1937_v36, %s2761_s12 }
 0x83d   : > { %v1930_v60 = vpop.permute.xlu0 %1929 }
 0x83e   : > { %v1934_v1 = vmul.f32 %v2516_v17, %v1930_v60 }
 0x840   : > { %v1936_v21 = vadd.f32 %v1934_v1, %v1906_v29 }
 0x842   : > { %v1938_v20 = vadd.f32 %v1936_v21, %v1921_v61 }
 0x844   : > { %1959 = vrot.lane.b32.xlu0 %v1938_v20, %s2762_s23  ;;  %1951 = vrot.lane.b32.xlu2 %v1938_v20, %s2760_s28  ;;  %s2678_s28 = scalar_lea.hbm %s3485_s4, 128 }
 0x845   : > { %1943 = vrot.lane.b32.xlu1 %v1938_v20, %s2761_s12 }
 0x84d   : > { %1957 = vrot.lane.b32.xlu1 %v1937_v36, %s2762_s23 }
 0x896   : > { %v1942_v40 = vpop.permute.xlu2 %1941 }
 0x897   : > { %v1947_v31 = vadd.f32 %v1942_v40, %v1937_v36 }
 0x89e   : > { %v1952_v9 = vpop.permute.xlu2 %1951 }
 0x8ae   : > { %v1950_v41 = vpop.permute.xlu0 %1949 }
 0x8af   : > { %v1955_v35 = vadd.f32 %v1950_v41, %v1947_v31 }
 0x8b6   : > { %v1960_v14 = vpop.permute.xlu0 %1959 }
 0x8b7   : > { %v1944_v6 = vpop.permute.xlu1 %1943 }
 0x8b8   : > { %v1948_v49 = vadd.f32 %v1944_v6, %v1938_v20 }
 0x8ba   : > { %v1956_v34 = vadd.f32 %v1952_v9, %v1948_v49 }
 0x8bc   : > { %v1964_v43 = vadd.f32 %v1960_v14, %v1956_v34 }
 0x8be   : > { %v1966_v22 = vsel %vm282_vm0, %v1964_v43, 0.0 }
 0x8bf   : > { %v1958_v10 = vpop.permute.xlu1 %1957 }
 0x8c0   : > { %v1963_v57 = vadd.f32 %v1958_v10, %v1955_v35 }
 0x8c2   : > { %v1965_v23 = vsel %vm282_vm0, %v1963_v57, 0.0 }
 0x8c3   : > { %v1967_v37 = vadd.f32 %v1966_v22, %v1965_v23 }
 0x8c5   : > { %1968 = vadd.xlane.f32.xlu2 %v1967_v37  ;;  %v2050_v37 = vld [vmem:[#allocation2 + $0x1] sm:$0xff] }
 0x938   : > { %v1969_v58 = vpop.xlane.xlu2 %1968 }
 0x939   : > { %v1970_v62 = vrot.slane %v1969_v58, 4 }
 0x93b   : > { %v1971_v52 = vadd.f32 %v1970_v62, %v1969_v58 }
 0x93d   : > { %v1972_v25 = vrot.slane %v1971_v52, 2 }
 0x93f   : > { %v1973_v19 = vadd.f32 %v1972_v25, %v1971_v52  ;;  %v2051_v52 = vld [vmem:[#allocation2 + $0x9] sm:$0xff] }
 0x941   : > { %v1974_v50 = vrot.slane %v1973_v19, 1 }
 0x943   : > { %v1975_v12 = vadd.f32 %v1974_v50, %v1973_v19 }
 0x945   : > { %2323 = vpush %v1975_v12 }
 0x976   : > { %s2324_s26 = spop %2323 }
 0x977   : > { %v1977_v2 = vstv %s2324_s26 }
 0x978   : > { %v1978_v17 = vmul.f32 %v1977_v2, %v2951_v55 }
 0x97a   : > { %v1979_v15 = vsub.f32 %v1963_v57, %v1978_v17  ;;  %v1980_v47 = vsub.f32 %v1964_v43, %v1978_v17 }
 0x97c   : > { %v1981_v8 = vmul.f32 %v1979_v15, %v1979_v15  ;;  %v1982_v13 = vmul.f32 %v1980_v47, %v1980_v47 }
 0x97e   : > { %v1983_v0 = vsel %vm282_vm0, %v1981_v8, 0.0  ;;  %v1984_v16 = vsel %vm282_vm0, %v1982_v13, 0.0 }
 0x97f   : > { %v1985_v28 = vadd.f32 %v1984_v16, %v1983_v0 }
 0x981   : > { %1986 = vadd.xlane.f32.xlu1 %v1985_v28 }
 0x9f4   : > { %v1987_v7 = vpop.xlane.xlu1 %1986 }
 0x9f5   : > { %v1988_v48 = vrot.slane %v1987_v7, 4 }
 0x9f7   : > { %v1989_v46 = vadd.f32 %v1988_v48, %v1987_v7 }
 0x9f9   : > { %v1990_v39 = vrot.slane %v1989_v46, 2 }
 0x9fb   : > { %v1991_v11 = vadd.f32 %v1990_v39, %v1989_v46 }
 0x9fd   : > { %v1992_v44 = vrot.slane %v1991_v11, 1 }
 0x9ff   : > { %v1993_v24 = vadd.f32 %v1992_v44, %v1991_v11 }
 0xa01   : > { %2325 = vpush %v1993_v24 }
 0xa32   : > { %s2326_s8 = spop %2325 }
 0xa33   : > { %v1995_v3 = vstv %s2326_s8 }
 0xa34   : > { %v1996_v45 = vmul.f32 %v1995_v3, %v2951_v55 }
 0xa36   : > { %v1997_v27 = vadd.f32 1e-05, %v1996_v45 }
 0xa38   : > { %2543 = vrsqrt.f32 %v1997_v27  ;;  %vm2004_vm9 = vweird.f32 %v1997_v27 }
 0xa3e   : > { %v2544_v59 = vpop.eup %2543 }
 0xa3f   : > { %v1999_v4 = vmul.f32 %v2544_v59, %v1997_v27  ;;  %vm2005_vm8 = vweird.f32 %v2544_v59 }
 0xa40   : > { %vm2006_vm10 = vmor %vm2004_vm9, %vm2005_vm8 }
 0xa41   : > { %v2000_v38 = vmul.f32 %v2544_v59, %v1999_v4 }
 0xa43   : > { %v2001_v18 = vmul.f32 0.5, %v2000_v38 }
 0xa45   : > { %v2002_v30 = vsub.f32 1.5, %v2001_v18 }
 0xa47   : > { %v2003_v26 = vmul.f32 %v2544_v59, %v2002_v30 }
 0xa49   : > { %v2007_v53 = vsel %vm2006_vm10, %v2544_v59, %v2003_v26 }
 0xa4a   : > { %v2008_v5 = vmul.f32 %v2007_v53, %v1979_v15  ;;  %v2009_v51 = vmul.f32 %v2007_v53, %v1980_v47 }
 0xa4c   : > { %v2290_v54 = vmul.f32 -1.442695, %v2008_v5  ;;  %v2291_v42 = vmul.f32 -1.442695, %v2009_v51 }
 0xa4e   : > { %2545 = vpow2.f32 %v2290_v54 }
 0xa4f   : > { %2547 = vpow2.f32 %v2291_v42 }
 0xa54   : > { %v2546_v36 = vpop.eup %2545 }
 0xa55   : > { %v2548_v55 = vpop.eup %2547  ;;  %v2016_v56 = vadd.f32 1.0, %v2546_v36 }
 0xa56   : > { %v2017_v32 = vadd.f32 1.0, %v2548_v55 }
 0xa57   : > { %2549 = vrcp.f32 %v2016_v56  ;;  %v2029_v21 = vand.u32 2147483648, %v2016_v56  ;;  %v2027_v41 = vand.u32 2147483647, %v2016_v56  ;;  %vm2023_vm13 = vweird.f32 %v2016_v56 }
 0xa58   : > { %2551 = vrcp.f32 %v2017_v32  ;;  %v2044_v20 = vand.u32 2147483648, %v2017_v32  ;;  %v2042_v49 = vand.u32 2147483647, %v2017_v32  ;;  %vm2038_vm14 = vweird.f32 %v2017_v32 }
 0xa59   : > { %v2030_v31 = vor.u32 1.1754944e-38, %v2029_v21  ;;  %vm2028_vm2 = vcmp.eq.f32.partialorder %v2027_v41, 8.507059e+37 }
 0xa5a   : > { %v2045_v14 = vor.u32 1.1754944e-38, %v2044_v20  ;;  %vm2043_vm3 = vcmp.eq.f32.partialorder %v2042_v49, 8.507059e+37 }
 0xa5d   : > { %v2550_v33 = vpop.eup %2549 }
 0xa5e   : > { %v2552_v60 = vpop.eup %2551  ;;  %v2019_v63 = vmul.f32 %v2550_v33, %v2016_v56  ;;  %vm2024_vm11 = vweird.f32 %v2550_v33 }
 0xa5f   : > { %v2034_v29 = vmul.f32 %v2552_v60, %v2017_v32  ;;  %vm2039_vm12 = vweird.f32 %v2552_v60  ;;  %vm2025_vm15 = vmor %vm2023_vm13, %vm2024_vm11 }
 0xa60   : > { %v2020_v1 = vsub.f32 1.0, %v2019_v63  ;;  %vm2040_vm1 = vmor %vm2038_vm14, %vm2039_vm12 }
 0xa61   : > { %v2035_v61 = vsub.f32 1.0, %v2034_v29 }
 0xa62   : > { %v2021_v40 = vmul.f32 %v2550_v33, %v2020_v1 }
 0xa63   : > { %v2036_v6 = vmul.f32 %v2552_v60, %v2035_v61 }
 0xa64   : > { %v2022_v9 = vadd.f32 %v2550_v33, %v2021_v40 }
 0xa65   : > { %v2037_v34 = vadd.f32 %v2552_v60, %v2036_v6 }
 0xa66   : > { %v2026_v35 = vsel %vm2025_vm15, %v2550_v33, %v2022_v9 }
 0xa67   : > { %v2041_v43 = vsel %vm2040_vm1, %v2552_v60, %v2037_v34  ;;  %v2031_v10 = vsel %vm2028_vm2, %v2030_v31, %v2026_v35 }
 0xa68   : > { %v2046_v57 = vsel %vm2043_vm3, %v2045_v14, %v2041_v43  ;;  %v2048_v22 = vadd.f32 1.0, %v2031_v10 }
 0xa69   : > { %v2049_v23 = vadd.f32 1.0, %v2046_v57 }
 0xa6a   : > { %2062 = vrot.lane.b32.xlu0 %v2048_v22, %s2743_s29 }
 0xa6b   : > { %2056 = vrot.lane.b32.xlu1 %v2049_v23, %s2742_s24  ;;  %2080 = vrot.lane.b32.xlu2 %v2049_v23, %s2744_s30 }
 0xa72   : > { %2064 = vrot.lane.b32.xlu0 %v2049_v23, %s2743_s29 }
 0xa7a   : > { %2070 = vrot.lane.b32.xlu0 %v2048_v22, %s2745_s5 }
 0xa82   : > { %2072 = vrot.lane.b32.xlu0 %v2049_v23, %s2745_s5 }
 0xa8a   : > { %2078 = vrot.lane.b32.xlu0 %v2048_v22, %s2744_s30 }
 0xa92   : > { %2054 = vrot.lane.b32.xlu0 %v2048_v22, %s2742_s24  ;;  %s264_s24 = scalar_lea.vmem [#allocation12], %s2268_s9  ;;  %s2298_s9 = sshll.u32 %s2811_s19, 6 }
 0xa93   : > { %s2150_s5 = scalar_lea.hbm %s3485_s4, %s2298_s9 }
 0xac5   : > { %v2081_v2 = vpop.permute.xlu2 %2080 }
 0xac6   : > { %v2085_v15 = vmul.f32 %v2081_v2, %v2051_v52 }
 0xadc   : > { %v2063_v58 = vpop.permute.xlu0 %2062 }
 0xadd   : > { %v2068_v62 = vmul.f32 %v2063_v58, %v2050_v37  ;;  %v2057_v0 = vpop.permute.xlu1 %2056 }
 0xade   : > { %v2061_v28 = vmul.f32 %v2057_v0, %v2051_v52 }
 0xadf   : > { %2088 = vrot.lane.b32.xlu0 %v2068_v62, %s2749_s13 }
 0xae4   : > { %v2065_v25 = vpop.permute.xlu0 %2064 }
 0xae5   : > { %v2069_v19 = vmul.f32 %v2065_v25, %v2051_v52 }
 0xae7   : > { %2090 = vrot.lane.b32.xlu0 %v2069_v19, %s2749_s13  ;;  %s2153_s13 = sshll.u32 %s2150_s5, 4  ;;  %s2154_s13 = int_to_ptr.hbm [resolvable:$true] %s2153_s13 }
 0xaec   : > { %v2071_v50 = vpop.permute.xlu0 %2070 }
 0xaed   : > { %v2076_v12 = vmul.f32 %v2071_v50, %v2050_v37 }
 0xaef   : > { %2094 = vrot.lane.b32.xlu2 %v2076_v12, %s2750_s14 }
 0xaf4   : > { %v2073_v17 = vpop.permute.xlu0 %2072 }
 0xaf5   : > { %v2077_v47 = vmul.f32 %v2073_v17, %v2051_v52 }
 0xaf7   : > { %2102 = vrot.lane.b32.xlu2 %v2085_v15, %s2751_s21  ;;  %2096 = vrot.lane.b32.xlu0 %v2077_v47, %s2750_s14  ;;  %s2139_s14 = scalar_lea.sflag [#allocation6], %s2901_s7 }
 0xafc   : > { %v2079_v8 = vpop.permute.xlu0 %2078 }
 0xafd   : > { %v2084_v13 = vmul.f32 %v2079_v8, %v2050_v37 }
 0xaff   : > { %2100 = vrot.lane.b32.xlu1 %v2084_v13, %s2751_s21  ;;  %s2672_s21 = sshra.s32 %s2154_s13, 4  ;;  %s2673_s21 = int_to_ptr.hbm [resolvable:$true] %s2672_s21 }
 0xb00   : > { %s2674_s10 = scalar_lea.hbm %s2673_s21, 64  ;;  %p2679_p11 = scmp.lt.s32.totalorder %s2673_s21, %s3485_s4 }
 0xb01   : > { %p2675_p1 = scmp.ne.s32.totalorder %s2673_s21, %s2674_s10  ;;  %p2680_p9 = scmp.lt.s32.totalorder %s2678_s28, %s2674_s10 }
 0xb03   : > { %p2676_p4 = pnand %p2675_p1, %p2873_p7  ;;  %p2681_p2 = por %p2680_p9, %p2679_p11 }
 0xb04   : > { %v2055_v16 = vpop.permute.xlu0 %2054 }
 0xb05   : > { %v2060_v7 = vmul.f32 %v2055_v16, %v2050_v37  ;;  %p2677_p8 = pneg %p2676_p4 }
 0xb07   : > { %2108 = vrot.lane.b32.xlu1 %v2061_v28, %s2748_s6  ;;  %2106 = vrot.lane.b32.xlu0 %v2060_v7, %s2748_s6  ;;  %p2682_p10 = pnand %p2681_p2, %p2677_p8 }
 0xb49   : > { %v2095_v48 = vpop.permute.xlu2 %2094 }
 0xb4a   : > { %2114 = vrot.lane.b32.xlu1 %v2095_v48, %s2748_s6 }
 0xb51   : > { %v2103_v46 = vpop.permute.xlu2 %2102  ;;  %v2089_v39 = vpop.permute.xlu0 %2088 }
 0xb52   : > { %2120 = vrot.lane.b32.xlu1 %v2103_v46, %s2748_s6  ;;  %2110 = vrot.lane.b32.xlu2 %v2089_v39, %s2748_s6 }
 0xb59   : > { %v2091_v11 = vpop.permute.xlu0 %2090 }
 0xb5a   : > { %2112 = vrot.lane.b32.xlu0 %v2091_v11, %s2748_s6 }
 0xb69   : > { %v2097_v44 = vpop.permute.xlu0 %2096 }
 0xb6a   : > { %2116 = vrot.lane.b32.xlu2 %v2097_v44, %s2748_s6 }
 0xb71   : > { %v2101_v24 = vpop.permute.xlu1 %2100 }
 0xb72   : > { %2118 = vrot.lane.b32.xlu0 %v2101_v24, %s2748_s6  ;;  %s2151_s6 = sshll.u32 %s264_s24, 4  ;;  %s2152_s6 = int_to_ptr.vmem [resolvable:$true] %s2151_s6 }
 0xb79   : > { %v2109_v3 = vpop.permute.xlu1 %2108  ;;  %v2107_v45 = vpop.permute.xlu0 %2106 }
 0xb7a   : > { %2131 = vst.msk [vmem:[%s264_s24 + $0x8] sm:$0xff] %vm282_vm0, %v2109_v3 }
 0xb7b   : > { %2130 = vst.msk [vmem:[%s264_s24] sm:$0xff] %vm282_vm0, %v2107_v45 }
 0xbac   : > { %v2111_v27 = vpop.permute.xlu2 %2110 }
 0xbad   : > { %2132 = vst.msk [vmem:[%s264_s24 + $0x10] sm:$0xff] %vm282_vm0, %v2111_v27 }
 0xbbc   : > { %v2115_v59 = vpop.permute.xlu1 %2114 }
 0xbbd   : > { %2134 = vst.msk [vmem:[%s264_s24 + $0x20] sm:$0xff] %vm282_vm0, %v2115_v59 }
 0xbc4   : > { %v2121_v4 = vpop.permute.xlu1 %2120  ;;  %v2117_v38 = vpop.permute.xlu2 %2116 }
 0xbc5   : > { %2137 = vst.msk [vmem:[%s264_s24 + $0x38] sm:$0xff] %vm282_vm0, %v2121_v4 }
 0xbc6   : > { %2135 = vst.msk [vmem:[%s264_s24 + $0x28] sm:$0xff] %vm282_vm0, %v2117_v38 }
 0xbcc   : > { %v2113_v18 = vpop.permute.xlu0 %2112 }
 0xbcd   : > { %2133 = vst.msk [vmem:[%s264_s24 + $0x18] sm:$0xff] %vm282_vm0, %v2113_v18 }
 0xbe4   : > { %v2119_v30 = vpop.permute.xlu0 %2118 }
 0xbe5   : > { %2136 = vst.msk [vmem:[%s264_s24 + $0x30] sm:$0xff] %vm282_vm0, %v2119_v30 }
 0xbe6   : > { %2685 = shalt.err (!%p2682_p10)
}
 0xbe7   : > { %s2763_s7 = smov 128   ;;  %s2764_s26 = smov 8  }
 0xbe8   : > { %2341 = dma.vmem_to_hbm [thread:$0]  (%p2873_p7), %s2152_s6, 1024, %s2154_s13, %s2139_s14, %s2763_s7, %s2763_s7, %s2764_s26  }
 0xbe9 PF: > { %s2168_s8 = sand.u32 1, %s2720_s15   ;;  %p3492_p12 = scmp.ge.s32.totalorder %s2732_s18, 2 }
 0xbea   : > { %s2169_s24 = scalar_lea.sflag [#allocation6], %s2168_s8 }
 0xbeb   : > { %p2358_p13 = pnand %p3492_p12, %p2825_p6 }
 0xbed   : > { %p2359_p0 = pneg %p2358_p13 }
 0xbef   : > { %2715 = dma.done.wait (%p2359_p0), %s2169_s24, 1024  }
 0xbf0   : > { %2717 = vsyncadd (%p2359_p0), %s2169_s24, 4294966272  ;;  %p19_p3 = scmp.ge.s32.totalorder %s2859_s20, 4   ;;  %s3493_s15 = smov %s2724_s16 }
 0xbf1   : > { %s3494_s16 = smov %s2728_s17  ;;  %s3495_s17 = smov %s2869_s25 }
 0xbf2   : > { %s3496_s18 = smov %s2859_s20  ;;  %21 = sbr.rel (!%p19_p3) target bundleno = 7 (0x7), region = 180 }
 0xbf7   :  { %2175 = vsyncpa [#allocation5], 1 }
 0xbf8   :  { %2177 = vsyncpa [#allocation5 + $0x1], 1 }
 0xbf9   :  { %2178 = vsyncpa [#allocation10], 1 }
 0xbfa   :  { %2179 = vsyncpa [#allocation6], 1 }
 0xbfb   :  { %2181 = vsyncpa [#allocation6 + $0x1], 1 }
 0xbfc   :  { %2182 = vsyncpa [#allocation7], 1 }
 0xbfd   :  { %2184 = vsyncpa [#allocation7 + $0x1], 1 }

</bundles_post_ra>
